<compile_context>
chip_gen: v5e
topology: v5e:2x2
jax: 0.10.0
libtpu: 0.0.40
codegen_flags: <defaults>
</compile_context>

<pallas_src>
import functools

import jax
import jax.numpy as jnp
from jax.experimental import pallas as pl
from jax.experimental.pallas import tpu as pltpu


# ---------------------------------------------------------------------------
# Fused bottleneck kernel (one batch element per grid step)
# ---------------------------------------------------------------------------
def _bottleneck_kernel(x_ref, w1_ref, b1_ref, w2_ref, b2_ref, w3_ref, b3_ref,
                       o_ref, pad_ref, *, H, W, Cin, P, Cout, Wp):
    HW = H * W

    # Pixel-major input tile; also the identity residual (Cin == Cout).
    x2d = x_ref[0]                                             # (HW, Cin)

    # ---- conv1 (1x1) + folded bn1 + relu --------------------------------
    out1 = jnp.maximum(
        jnp.dot(x2d, w1_ref[...], preferred_element_type=jnp.float32)
        + b1_ref[...], 0.0)                                    # (HW, P)

    # ---- conv2 (3x3, stride=1, pad=1) + folded bn2 + relu ---------------
    # 2-D padded scratch: rows [0, Wp) and [Wp+HW, Wp+HW+Wp) are the zero
    # halo, the image lives at rows [Wp, Wp+HW).  Wp is a multiple of 8, so
    # the fill store is sublane-aligned; each tap is a sublane-only shifted
    # slice (lane axis untouched).
    zero_halo = jnp.zeros((Wp, P), jnp.float32)
    pad_ref[0:Wp, :] = zero_halo
    pad_ref[Wp + HW:Wp + HW + Wp, :] = zero_halo
    pad_ref[Wp:Wp + HW, :] = out1

    # Width-boundary masks (a flat row shift by dx wraps across image rows).
    x_idx = jax.lax.broadcasted_iota(jnp.int32, (HW, P), 0) % W
    mask_l = (x_idx >= 1).astype(jnp.float32)        # taps reading x - 1
    mask_r = (x_idx <= W - 2).astype(jnp.float32)    # taps reading x + 1

    acc = jnp.zeros((HW, P), jnp.float32)
    for t in range(9):                               # statically unrolled taps
        dy, dx = t // 3 - 1, t % 3 - 1
        start = Wp + dy * W + dx                     # static, >= 0 since Wp >= W+1
        a = pad_ref[start:start + HW, :]             # sublane-shifted view
        if dx == -1:
            a = a * mask_l
        elif dx == 1:
            a = a * mask_r
        acc = acc + jnp.dot(a, w2_ref[t], preferred_element_type=jnp.float32)
    out2 = jnp.maximum(acc + b2_ref[...], 0.0)       # (HW, P)

    # ---- conv3 (1x1) + folded bn3 + residual + relu ---------------------
    y = (jnp.dot(out2, w3_ref[...], preferred_element_type=jnp.float32)
         + b3_ref[...] + x2d)
    o_ref[0] = jnp.maximum(y, 0.0)                   # (HW, Cout)


# ---------------------------------------------------------------------------
# Wrapper
# ---------------------------------------------------------------------------
def fold_bn(gamma, beta, mean, var, eps=1e-5):
    scale = gamma / jnp.sqrt(var + eps)
    bias = beta - mean * scale
    return scale[None, :], bias[None, :]             # (1, C)


def bottleneck_forward(x_nchw, params, *, eps=1e-5):
    x = jnp.transpose(x_nchw, (0, 2, 3, 1)).astype(jnp.float32)   # NCHW -> NHWC
    N, H, W, Cin = x.shape
    P = params["w1"].shape[1]
    Cout = params["w3"].shape[1]
    assert Cin == Cout, "identity residual requires inplanes == planes * 4"
    HW = H * W

    # Fold BN scale into conv weights (bias-only epilogues in the kernel).
    s1, b1 = fold_bn(*params["bn1"], eps)
    s2, b2 = fold_bn(*params["bn2"], eps)
    s3, b3 = fold_bn(*params["bn3"], eps)
    w1f = params["w1"] * s1            # (Cin, P)
    w2f = params["w2"] * s2[None]      # (9, P, P)
    w3f = params["w3"] * s3            # (P, Cout)

    x_in = x.reshape(N, HW, Cin)       # pixel-major HBM view (free in XLA)
    Wp = ((W + 1 + 7) // 8) * 8        # sublane-aligned halo depth >= W + 1

    kernel = functools.partial(_bottleneck_kernel,
                               H=H, W=W, Cin=Cin, P=P, Cout=Cout, Wp=Wp)
    out = pl.pallas_call(
        kernel,
        out_shape=jax.ShapeDtypeStruct((N, HW, Cout), jnp.float32),
        grid=(N,),
        in_specs=[
            pl.BlockSpec((1, HW, Cin), lambda b: (b, 0, 0)),   # x / residual
            pl.BlockSpec((Cin, P), lambda b: (0, 0)),          # w1 (bn folded)
            pl.BlockSpec((1, P), lambda b: (0, 0)),            # bias1
            pl.BlockSpec((9, P, P), lambda b: (0, 0, 0)),      # w2 taps (folded)
            pl.BlockSpec((1, P), lambda b: (0, 0)),            # bias2
            pl.BlockSpec((P, Cout), lambda b: (0, 0)),         # w3 (bn folded)
            pl.BlockSpec((1, Cout), lambda b: (0, 0)),         # bias3
        ],
        out_specs=pl.BlockSpec((1, HW, Cout), lambda b: (b, 0, 0)),
        scratch_shapes=[pltpu.VMEM((HW + 2 * Wp, P), jnp.float32)],
        compiler_params=pltpu.CompilerParams(
            dimension_semantics=("parallel",),
            vmem_limit_bytes=32 * 1024 * 1024),
    )(x_in, w1f, b1, w2f, b2, w3f, b3)

    out = out.reshape(N, H, W, Cout)
    return jnp.transpose(out, (0, 3, 1, 2))                    # NHWC -> NCHW


# ---------------------------------------------------------------------------
# Pure-JAX reference (for correctness check)
# ---------------------------------------------------------------------------
def reference_forward(x_nchw, params):
    x = jnp.transpose(x_nchw, (0, 2, 3, 1)).astype(jnp.float32)
    dn = ("NHWC", "HWIO", "NHWC")

    def bn(y, g, b, m, v, eps=1e-5):
        return (y - m) / jnp.sqrt(v + eps) * g + b

    C1 = params["w1"].shape[1]
    w1 = params["w1"].reshape(1, 1, -1, C1)
    w2 = params["w2"].reshape(3, 3, C1, C1)
    w3 = params["w3"].reshape(1, 1, C1, -1)

    out = jax.lax.conv_general_dilated(x, w1, (1, 1), "VALID", dimension_numbers=dn)
    out = jax.nn.relu(bn(out, *params["bn1"]))
    out = jax.lax.conv_general_dilated(out, w2, (1, 1), "SAME", dimension_numbers=dn)
    out = jax.nn.relu(bn(out, *params["bn2"]))
    out = jax.lax.conv_general_dilated(out, w3, (1, 1), "VALID", dimension_numbers=dn)
    out = bn(out, *params["bn3"])
    out = jax.nn.relu(out + x)
    return jnp.transpose(out, (0, 3, 1, 2))


# ---------------------------------------------------------------------------
# Main
# ---------------------------------------------------------------------------
if __name__ == "__main__":
    planes = 8
    inplanes = planes * 4        # identity residual (no downsample)
    N, H, W = 2, 16, 16

    key = jax.random.PRNGKey(0)
    keys = jax.random.split(key, 16)

    def bn_params(k, c):
        k1, k2, k3, k4 = jax.random.split(k, 4)
        gamma = 1.0 + 0.1 * jax.random.normal(k1, (c,), jnp.float32)
        beta = 0.1 * jax.random.normal(k2, (c,), jnp.float32)
        mean = 0.1 * jax.random.normal(k3, (c,), jnp.float32)
        var = 0.5 + jax.random.uniform(k4, (c,), jnp.float32)
        return (gamma, beta, mean, var)

    params = {
        # w1: (inplanes, planes), w2: (9, planes, planes) taps in (ky,kx)
        # row-major with each tap (Cin, Cout), w3: (planes, planes*4)
        "w1": 0.2 * jax.random.normal(keys[0], (inplanes, planes), jnp.float32),
        "w2": 0.2 * jax.random.normal(keys[1], (9, planes, planes), jnp.float32),
        "w3": 0.2 * jax.random.normal(keys[2], (planes, planes * 4), jnp.float32),
        "bn1": bn_params(keys[3], planes),
        "bn2": bn_params(keys[4], planes),
        "bn3": bn_params(keys[5], planes * 4),
    }

    x = jax.random.normal(keys[6], (N, inplanes, H, W), jnp.float32)   # NCHW

    out = bottleneck_forward(x, params)
    out = jax.block_until_ready(out)

    ref = reference_forward(x, params)
    assert out.shape == (N, planes * 4, H, W), out.shape
    err = float(jnp.max(jnp.abs(out - ref)))
    assert jnp.allclose(out, ref, atol=1e-4, rtol=1e-4), err

    print("KERNEL_OK")
</pallas_src>

<mosaic_0001>
module attributes {stable_mosaic.version = 11 : i64} {
  func.func @_bottleneck_kernel(%arg0: i32, %arg1: memref<1x256x32xf32, #tpu.memory_space<vmem>>, %arg2: memref<32x8xf32, #tpu.memory_space<vmem>>, %arg3: memref<1x8xf32, #tpu.memory_space<vmem>>, %arg4: memref<9x8x8xf32, #tpu.memory_space<vmem>>, %arg5: memref<1x8xf32, #tpu.memory_space<vmem>>, %arg6: memref<8x32xf32, #tpu.memory_space<vmem>>, %arg7: memref<1x32xf32, #tpu.memory_space<vmem>>, %arg8: memref<1x256x32xf32, #tpu.memory_space<vmem>>, %arg9: memref<304x8xf32, #tpu.memory_space<vmem>>) attributes {dimension_semantics = [#tpu.dimension_semantics<parallel>], iteration_bounds = array<i64: 2>, scalar_prefetch = 0 : i64, scratch_operands = 1 : i64, tpu.core_type = #tpu.core_type<tc>, window_params = [{transform_indices = @transform_0, window_bounds = array<i64: 1, 256, 32>}, {pipeline_mode = #tpu.pipeline_mode<synchronous>, transform_indices = @transform_1, window_bounds = array<i64: 32, 8>}, {pipeline_mode = #tpu.pipeline_mode<synchronous>, transform_indices = @transform_2, window_bounds = array<i64: 1, 8>}, {pipeline_mode = #tpu.pipeline_mode<synchronous>, transform_indices = @transform_3, window_bounds = array<i64: 9, 8, 8>}, {pipeline_mode = #tpu.pipeline_mode<synchronous>, transform_indices = @transform_4, window_bounds = array<i64: 1, 8>}, {pipeline_mode = #tpu.pipeline_mode<synchronous>, transform_indices = @transform_5, window_bounds = array<i64: 8, 32>}, {pipeline_mode = #tpu.pipeline_mode<synchronous>, transform_indices = @transform_6, window_bounds = array<i64: 1, 32>}, {transform_indices = @transform_7, window_bounds = array<i64: 1, 256, 32>}]} {
    %c0 = arith.constant 0 : index
    %c0_0 = arith.constant 0 : index
    %c0_1 = arith.constant 0 : index
    %0 = vector.load %arg1[%c0, %c0_0, %c0_1] : memref<1x256x32xf32, #tpu.memory_space<vmem>>, vector<1x256x32xf32>
    %1 = vector.shape_cast %0 : vector<1x256x32xf32> to vector<256x32xf32>
    %c0_2 = arith.constant 0 : index
    %c0_3 = arith.constant 0 : index
    %2 = vector.load %arg2[%c0_2, %c0_3] : memref<32x8xf32, #tpu.memory_space<vmem>>, vector<32x8xf32>
    %cst = arith.constant dense<0.000000e+00> : vector<256x8xf32>
    %3 = tpu.matmul %1, %2, %cst {dimension_numbers = #tpu.dot_dimension_numbers<[1], [0], [0], [1], [0, 0, 1, 1], [], []>} : vector<256x32xf32>, vector<32x8xf32>, vector<256x8xf32> -> vector<256x8xf32>
    %c0_4 = arith.constant 0 : index
    %c0_5 = arith.constant 0 : index
    %4 = vector.load %arg3[%c0_4, %c0_5] : memref<1x8xf32, #tpu.memory_space<vmem>>, vector<1x8xf32>
    %5 = vector.broadcast %4 : vector<1x8xf32> to vector<256x8xf32>
    %6 = arith.addf %3, %5 : vector<256x8xf32>
    %cst_6 = arith.constant 0.000000e+00 : f32
    %7 = vector.broadcast %cst_6 : f32 to vector<256x8xf32>
    %8 = arith.maximumf %6, %7 : vector<256x8xf32>
    %cst_7 = arith.constant 0.000000e+00 : f32
    %9 = vector.broadcast %cst_7 : f32 to vector<24x8xf32>
    %c0_8 = arith.constant 0 : index
    %c0_9 = arith.constant 0 : index
    %10 = vector.load %arg9[%c0_8, %c0_9] : memref<304x8xf32, #tpu.memory_space<vmem>>, vector<24x8xf32>
    tpu.vector_store %arg9[%c0_8, %c0_9], %9 {strides = array<i32>} : memref<304x8xf32, #tpu.memory_space<vmem>>, vector<24x8xf32>,
    %c280 = arith.constant 280 : index
    %c0_10 = arith.constant 0 : index
    %11 = vector.load %arg9[%c280, %c0_10] : memref<304x8xf32, #tpu.memory_space<vmem>>, vector<24x8xf32>
    tpu.vector_store %arg9[%c280, %c0_10], %9 {strides = array<i32>} : memref<304x8xf32, #tpu.memory_space<vmem>>, vector<24x8xf32>,
    %c24 = arith.constant 24 : index
    %c0_11 = arith.constant 0 : index
    %12 = vector.load %arg9[%c24, %c0_11] : memref<304x8xf32, #tpu.memory_space<vmem>>, vector<256x8xf32>
    tpu.vector_store %arg9[%c24, %c0_11], %8 {strides = array<i32>} : memref<304x8xf32, #tpu.memory_space<vmem>>, vector<256x8xf32>,
    %13 = tpu.iota {dimensions = array<i32: 0>} : vector<256x8xi32>
    %c16_i32 = arith.constant 16 : i32
    %c0_i32 = arith.constant 0 : i32
    %14 = arith.cmpi eq, %c16_i32, %c0_i32 : i32
    %c1_i32 = arith.constant 1 : i32
    %15 = arith.select %14, %c1_i32, %c16_i32 : i32
    %16 = vector.broadcast %15 : i32 to vector<256x8xi32>
    %17 = arith.remsi %13, %16 : vector<256x8xi32>
    %c0_i32_12 = arith.constant 0 : i32
    %18 = vector.broadcast %c0_i32_12 : i32 to vector<256x8xi32>
    %19 = arith.cmpi ne, %17, %18 : vector<256x8xi32>
    %c0_i32_13 = arith.constant 0 : i32
    %20 = vector.broadcast %c0_i32_13 : i32 to vector<256x8xi32>
    %21 = arith.cmpi slt, %17, %20 : vector<256x8xi32>
    %c0_i32_14 = arith.constant 0 : i32
    %22 = arith.cmpi slt, %15, %c0_i32_14 : i32
    %23 = vector.broadcast %22 : i1 to vector<256x8xi1>
    %24 = vector.broadcast %23 : vector<256x8xi1> to vector<256x8xi1>
    %25 = arith.xori %21, %24 : vector<256x8xi1>
    %26 = arith.andi %25, %19 : vector<256x8xi1>
    %27 = vector.broadcast %15 : i32 to vector<256x8xi32>
    %28 = arith.addi %17, %27 : vector<256x8xi32>
    %29 = arith.select %26, %28, %17 : vector<256x8xi1>, vector<256x8xi32>
    %c1_i32_15 = arith.constant 1 : i32
    %30 = vector.broadcast %c1_i32_15 : i32 to vector<256x8xi32>
    %31 = arith.cmpi sge, %29, %30 : vector<256x8xi32>
    %32 = arith.extui %31 : vector<256x8xi1> to vector<256x8xi32>
    %33 = arith.sitofp %32 : vector<256x8xi32> to vector<256x8xf32>
    %c14_i32 = arith.constant 14 : i32
    %34 = vector.broadcast %c14_i32 : i32 to vector<256x8xi32>
    %35 = arith.cmpi sle, %29, %34 : vector<256x8xi32>
    %36 = arith.extui %35 : vector<256x8xi1> to vector<256x8xi32>
    %37 = arith.sitofp %36 : vector<256x8xi32> to vector<256x8xf32>
    %cst_16 = arith.constant 0.000000e+00 : f32
    %38 = vector.broadcast %cst_16 : f32 to vector<256x8xf32>
    %c7 = arith.constant 7 : index
    %c0_17 = arith.constant 0 : index
    %39 = vector.load %arg9[%c7, %c0_17] : memref<304x8xf32, #tpu.memory_space<vmem>>, vector<256x8xf32>
    %40 = arith.mulf %39, %33 : vector<256x8xf32>
    %c0_18 = arith.constant 0 : index
    %c0_19 = arith.constant 0 : index
    %c0_20 = arith.constant 0 : index
    %41 = vector.load %arg4[%c0_18, %c0_19, %c0_20] : memref<9x8x8xf32, #tpu.memory_space<vmem>>, vector<1x8x8xf32>
    %42 = vector.shape_cast %41 : vector<1x8x8xf32> to vector<8x8xf32>
    %cst_21 = arith.constant dense<0.000000e+00> : vector<256x8xf32>
    %43 = tpu.matmul %40, %42, %cst_21 {dimension_numbers = #tpu.dot_dimension_numbers<[1], [0], [0], [1], [0, 0, 1, 1], [], []>} : vector<256x8xf32>, vector<8x8xf32>, vector<256x8xf32> -> vector<256x8xf32>
    %44 = arith.addf %38, %43 : vector<256x8xf32>
    %c8 = arith.constant 8 : index
    %c0_22 = arith.constant 0 : index
    %45 = vector.load %arg9[%c8, %c0_22] : memref<304x8xf32, #tpu.memory_space<vmem>>, vector<256x8xf32>
    %c1 = arith.constant 1 : index
    %c0_23 = arith.constant 0 : index
    %c0_24 = arith.constant 0 : index
    %46 = vector.load %arg4[%c1, %c0_23, %c0_24] : memref<9x8x8xf32, #tpu.memory_space<vmem>>, vector<1x8x8xf32>
    %47 = vector.shape_cast %46 : vector<1x8x8xf32> to vector<8x8xf32>
    %cst_25 = arith.constant dense<0.000000e+00> : vector<256x8xf32>
    %48 = tpu.matmul %45, %47, %cst_25 {dimension_numbers = #tpu.dot_dimension_numbers<[1], [0], [0], [1], [0, 0, 1, 1], [], []>} : vector<256x8xf32>, vector<8x8xf32>, vector<256x8xf32> -> vector<256x8xf32>
    %49 = arith.addf %44, %48 : vector<256x8xf32>
    %c9 = arith.constant 9 : index
    %c0_26 = arith.constant 0 : index
    %50 = vector.load %arg9[%c9, %c0_26] : memref<304x8xf32, #tpu.memory_space<vmem>>, vector<256x8xf32>
    %51 = arith.mulf %50, %37 : vector<256x8xf32>
    %c2 = arith.constant 2 : index
    %c0_27 = arith.constant 0 : index
    %c0_28 = arith.constant 0 : index
    %52 = vector.load %arg4[%c2, %c0_27, %c0_28] : memref<9x8x8xf32, #tpu.memory_space<vmem>>, vector<1x8x8xf32>
    %53 = vector.shape_cast %52 : vector<1x8x8xf32> to vector<8x8xf32>
    %cst_29 = arith.constant dense<0.000000e+00> : vector<256x8xf32>
    %54 = tpu.matmul %51, %53, %cst_29 {dimension_numbers = #tpu.dot_dimension_numbers<[1], [0], [0], [1], [0, 0, 1, 1], [], []>} : vector<256x8xf32>, vector<8x8xf32>, vector<256x8xf32> -> vector<256x8xf32>
    %55 = arith.addf %49, %54 : vector<256x8xf32>
    %c23 = arith.constant 23 : index
    %c0_30 = arith.constant 0 : index
    %56 = vector.load %arg9[%c23, %c0_30] : memref<304x8xf32, #tpu.memory_space<vmem>>, vector<256x8xf32>
    %57 = arith.mulf %56, %33 : vector<256x8xf32>
    %c3 = arith.constant 3 : index
    %c0_31 = arith.constant 0 : index
    %c0_32 = arith.constant 0 : index
    %58 = vector.load %arg4[%c3, %c0_31, %c0_32] : memref<9x8x8xf32, #tpu.memory_space<vmem>>, vector<1x8x8xf32>
    %59 = vector.shape_cast %58 : vector<1x8x8xf32> to vector<8x8xf32>
    %cst_33 = arith.constant dense<0.000000e+00> : vector<256x8xf32>
    %60 = tpu.matmul %57, %59, %cst_33 {dimension_numbers = #tpu.dot_dimension_numbers<[1], [0], [0], [1], [0, 0, 1, 1], [], []>} : vector<256x8xf32>, vector<8x8xf32>, vector<256x8xf32> -> vector<256x8xf32>
    %61 = arith.addf %55, %60 : vector<256x8xf32>
    %c24_34 = arith.constant 24 : index
    %c0_35 = arith.constant 0 : index
    %62 = vector.load %arg9[%c24_34, %c0_35] : memref<304x8xf32, #tpu.memory_space<vmem>>, vector<256x8xf32>
    %c4 = arith.constant 4 : index
    %c0_36 = arith.constant 0 : index
    %c0_37 = arith.constant 0 : index
    %63 = vector.load %arg4[%c4, %c0_36, %c0_37] : memref<9x8x8xf32, #tpu.memory_space<vmem>>, vector<1x8x8xf32>
    %64 = vector.shape_cast %63 : vector<1x8x8xf32> to vector<8x8xf32>
    %cst_38 = arith.constant dense<0.000000e+00> : vector<256x8xf32>
    %65 = tpu.matmul %62, %64, %cst_38 {dimension_numbers = #tpu.dot_dimension_numbers<[1], [0], [0], [1], [0, 0, 1, 1], [], []>} : vector<256x8xf32>, vector<8x8xf32>, vector<256x8xf32> -> vector<256x8xf32>
    %66 = arith.addf %61, %65 : vector<256x8xf32>
    %c25 = arith.constant 25 : index
    %c0_39 = arith.constant 0 : index
    %67 = vector.load %arg9[%c25, %c0_39] : memref<304x8xf32, #tpu.memory_space<vmem>>, vector<256x8xf32>
    %68 = arith.mulf %67, %37 : vector<256x8xf32>
    %c5 = arith.constant 5 : index
    %c0_40 = arith.constant 0 : index
    %c0_41 = arith.constant 0 : index
    %69 = vector.load %arg4[%c5, %c0_40, %c0_41] : memref<9x8x8xf32, #tpu.memory_space<vmem>>, vector<1x8x8xf32>
    %70 = vector.shape_cast %69 : vector<1x8x8xf32> to vector<8x8xf32>
    %cst_42 = arith.constant dense<0.000000e+00> : vector<256x8xf32>
    %71 = tpu.matmul %68, %70, %cst_42 {dimension_numbers = #tpu.dot_dimension_numbers<[1], [0], [0], [1], [0, 0, 1, 1], [], []>} : vector<256x8xf32>, vector<8x8xf32>, vector<256x8xf32> -> vector<256x8xf32>
    %72 = arith.addf %66, %71 : vector<256x8xf32>
    %c39 = arith.constant 39 : index
    %c0_43 = arith.constant 0 : index
    %73 = vector.load %arg9[%c39, %c0_43] : memref<304x8xf32, #tpu.memory_space<vmem>>, vector<256x8xf32>
    %74 = arith.mulf %73, %33 : vector<256x8xf32>
    %c6 = arith.constant 6 : index
    %c0_44 = arith.constant 0 : index
    %c0_45 = arith.constant 0 : index
    %75 = vector.load %arg4[%c6, %c0_44, %c0_45] : memref<9x8x8xf32, #tpu.memory_space<vmem>>, vector<1x8x8xf32>
    %76 = vector.shape_cast %75 : vector<1x8x8xf32> to vector<8x8xf32>
    %cst_46 = arith.constant dense<0.000000e+00> : vector<256x8xf32>
    %77 = tpu.matmul %74, %76, %cst_46 {dimension_numbers = #tpu.dot_dimension_numbers<[1], [0], [0], [1], [0, 0, 1, 1], [], []>} : vector<256x8xf32>, vector<8x8xf32>, vector<256x8xf32> -> vector<256x8xf32>
    %78 = arith.addf %72, %77 : vector<256x8xf32>
    %c40 = arith.constant 40 : index
    %c0_47 = arith.constant 0 : index
    %79 = vector.load %arg9[%c40, %c0_47] : memref<304x8xf32, #tpu.memory_space<vmem>>, vector<256x8xf32>
    %c7_48 = arith.constant 7 : index
    %c0_49 = arith.constant 0 : index
    %c0_50 = arith.constant 0 : index
    %80 = vector.load %arg4[%c7_48, %c0_49, %c0_50] : memref<9x8x8xf32, #tpu.memory_space<vmem>>, vector<1x8x8xf32>
    %81 = vector.shape_cast %80 : vector<1x8x8xf32> to vector<8x8xf32>
    %cst_51 = arith.constant dense<0.000000e+00> : vector<256x8xf32>
    %82 = tpu.matmul %79, %81, %cst_51 {dimension_numbers = #tpu.dot_dimension_numbers<[1], [0], [0], [1], [0, 0, 1, 1], [], []>} : vector<256x8xf32>, vector<8x8xf32>, vector<256x8xf32> -> vector<256x8xf32>
    %83 = arith.addf %78, %82 : vector<256x8xf32>
    %c41 = arith.constant 41 : index
    %c0_52 = arith.constant 0 : index
    %84 = vector.load %arg9[%c41, %c0_52] : memref<304x8xf32, #tpu.memory_space<vmem>>, vector<256x8xf32>
    %85 = arith.mulf %84, %37 : vector<256x8xf32>
    %c8_53 = arith.constant 8 : index
    %c0_54 = arith.constant 0 : index
    %c0_55 = arith.constant 0 : index
    %86 = vector.load %arg4[%c8_53, %c0_54, %c0_55] : memref<9x8x8xf32, #tpu.memory_space<vmem>>, vector<1x8x8xf32>
    %87 = vector.shape_cast %86 : vector<1x8x8xf32> to vector<8x8xf32>
    %cst_56 = arith.constant dense<0.000000e+00> : vector<256x8xf32>
    %88 = tpu.matmul %85, %87, %cst_56 {dimension_numbers = #tpu.dot_dimension_numbers<[1], [0], [0], [1], [0, 0, 1, 1], [], []>} : vector<256x8xf32>, vector<8x8xf32>, vector<256x8xf32> -> vector<256x8xf32>
    %89 = arith.addf %83, %88 : vector<256x8xf32>
    %c0_57 = arith.constant 0 : index
    %c0_58 = arith.constant 0 : index
    %90 = vector.load %arg5[%c0_57, %c0_58] : memref<1x8xf32, #tpu.memory_space<vmem>>, vector<1x8xf32>
    %91 = vector.broadcast %90 : vector<1x8xf32> to vector<256x8xf32>
    %92 = arith.addf %89, %91 : vector<256x8xf32>
    %cst_59 = arith.constant 0.000000e+00 : f32
    %93 = vector.broadcast %cst_59 : f32 to vector<256x8xf32>
    %94 = arith.maximumf %92, %93 : vector<256x8xf32>
    %c0_60 = arith.constant 0 : index
    %c0_61 = arith.constant 0 : index
    %95 = vector.load %arg6[%c0_60, %c0_61] : memref<8x32xf32, #tpu.memory_space<vmem>>, vector<8x32xf32>
    %cst_62 = arith.constant dense<0.000000e+00> : vector<256x32xf32>
    %96 = tpu.matmul %94, %95, %cst_62 {dimension_numbers = #tpu.dot_dimension_numbers<[1], [0], [0], [1], [0, 0, 1, 1], [], []>} : vector<256x8xf32>, vector<8x32xf32>, vector<256x32xf32> -> vector<256x32xf32>
    %c0_63 = arith.constant 0 : index
    %c0_64 = arith.constant 0 : index
    %97 = vector.load %arg7[%c0_63, %c0_64] : memref<1x32xf32, #tpu.memory_space<vmem>>, vector<1x32xf32>
    %98 = vector.broadcast %97 : vector<1x32xf32> to vector<256x32xf32>
    %99 = arith.addf %96, %98 : vector<256x32xf32>
    %100 = arith.addf %99, %1 : vector<256x32xf32>
    %cst_65 = arith.constant 0.000000e+00 : f32
    %101 = vector.broadcast %cst_65 : f32 to vector<256x32xf32>
    %102 = arith.maximumf %100, %101 : vector<256x32xf32>
    %c0_66 = arith.constant 0 : index
    %c0_67 = arith.constant 0 : index
    %c0_68 = arith.constant 0 : index
    %103 = vector.load %arg8[%c0_66, %c0_67, %c0_68] : memref<1x256x32xf32, #tpu.memory_space<vmem>>, vector<1x256x32xf32>
    %104 = vector.shape_cast %103 : vector<1x256x32xf32> to vector<256x32xf32>
    %105 = vector.shape_cast %102 : vector<256x32xf32> to vector<1x256x32xf32>
    tpu.vector_store %arg8[%c0_66, %c0_67, %c0_68], %105 {strides = array<i32>} : memref<1x256x32xf32, #tpu.memory_space<vmem>>, vector<1x256x32xf32>,
    return
  }
  func.func @transform_0(%arg0: i32) -> (i32, i32, i32) {
    %c0_i32 = arith.constant 0 : i32
    %c0_i32_0 = arith.constant 0 : i32
    %c0_i32_1 = arith.constant 0 : i32
    return %arg0, %c0_i32, %c0_i32_0 : i32, i32, i32
  }
  func.func @transform_1(%arg0: i32) -> (i32, i32) {
    %c0_i32 = arith.constant 0 : i32
    %c0_i32_0 = arith.constant 0 : i32
    %c0_i32_1 = arith.constant 0 : i32
    return %c0_i32, %c0_i32_0 : i32, i32
  }
  func.func @transform_2(%arg0: i32) -> (i32, i32) {
    %c0_i32 = arith.constant 0 : i32
    %c0_i32_0 = arith.constant 0 : i32
    %c0_i32_1 = arith.constant 0 : i32
    return %c0_i32, %c0_i32_0 : i32, i32
  }
  func.func @transform_3(%arg0: i32) -> (i32, i32, i32) {
    %c0_i32 = arith.constant 0 : i32
    %c0_i32_0 = arith.constant 0 : i32
    %c0_i32_1 = arith.constant 0 : i32
    %c0_i32_2 = arith.constant 0 : i32
    return %c0_i32, %c0_i32_0, %c0_i32_1 : i32, i32, i32
  }
  func.func @transform_4(%arg0: i32) -> (i32, i32) {
    %c0_i32 = arith.constant 0 : i32
    %c0_i32_0 = arith.constant 0 : i32
    %c0_i32_1 = arith.constant 0 : i32
    return %c0_i32, %c0_i32_0 : i32, i32
  }
  func.func @transform_5(%arg0: i32) -> (i32, i32) {
    %c0_i32 = arith.constant 0 : i32
    %c0_i32_0 = arith.constant 0 : i32
    %c0_i32_1 = arith.constant 0 : i32
    return %c0_i32, %c0_i32_0 : i32, i32
  }
  func.func @transform_6(%arg0: i32) -> (i32, i32) {
    %c0_i32 = arith.constant 0 : i32
    %c0_i32_0 = arith.constant 0 : i32
    %c0_i32_1 = arith.constant 0 : i32
    return %c0_i32, %c0_i32_0 : i32, i32
  }
  func.func @transform_7(%arg0: i32) -> (i32, i32, i32) {
    %c0_i32 = arith.constant 0 : i32
    %c0_i32_0 = arith.constant 0 : i32
    %c0_i32_1 = arith.constant 0 : i32
    return %arg0, %c0_i32, %c0_i32_0 : i32, i32, i32
  }
}

</mosaic_0001>

<bundles_post_ra>
// kernel: tpu_custom_call.1
= control target key start
LH: loop header
LB: loop body
LE: loop exit
PB: predicated region body
PF: predicated region fallthrough
CT: control target
= control target key end

     0   :  { %s4757_s24 = smov 0   ;;  %s6324_s0 = inlined_call_operand.vmem [shape: f32[2,256,32], index: 0, kind: input, shape index: {}]   ;;  %s6325_s1 = inlined_call_operand.vmem [shape: f32[32,8], index: 1, kind: input, shape index: {}]   ;;  %s6326_s2 = inlined_call_operand.vmem [shape: f32[1,8], index: 2, kind: input, shape index: {}]   ;;  %s6327_s3 = inlined_call_operand.vmem [shape: f32[9,8,8], index: 3, kind: input, shape index: {}]   ;;  %s6328_s4 = inlined_call_operand.vmem [shape: f32[1,8], index: 4, kind: input, shape index: {}]   ;;  %s6329_s5 = inlined_call_operand.vmem [shape: f32[8,32], index: 5, kind: input, shape index: {}]   ;;  %s6330_s6 = inlined_call_operand.vmem [shape: f32[1,32], index: 6, kind: input, shape index: {}]   ;;  %s6331_s7 = inlined_call_operand.vmem [shape: f32[2,256,32], index: 7, kind: output, shape index: {}]  }
   0x1 LB: > { %s4244_s25 = sadd.s32 4294967295, %s4714_s24   ;;  %p4248_p0 = scmp.ge.s32.totalorder %s4714_s24, 1  ;;  %s4714_s24 = sphi %s4757_s24, %s17_s24  }
   0x2   : > { %p237_p1 = scmp.lt.s32.totalorder %s4714_s24, 3 }
   0x4   : > { %p238_p2 = pnand %p4248_p0, %p237_p1 }
   0x6   : > { %241 = sbr.rel (%p238_p2) target bundleno = 1181 (0x49d), region = 48 }
   0xb   : > { %v314_v0 = vld [vmem:[%s6325_s1 + $0x18] sm:$0xff]  ;;  %v313_v1 = vld [vmem:[%s6325_s1 + $0x10] sm:$0xff]  ;;  %p269_p3 = scmp.lt.s32.totalorder %s4244_s25, 1  ;;  %v312_v2 = vld [vmem:[%s6325_s1 + $0x8] sm:$0xff]  ;;  %vm319_vm0 = vcmask 261120   ;;  %vm561_vm1 = vcmask 64512   ;;  %v600_v40 = vlaneseq }
   0xc   : > { %428 = vmatpush.msra.mxu0 %v314_v0  ;;  %v311_v3 = vld [vmem:[%s6325_s1] sm:$0xff]  ;;  %v6332_v17 = vmov 0.0   ;;  %v4317_v34 = vld [vmem:[%s6327_s3 + $0x8] sm:$0xff]  ;;  %v4415_v42 = vld [vmem:[%s6327_s3 + $0x18] sm:$0xff] }
   0xd   : > { %s6504_s25 = smov (!%p269_p3, %s4244_s25), 1  ;;  %562 = vst.msk [vmem:[#allocation2] sm:$0xff] %vm561_vm1, %v6332_v17  ;;  %v4834_v21 = vld [vmem:[%s6326_s2] ss:$0 sm:$0xff]  ;;  %4649 = vmatpush.msra.mxu1 %v4317_v34  ;;  %v4867_v43 = vld [vmem:[%s6327_s3 + $0x10] sm:$0xff]  ;;  %v4870_v44 = vshrl.u32 %v600_v40, 7 }
   0xe   : > { %429 = vmatpush.msra.mxu0 %v313_v1  ;;  %s4647_s11 = sshll.u32 %s6504_s25, 8  ;;  %563 = vst.msk [vmem:[#allocation2 + $0x8] sm:$0xff] %vm561_vm1, %v6332_v17  ;;  %v1273_v35 = vld [vmem:[%s6327_s3] sm:$0xff]  ;;  %4651 = vmatpush.msra.mxu3 %v4867_v43 }
   0xf   : > { %s4785_s14 = scalar_lea.vmem %s6324_s0, %s4647_s11  ;;  %564 = vst.msk [vmem:[#allocation2 + $0x10] sm:$0xff] %vm561_vm1, %v6332_v17  ;;  %4650 = vmatpush.msra.mxu2 %v1273_v35  ;;  %v4448_v36 = vld [vmem:[%s6327_s3 + $0x20] sm:$0xff]  ;;  %2210 = vmatpush.msrb.mxu1 %v4415_v42  ;;  %v603_v48 = vadd.s32 16, %v4870_v44  ;;  %v602_v49 = vadd.s32 8, %v4870_v44  ;;  %v609_v63 = vadd.s32 64, %v4870_v44  ;;  %v608_v0 = vadd.s32 56, %v4870_v44  ;;  %s6138_s28 = scalar_lea.vmem %s6331_s7, %s4647_s11 }
  0x10   : > { %430 = vmatpush.msra.mxu0 %v312_v2  ;;  %v279_v4 = vld [vmem:[%s4785_s14] sm:$0xff]  ;;  %v280_v5 = vld [vmem:[%s4785_s14 + $0x8] sm:$0xff]  ;;  %v281_v6 = vld [vmem:[%s4785_s14 + $0x10] sm:$0xff]  ;;  %565 = vst.msk [vmem:[#allocation2 + $0x118] sm:$0xff] %vm561_vm1, %v6332_v17 }
  0x11   : > { %v282_v7 = vld [vmem:[%s4785_s14 + $0x18] sm:$0xff]  ;;  %v283_v8 = vld [vmem:[%s4785_s14 + $0x20] sm:$0xff]  ;;  %v284_v9 = vld [vmem:[%s4785_s14 + $0x28] sm:$0xff]  ;;  %566 = vst.msk [vmem:[#allocation2 + $0x120] sm:$0xff] %vm561_vm1, %v6332_v17  ;;  %2485 = vmatpush.msrb.mxu2 %v4448_v36  ;;  %v651_v51 = vand.u32 15, %v603_v48  ;;  %v644_v52 = vand.u32 15, %v602_v49 }
  0x12   : > { %431 = vmatpush.msra.mxu0 %v311_v3  ;;  %v285_v10 = vld [vmem:[%s4785_s14 + $0x30] sm:$0xff]  ;;  %v286_v11 = vld [vmem:[%s4785_s14 + $0x38] sm:$0xff]  ;;  %v287_v12 = vld [vmem:[%s4785_s14 + $0x40] sm:$0xff]  ;;  %567 = vst.msk [vmem:[#allocation2 + $0x128] sm:$0xff] %vm561_vm1, %v6332_v17 }
  0x13   : > { %4253 = vmatmul.msk.f32.vlgmr.msra.gmra.mxu0 %vm319_vm0, %v279_v4  ;;  %v288_v13 = vld [vmem:[%s4785_s14 + $0x48] sm:$0xff]  ;;  %v289_v14 = vld [vmem:[%s4785_s14 + $0x50] sm:$0xff]  ;;  %v290_v15 = vld [vmem:[%s4785_s14 + $0x58] sm:$0xff]  ;;  %vm1019_vm2 = vcmp.ge.s32.totalorder %v651_v51, 1  ;;  %vm1114_vm3 = vcmp.le.s32.totalorder %v644_v52, 14  ;;  %v604_v4 = vadd.s32 24, %v4870_v44 }
  0x14   : > { %v291_v16 = vld [vmem:[%s4785_s14 + $0x60] sm:$0xff]  ;;  %v292_v18 = vld [vmem:[%s4785_s14 + $0x68] sm:$0xff]  ;;  %v293_v19 = vld [vmem:[%s4785_s14 + $0x70] sm:$0xff]  ;;  %1419 = vmatpush.msrb.mxu0 %v4317_v34  ;;  %v4885_v59 = vsel %vm1019_vm2, 1.0, %v6332_v17  ;;  %v4888_v60 = vsel %vm1114_vm3, 1.0, %v6332_v17 }
  0x15   : > { %v294_v20 = vld [vmem:[%s4785_s14 + $0x78] sm:$0xff]  ;;  %v295_v23 = vld [vmem:[%s4785_s14 + $0x80] sm:$0xff]  ;;  %v296_v27 = vld [vmem:[%s4785_s14 + $0x88] sm:$0xff] }
  0x16   : > { %v297_v31 = vld [vmem:[%s4785_s14 + $0x90] sm:$0xff]  ;;  %1628 = vmatpush.msra.mxu0 %v1273_v35  ;;  %v298_v38 = vld [vmem:[%s4785_s14 + $0x98] sm:$0xff]  ;;  %v299_v46 = vld [vmem:[%s4785_s14 + $0xa0] sm:$0xff] }
  0x17   : > { %v300_v54 = vld [vmem:[%s4785_s14 + $0xa8] sm:$0xff]  ;;  %v301_v2 = vld [vmem:[%s4785_s14 + $0xb0] sm:$0xff] }
  0x1b   : > { %4254 = vmatmul.msk.f32.gmra.mxu0 %vm319_vm0, %v280_v5 }
  0x23   : > { %4255 = vmatmul.msk.f32.gmra.mxu0 %vm319_vm0, %v281_v6  ;;  %v693_v6 = vand.u32 15, %v609_v63 }
  0x25   : > { %vm1025_vm4 = vcmp.ge.s32.totalorder %v693_v6, 1 }
  0x2b   : > { %4256 = vmatmul.msk.f32.gmra.mxu0 %vm319_vm0, %v282_v7  ;;  %v686_v7 = vand.u32 15, %v608_v0  ;;  %v305_v0 = vld [vmem:[%s4785_s14 + $0xd0] sm:$0xff] }
  0x2d   : > { %vm1120_vm5 = vcmp.le.s32.totalorder %v686_v7, 14 }
  0x33   : > { %4257 = vmatmul.msk.f32.gmra.mxu0 %vm319_vm0, %v283_v8 }
  0x3b   : > { %4258 = vmatmul.msk.f32.gmra.mxu0 %vm319_vm0, %v284_v9 }
  0x43   : > { %4259 = vmatmul.msk.f32.gmra.mxu0 %vm319_vm0, %v285_v10  ;;  %v658_v10 = vand.u32 15, %v604_v4 }
  0x45   : > { %vm1116_vm6 = vcmp.le.s32.totalorder %v658_v10, 14 }
  0x4b   : > { %4260 = vmatmul.msk.f32.gmra.mxu0 %vm319_vm0, %v286_v11 }
  0x53   : > { %4261 = vmatmul.msk.f32.gmra.mxu0 %vm319_vm0, %v287_v12  ;;  %v302_v12 = vld [vmem:[%s4785_s14 + $0xb8] sm:$0xff] }
  0x5b   : > { %4262 = vmatmul.msk.f32.gmra.mxu0 %vm319_vm0, %v288_v13 }
  0x63   : > { %4263 = vmatmul.msk.f32.gmra.mxu0 %vm319_vm0, %v289_v14  ;;  %v4909_v14 = vsel %vm1025_vm4, 1.0, %v6332_v17 }
  0x6b   : > { %4264 = vmatmul.msk.f32.gmra.mxu0 %vm319_vm0, %v290_v15  ;;  %v4912_v15 = vsel %vm1120_vm5, 1.0, %v6332_v17 }
  0x73   : > { %4265 = vmatmul.msk.f32.gmra.mxu0 %vm319_vm0, %v291_v16 }
  0x7b   : > { %4266 = vmatmul.msk.f32.gmra.mxu0 %vm319_vm0, %v292_v18 }
  0x83   : > { %4267 = vmatmul.msk.f32.gmra.mxu0 %vm319_vm0, %v293_v19 }
  0x8b   : > { %4268 = vmatmul.msk.f32.gmra.mxu0 %vm319_vm0, %v294_v20 }
  0x90   : > { %v433_v22 = vpop.f32.mrf.mxu0 }
  0x91   : > { %v434_v24 = vadd.f32 %v4834_v21, %v433_v22 }
  0x93   : > { %v529_v25 = vmax.f32 %v434_v24, 0.0  ;;  %4269 = vmatmul.msk.f32.gmra.mxu0 %vm319_vm0, %v295_v23  ;;  %v4920_v24 = vsel %vm1116_vm6, 1.0, %v6332_v17 }
  0x95   : > { %568 = vst.msk [vmem:[#allocation2 + $0x18] sm:$0xff] %vm561_vm1, %v529_v25 }
  0x98   : > { %v436_v26 = vpop.f32.mrf.mxu0 }
  0x99   : > { %v437_v28 = vadd.f32 %v4834_v21, %v436_v26 }
  0x9b   : > { %v530_v29 = vmax.f32 %v437_v28, 0.0  ;;  %4270 = vmatmul.msk.f32.gmra.mxu0 %vm319_vm0, %v296_v27  ;;  %v611_v27 = vadd.s32 80, %v4870_v44  ;;  %v610_v28 = vadd.s32 72, %v4870_v44 }
  0x9d   : > { %569 = vst.msk [vmem:[#allocation2 + $0x20] sm:$0xff] %vm561_vm1, %v530_v29  ;;  %v707_v34 = vand.u32 15, %v611_v27  ;;  %v700_v35 = vand.u32 15, %v610_v28  ;;  %v615_v27 = vadd.s32 112, %v4870_v44  ;;  %v614_v28 = vadd.s32 104, %v4870_v44 }
  0x9f   : > { %vm1027_vm7 = vcmp.ge.s32.totalorder %v707_v34, 1  ;;  %vm1122_vm8 = vcmp.le.s32.totalorder %v700_v35, 14  ;;  %v728_v34 = vand.u32 15, %v614_v28 }
  0xa0   : > { %v439_v30 = vpop.f32.mrf.mxu0 }
  0xa1   : > { %v440_v32 = vadd.f32 %v4834_v21, %v439_v30  ;;  %v303_v30 = vld [vmem:[%s4785_s14 + $0xc0] sm:$0xff]  ;;  %vm1126_vm13 = vcmp.le.s32.totalorder %v728_v34, 14  ;;  %v1274_v34 = vld [vmem:[#allocation2 + $0x8] sm:$0xff] }
  0xa3   : > { %v531_v33 = vmax.f32 %v440_v32, 0.0  ;;  %4271 = vmatmul.msk.f32.gmra.mxu0 %vm319_vm0, %v297_v31  ;;  %v606_v32 = vadd.s32 40, %v4870_v44 }
  0xa5   : > { %570 = vst.msk [vmem:[#allocation2 + $0x28] sm:$0xff] %vm561_vm1, %v531_v33 }
  0xa8   : > { %v442_v37 = vpop.f32.mrf.mxu0 }
  0xa9   : > { %v443_v39 = vadd.f32 %v4834_v21, %v442_v37 }
  0xab   : > { %v532_v41 = vmax.f32 %v443_v39, 0.0  ;;  %4272 = vmatmul.msk.f32.gmra.mxu0 %vm319_vm0, %v298_v38  ;;  %v672_v39 = vand.u32 15, %v606_v32 }
  0xad   : > { %571 = vst.msk [vmem:[#allocation2 + $0x30] sm:$0xff] %vm561_vm1, %v532_v41  ;;  %v304_v41 = vld [vmem:[%s4785_s14 + $0xc8] sm:$0xff]  ;;  %vm1118_vm9 = vcmp.le.s32.totalorder %v672_v39, 14 }
  0xae   : > { %v308_v39 = vld [vmem:[%s4785_s14 + $0xe8] sm:$0xff] }
  0xb0   : > { %v445_v45 = vpop.f32.mrf.mxu0 }
  0xb1   : > { %v446_v47 = vadd.f32 %v4834_v21, %v445_v45  ;;  %v4940_v45 = vsel %vm1027_vm7, 1.0, %v6332_v17 }
  0xb3   : > { %v533_v50 = vmax.f32 %v446_v47, 0.0  ;;  %4273 = vmatmul.msk.f32.gmra.mxu0 %vm319_vm0, %v299_v46  ;;  %v4943_v46 = vsel %vm1122_vm8, 1.0, %v6332_v17 }
  0xb5   : > { %572 = vst.msk [vmem:[#allocation2 + $0x38] sm:$0xff] %vm561_vm1, %v533_v50 }
  0xb8   : > { %v448_v53 = vpop.f32.mrf.mxu0 }
  0xb9   : > { %v449_v55 = vadd.f32 %v4834_v21, %v448_v53  ;;  %v4951_v53 = vsel %vm1118_vm9, 1.0, %v6332_v17 }
  0xbb   : > { %v534_v56 = vmax.f32 %v449_v55, 0.0  ;;  %4274 = vmatmul.msk.f32.gmra.mxu0 %vm319_vm0, %v300_v54 }
  0xbc   : > { %v4881_v57 = vld [vmem:[#allocation2 + $0x37] sm:$0xff] }
  0xbd   : > { %v1731_v58 = vld [vmem:[#allocation2 + $0x31] sm:$0xff]  ;;  %573 = vst.msk [vmem:[#allocation2 + $0x40] sm:$0xff] %vm561_vm1, %v534_v56  ;;  %v4892_v61 = vmul.f32 %v4885_v59, %v4881_v57  ;;  %v613_v56 = vadd.s32 96, %v4870_v44 }
  0xbe   : > { %v4895_v62 = vmul.f32 %v4888_v60, %v1731_v58  ;;  %v612_v58 = vadd.s32 88, %v4870_v44 }
  0xc0   : > { %6361 = vst [vmem:[#allocation3_spill] sm:$0xff] %v4895_v62  ;;  %v451_v1 = vpop.f32.mrf.mxu0  ;;  %v714_v4 = vand.u32 15, %v612_v58  ;;  %v617_v58 = vadd.s32 128, %v4870_v44 }
  0xc1   : > { %v452_v3 = vadd.f32 %v4834_v21, %v451_v1 }
  0xc2   : > { %vm1124_vm11 = vcmp.le.s32.totalorder %v714_v4, 14  ;;  %v749_v4 = vand.u32 15, %v617_v58 }
  0xc3   : > { %v535_v5 = vmax.f32 %v452_v3, 0.0  ;;  %4275 = vmatmul.msk.f32.gmra.mxu0 %vm319_vm0, %v301_v2  ;;  %v721_v3 = vand.u32 15, %v613_v56 }
  0xc4   : > { %v1281_v8 = vld [vmem:[#allocation2 + $0x40] sm:$0xff]  ;;  %vm1033_vm14 = vcmp.ge.s32.totalorder %v749_v4, 1  ;;  %v621_v4 = vadd.s32 160, %v4870_v44 }
  0xc5   : > { %v1216_v9 = vld [vmem:[#allocation2 + $0x3f] sm:$0xff]  ;;  %574 = vst.msk [vmem:[#allocation2 + $0x48] sm:$0xff] %vm561_vm1, %v535_v5  ;;  %4325 = vmatmul.msk.f32.vlgmr.msra.gmra.mxu1 %vm561_vm1, %v1281_v8  ;;  %vm1029_vm10 = vcmp.ge.s32.totalorder %v721_v3, 1 }
  0xc6   : > { %4357 = vmatmul.msk.f32.vlgmr.msra.gmra.mxu2 %vm561_vm1, %v1216_v9  ;;  %v306_v9 = vld [vmem:[%s4785_s14 + $0xd8] sm:$0xff] }
  0xc8   : > { %v454_v11 = vpop.f32.mrf.mxu0 }
  0xc9   : > { %v455_v13 = vadd.f32 %v4834_v21, %v454_v11  ;;  %v4970_v11 = vsel %vm1029_vm10, 1.0, %v6332_v17 }
  0xcb   : > { %v536_v16 = vmax.f32 %v455_v13, 0.0  ;;  %4276 = vmatmul.msk.f32.gmra.mxu0 %vm319_vm0, %v302_v12  ;;  %v4973_v12 = vsel %vm1124_vm11, 1.0, %v6332_v17 }
  0xcc   : > { %v1282_v18 = vld [vmem:[#allocation2 + $0x48] sm:$0xff] }
  0xcd   : > { %v1217_v19 = vld [vmem:[#allocation2 + $0x47] sm:$0xff]  ;;  %575 = vst.msk [vmem:[#allocation2 + $0x50] sm:$0xff] %vm561_vm1, %v536_v16  ;;  %4326 = vmatmul.msk.f32.gmra.mxu1 %vm561_vm1, %v1282_v18 }
  0xce   : > { %v1733_v20 = vld [vmem:[#allocation2 + $0x41] sm:$0xff]  ;;  %v1249_v22 = vmul.f32 %v4909_v14, %v1217_v19 }
  0xcf   : > { %v1765_v23 = vmul.f32 %v4912_v15, %v1733_v20  ;;  %v2620_v25 = vld [vmem:[#allocation2 + $0x41] sm:$0xff] }
  0xd0   : > { %v4923_v26 = vmul.f32 %v4920_v24, %v2620_v25  ;;  %4358 = vmatmul.msk.f32.gmra.mxu2 %vm561_vm1, %v1249_v22  ;;  %v457_v29 = vpop.f32.mrf.mxu0 }
  0xd1   : > { %4390 = vmatmul.msk.f32.vlgmr.msra.gmra.mxu3 %vm561_vm1, %v1765_v23  ;;  %v458_v31 = vadd.f32 %v4834_v21, %v457_v29 }
  0xd2   : > { %6362 = vst [vmem:[#allocation4_spill] sm:$0xff] %v4923_v26 }
  0xd3   : > { %v537_v33 = vmax.f32 %v458_v31, 0.0  ;;  %4277 = vmatmul.msk.f32.gmra.mxu0 %vm319_vm0, %v303_v30  ;;  %v307_v30 = vld [vmem:[%s4785_s14 + $0xe0] sm:$0xff] }
  0xd4   : > { %v1283_v36 = vld [vmem:[#allocation2 + $0x50] sm:$0xff] }
  0xd5   : > { %576 = vst.msk [vmem:[#allocation2 + $0x58] sm:$0xff] %vm561_vm1, %v537_v33  ;;  %4327 = vmatmul.msk.f32.gmra.mxu1 %vm561_vm1, %v1283_v36  ;;  %v1218_v37 = vld [vmem:[#allocation2 + $0x4f] sm:$0xff]  ;;  %v735_v33 = vand.u32 15, %v615_v27 }
  0xd6   : > { %v1734_v38 = vld [vmem:[#allocation2 + $0x49] sm:$0xff] }
  0xd7   : > { %vm1031_vm12 = vcmp.ge.s32.totalorder %v735_v33, 1 }
  0xd8   : > { %4359 = vmatmul.msk.f32.gmra.mxu2 %vm561_vm1, %v1218_v37  ;;  %v460_v40 = vpop.f32.mrf.mxu0 }
  0xd9   : > { %4391 = vmatmul.msk.f32.gmra.mxu3 %vm561_vm1, %v1734_v38  ;;  %v461_v42 = vadd.f32 %v4834_v21, %v460_v40 }
  0xdb   : > { %v538_v47 = vmax.f32 %v461_v42, 0.0  ;;  %4278 = vmatmul.msk.f32.gmra.mxu0 %vm319_vm0, %v304_v41  ;;  %v4997_v41 = vsel %vm1031_vm12, 1.0, %v6332_v17  ;;  %v5000_v42 = vsel %vm1126_vm13, 1.0, %v6332_v17 }
  0xdc   : > { %v1284_v48 = vld [vmem:[#allocation2 + $0x58] sm:$0xff] }
  0xdd   : > { %v1219_v49 = vld [vmem:[#allocation2 + $0x57] sm:$0xff]  ;;  %577 = vst.msk [vmem:[#allocation2 + $0x60] sm:$0xff] %vm561_vm1, %v538_v47  ;;  %4328 = vmatmul.msk.f32.gmra.mxu1 %vm561_vm1, %v1284_v48 }
  0xde   : > { %v1735_v50 = vld [vmem:[#allocation2 + $0x51] sm:$0xff]  ;;  %v1251_v51 = vmul.f32 %v4940_v45, %v1219_v49 }
  0xdf   : > { %v1767_v52 = vmul.f32 %v4943_v46, %v1735_v50  ;;  %v2622_v54 = vld [vmem:[#allocation2 + $0x51] sm:$0xff] }
  0xe0   : > { %v4954_v55 = vmul.f32 %v4951_v53, %v2622_v54  ;;  %4360 = vmatmul.msk.f32.gmra.mxu2 %vm561_vm1, %v1251_v51  ;;  %v463_v63 = vpop.f32.mrf.mxu0 }
  0xe1   : > { %4392 = vmatmul.msk.f32.gmra.mxu3 %vm561_vm1, %v1767_v52  ;;  %v464_v1 = vadd.f32 %v4834_v21, %v463_v63  ;;  %v616_v63 = vadd.s32 120, %v4870_v44 }
  0xe2   : > { %6363 = vst [vmem:[#allocation5_spill] sm:$0xff] %v4954_v55 }
  0xe3   : > { %v539_v2 = vmax.f32 %v464_v1, 0.0  ;;  %4279 = vmatmul.msk.f32.gmra.mxu0 %vm319_vm0, %v305_v0  ;;  %v309_v1 = vld [vmem:[%s4785_s14 + $0xf0] sm:$0xff] }
  0xe4   : > { %v1285_v5 = vld [vmem:[#allocation2 + $0x60] sm:$0xff] }
  0xe5   : > { %578 = vst.msk [vmem:[#allocation2 + $0x68] sm:$0xff] %vm561_vm1, %v539_v2  ;;  %4329 = vmatmul.msk.f32.gmra.mxu1 %vm561_vm1, %v1285_v5  ;;  %v1220_v6 = vld [vmem:[#allocation2 + $0x5f] sm:$0xff]  ;;  %v742_v5 = vand.u32 15, %v616_v63 }
  0xe6   : > { %v1736_v7 = vld [vmem:[#allocation2 + $0x59] sm:$0xff] }
  0xe7   : > { %vm1128_vm15 = vcmp.le.s32.totalorder %v742_v5, 14  ;;  %v620_v5 = vadd.s32 152, %v4870_v44 }
  0xe8   : > { %4361 = vmatmul.msk.f32.gmra.mxu2 %vm561_vm1, %v1220_v6  ;;  %v466_v8 = vpop.f32.mrf.mxu0 }
  0xe9   : > { %4393 = vmatmul.msk.f32.gmra.mxu3 %vm561_vm1, %v1736_v7  ;;  %v467_v10 = vadd.f32 %v4834_v21, %v466_v8 }
  0xeb   : > { %v540_v13 = vmax.f32 %v467_v10, 0.0  ;;  %4280 = vmatmul.msk.f32.gmra.mxu0 %vm319_vm0, %v306_v9  ;;  %v310_v10 = vld [vmem:[%s4785_s14 + $0xf8] sm:$0xff] }
  0xec   : > { %v1286_v16 = vld [vmem:[#allocation2 + $0x68] sm:$0xff] }
  0xed   : > { %v1221_v18 = vld [vmem:[#allocation2 + $0x67] sm:$0xff]  ;;  %579 = vst.msk [vmem:[#allocation2 + $0x70] sm:$0xff] %vm561_vm1, %v540_v13  ;;  %4330 = vmatmul.msk.f32.gmra.mxu1 %vm561_vm1, %v1286_v16  ;;  %v5024_v16 = vsel %vm1033_vm14, 1.0, %v6332_v17 }
  0xee   : > { %v1737_v19 = vld [vmem:[#allocation2 + $0x61] sm:$0xff]  ;;  %v1253_v20 = vmul.f32 %v4970_v11, %v1221_v18  ;;  %v5027_v18 = vsel %vm1128_vm15, 1.0, %v6332_v17 }
  0xef   : > { %v1769_v22 = vmul.f32 %v4973_v12, %v1737_v19  ;;  %v2624_v23 = vld [vmem:[#allocation2 + $0x61] sm:$0xff] }
  0xf0   : > { %v4981_v25 = vmul.f32 %v4912_v15, %v2624_v23  ;;  %4362 = vmatmul.msk.f32.gmra.mxu2 %vm561_vm1, %v1253_v20  ;;  %v469_v29 = vpop.f32.mrf.mxu0 }
  0xf1   : > { %4394 = vmatmul.msk.f32.gmra.mxu3 %vm561_vm1, %v1769_v22  ;;  %v470_v31 = vadd.f32 %v4834_v21, %v469_v29 }
  0xf2   : > { %6364 = vst [vmem:[#allocation6_spill] sm:$0xff] %v4981_v25 }
  0xf3   : > { %v541_v32 = vmax.f32 %v470_v31, 0.0  ;;  %4281 = vmatmul.msk.f32.gmra.mxu0 %vm319_vm0, %v307_v30  ;;  %v619_v31 = vadd.s32 144, %v4870_v44 }
  0xf4   : > { %v1287_v35 = vld [vmem:[#allocation2 + $0x70] sm:$0xff] }
  0xf5   : > { %580 = vst.msk [vmem:[#allocation2 + $0x78] sm:$0xff] %vm561_vm1, %v541_v32  ;;  %4331 = vmatmul.msk.f32.gmra.mxu1 %vm561_vm1, %v1287_v35  ;;  %v1222_v36 = vld [vmem:[#allocation2 + $0x6f] sm:$0xff]  ;;  %v618_v32 = vadd.s32 136, %v4870_v44 }
  0xf6   : > { %v1738_v37 = vld [vmem:[#allocation2 + $0x69] sm:$0xff] }
  0xf8   : > { %4363 = vmatmul.msk.f32.gmra.mxu2 %vm561_vm1, %v1222_v36  ;;  %v472_v38 = vpop.f32.mrf.mxu0 }
  0xf9   : > { %4395 = vmatmul.msk.f32.gmra.mxu3 %vm561_vm1, %v1738_v37  ;;  %v473_v40 = vadd.f32 %v4834_v21, %v472_v38  ;;  %v763_v37 = vand.u32 15, %v619_v31  ;;  %v756_v38 = vand.u32 15, %v618_v32 }
  0xfb   : > { %v542_v47 = vmax.f32 %v473_v40, 0.0  ;;  %4282 = vmatmul.msk.f32.gmra.mxu0 %vm319_vm0, %v308_v39  ;;  %vm1035_vm2 = vcmp.ge.s32.totalorder %v763_v37, 1  ;;  %vm1130_vm3 = vcmp.le.s32.totalorder %v756_v38, 14 }
  0xfc   : > { %v1288_v48 = vld [vmem:[#allocation2 + $0x78] sm:$0xff] }
  0xfd   : > { %v1223_v49 = vld [vmem:[#allocation2 + $0x77] sm:$0xff]  ;;  %581 = vst.msk [vmem:[#allocation2 + $0x80] sm:$0xff] %vm561_vm1, %v542_v47  ;;  %4332 = vmatmul.msk.f32.gmra.mxu1 %vm561_vm1, %v1288_v48 }
  0xfe   : > { %v1739_v50 = vld [vmem:[#allocation2 + $0x71] sm:$0xff]  ;;  %v1255_v51 = vmul.f32 %v4997_v41, %v1223_v49 }
  0xff   : > { %v1771_v52 = vmul.f32 %v5000_v42, %v1739_v50  ;;  %v2626_v54 = vld [vmem:[#allocation2 + $0x71] sm:$0xff] }
 0x100   : > { %v5008_v56 = vmul.f32 %v4943_v46, %v2626_v54  ;;  %4364 = vmatmul.msk.f32.gmra.mxu2 %vm561_vm1, %v1255_v51  ;;  %v475_v0 = vpop.f32.mrf.mxu0  ;;  %v1275_v49 = vld [vmem:[#allocation2 + $0x10] sm:$0xff]  ;;  %v5050_v51 = vsel %vm1035_vm2, 1.0, %v6332_v17 }
 0x101   : > { %4396 = vmatmul.msk.f32.gmra.mxu3 %vm561_vm1, %v1771_v52  ;;  %v476_v2 = vadd.f32 %v4834_v21, %v475_v0 }
 0x102   : > { %6365 = vst [vmem:[#allocation7_spill] sm:$0xff] %v5008_v56 }
 0x103   : > { %v543_v3 = vmax.f32 %v476_v2, 0.0  ;;  %4283 = vmatmul.msk.f32.gmra.mxu0 %vm319_vm0, %v309_v1 }
 0x104   : > { %v1289_v6 = vld [vmem:[#allocation2 + $0x80] sm:$0xff] }
 0x105   : > { %582 = vst.msk [vmem:[#allocation2 + $0x88] sm:$0xff] %vm561_vm1, %v543_v3  ;;  %4333 = vmatmul.msk.f32.gmra.mxu1 %vm561_vm1, %v1289_v6  ;;  %v1224_v7 = vld [vmem:[#allocation2 + $0x7f] sm:$0xff] }
 0x106   : > { %v1740_v8 = vld [vmem:[#allocation2 + $0x79] sm:$0xff] }
 0x108   : > { %4365 = vmatmul.msk.f32.gmra.mxu2 %vm561_vm1, %v1224_v7  ;;  %v478_v9 = vpop.f32.mrf.mxu0 }
 0x109   : > { %4397 = vmatmul.msk.f32.gmra.mxu3 %vm561_vm1, %v1740_v8  ;;  %v479_v13 = vadd.f32 %v4834_v21, %v478_v9  ;;  %v5068_v8 = vld [vmem:[#allocation2 + $0x18] sm:$0xff] }
 0x10b   : > { %v544_v19 = vmax.f32 %v479_v13, 0.0  ;;  %4284 = vmatmul.msk.f32.gmra.mxu0 %vm319_vm0, %v310_v10  ;;  %v777_v10 = vand.u32 15, %v621_v4  ;;  %v770_v13 = vand.u32 15, %v620_v5 }
 0x10c   : > { %v1290_v20 = vld [vmem:[#allocation2 + $0x88] sm:$0xff] }
 0x10d   : > { %v1225_v22 = vld [vmem:[#allocation2 + $0x87] sm:$0xff]  ;;  %583 = vst.msk [vmem:[#allocation2 + $0x90] sm:$0xff] %vm561_vm1, %v544_v19  ;;  %4334 = vmatmul.msk.f32.gmra.mxu1 %vm561_vm1, %v1290_v20  ;;  %vm1037_vm4 = vcmp.ge.s32.totalorder %v777_v10, 1  ;;  %vm1132_vm5 = vcmp.le.s32.totalorder %v770_v13, 14 }
 0x10e   : > { %v1741_v23 = vld [vmem:[#allocation2 + $0x81] sm:$0xff]  ;;  %v1257_v27 = vmul.f32 %v5024_v16, %v1225_v22  ;;  %v5083_v31 = vsel %vm1132_vm5, 1.0, %v6332_v17 }
 0x10f   : > { %v1773_v28 = vmul.f32 %v5027_v18, %v1741_v23  ;;  %v2628_v29 = vld [vmem:[#allocation2 + $0x81] sm:$0xff] }
 0x110   : > { %v5035_v30 = vmul.f32 %v4973_v12, %v2628_v29  ;;  %4366 = vmatmul.msk.f32.gmra.mxu2 %vm561_vm1, %v1257_v27  ;;  %v481_v33 = vpop.f32.mrf.mxu0  ;;  %v5080_v29 = vsel %vm1037_vm4, 1.0, %v6332_v17 }
 0x111   : > { %4398 = vmatmul.msk.f32.gmra.mxu3 %vm561_vm1, %v1773_v28  ;;  %v482_v35 = vadd.f32 %v4834_v21, %v481_v33  ;;  %v5077_v28 = vld [vmem:[#allocation2 + $0x20] sm:$0xff] }
 0x112   : > { %6366 = vst [vmem:[#allocation8_spill] sm:$0xff] %v5035_v30 }
 0x113   : > { %v545_v36 = vmax.f32 %v482_v35, 0.0  ;;  %4318 = vmatmul.msk.f32.vlgmr.msrb.gmra.mxu0 %vm561_vm1, %v1274_v34 }
 0x114   : > { %v1291_v39 = vld [vmem:[#allocation2 + $0x90] sm:$0xff]  ;;  %1903 = vmatpush.msrb.mxu0 %v4867_v43  ;;  %v5053_v43 = vsel %vm1130_vm3, 1.0, %v6332_v17 }
 0x115   : > { %584 = vst.msk [vmem:[#allocation2 + $0x98] sm:$0xff] %vm561_vm1, %v545_v36  ;;  %4335 = vmatmul.msk.f32.gmra.mxu1 %vm561_vm1, %v1291_v39  ;;  %v1226_v40 = vld [vmem:[#allocation2 + $0x8f] sm:$0xff] }
 0x116   : > { %v1742_v47 = vld [vmem:[#allocation2 + $0x89] sm:$0xff] }
 0x118   : > { %4367 = vmatmul.msk.f32.gmra.mxu2 %vm561_vm1, %v1226_v40  ;;  %v484_v48 = vpop.f32.mrf.mxu0  ;;  %v623_v40 = vadd.s32 176, %v4870_v44 }
 0x119   : > { %4399 = vmatmul.msk.f32.gmra.mxu3 %vm561_vm1, %v1742_v47  ;;  %v485_v50 = vadd.f32 %v4834_v21, %v484_v48  ;;  %v622_v47 = vadd.s32 168, %v4870_v44 }
 0x11b   : > { %v546_v52 = vmax.f32 %v485_v50, 0.0  ;;  %4319 = vmatmul.msk.f32.gmra.mxu0 %vm561_vm1, %v1275_v49  ;;  %v5099_v50 = vld [vmem:[#allocation2 + $0x28] sm:$0xff] }
 0x11c   : > { %v1292_v54 = vld [vmem:[#allocation2 + $0x98] sm:$0xff] }
 0x11d   : > { %v1227_v58 = vld [vmem:[#allocation2 + $0x97] sm:$0xff]  ;;  %585 = vst.msk [vmem:[#allocation2 + $0xa0] sm:$0xff] %vm561_vm1, %v546_v52  ;;  %4336 = vmatmul.msk.f32.gmra.mxu1 %vm561_vm1, %v1292_v54  ;;  %v791_v54 = vand.u32 15, %v623_v40 }
 0x11e   : > { %v1743_v63 = vld [vmem:[#allocation2 + $0x91] sm:$0xff]  ;;  %v1259_v0 = vmul.f32 %v5050_v51, %v1227_v58  ;;  %v784_v58 = vand.u32 15, %v622_v47 }
 0x11f   : > { %v1775_v1 = vmul.f32 %v5053_v43, %v1743_v63  ;;  %v2630_v2 = vld [vmem:[#allocation2 + $0x91] sm:$0xff]  ;;  %vm1039_vm6 = vcmp.ge.s32.totalorder %v791_v54, 1  ;;  %v1209_v54 = vld [vmem:[#allocation2 + $0x7] sm:$0xff] }
 0x120   : > { %v5061_v3 = vmul.f32 %v5000_v42, %v2630_v2  ;;  %4368 = vmatmul.msk.f32.gmra.mxu2 %vm561_vm1, %v1259_v0  ;;  %v487_v6 = vpop.f32.mrf.mxu0  ;;  %v4481_v0 = vld [vmem:[%s6327_s3 + $0x28] sm:$0xff]  ;;  %vm1134_vm7 = vcmp.le.s32.totalorder %v784_v58, 14  ;;  %v5134_v40 = vld [vmem:[#allocation2 + $0x38] sm:$0xff] }
 0x121   : > { %4400 = vmatmul.msk.f32.gmra.mxu3 %vm561_vm1, %v1775_v1  ;;  %v488_v7 = vadd.f32 %v4834_v21, %v487_v6  ;;  %v5111_v6 = vld [vmem:[#allocation2 + $0x30] sm:$0xff] }
 0x122   : > { %6367 = vst [vmem:[#allocation9_spill] sm:$0xff] %v5061_v3  ;;  %2792 = vmatpush.msrb.mxu3 %v4481_v0 }
 0x123   : > { %v547_v9 = vmax.f32 %v488_v7, 0.0  ;;  %4320 = vmatmul.msk.f32.gmra.mxu0 %vm561_vm1, %v5068_v8  ;;  %v5114_v7 = vsel %vm1039_vm6, 1.0, %v6332_v17 }
 0x124   : > { %v1293_v19 = vld [vmem:[#allocation2 + $0xa0] sm:$0xff] }
 0x125   : > { %586 = vst.msk [vmem:[#allocation2 + $0xa8] sm:$0xff] %vm561_vm1, %v547_v9  ;;  %4337 = vmatmul.msk.f32.gmra.mxu1 %vm561_vm1, %v1293_v19  ;;  %v1228_v20 = vld [vmem:[#allocation2 + $0x9f] sm:$0xff]  ;;  %v5117_v9 = vsel %vm1134_vm7, 1.0, %v6332_v17 }
 0x126   : > { %v1744_v22 = vld [vmem:[#allocation2 + $0x99] sm:$0xff] }
 0x128   : > { %4369 = vmatmul.msk.f32.gmra.mxu2 %vm561_vm1, %v1228_v20  ;;  %v490_v23 = vpop.f32.mrf.mxu0 }
 0x129   : > { %4401 = vmatmul.msk.f32.gmra.mxu3 %vm561_vm1, %v1744_v22  ;;  %v491_v27 = vadd.f32 %v4834_v21, %v490_v23 }
 0x12b   : > { %v548_v32 = vmax.f32 %v491_v27, 0.0  ;;  %4321 = vmatmul.msk.f32.gmra.mxu0 %vm561_vm1, %v5077_v28 }
 0x12c   : > { %v1294_v33 = vld [vmem:[#allocation2 + $0xa8] sm:$0xff] }
 0x12d   : > { %v1229_v34 = vld [vmem:[#allocation2 + $0xa7] sm:$0xff]  ;;  %587 = vst.msk [vmem:[#allocation2 + $0xb0] sm:$0xff] %vm561_vm1, %v548_v32  ;;  %4338 = vmatmul.msk.f32.gmra.mxu1 %vm561_vm1, %v1294_v33  ;;  %v637_v33 = vand.u32 15, %v4870_v44 }
 0x12e   : > { %v1745_v35 = vld [vmem:[#allocation2 + $0xa1] sm:$0xff]  ;;  %v1261_v36 = vmul.f32 %v5080_v29, %v1229_v34  ;;  %v625_v34 = vadd.s32 192, %v4870_v44 }
 0x12f   : > { %v1777_v37 = vmul.f32 %v5083_v31, %v1745_v35  ;;  %v2632_v38 = vld [vmem:[#allocation2 + $0xa1] sm:$0xff]  ;;  %v624_v35 = vadd.s32 184, %v4870_v44  ;;  %vm1017_vm8 = vcmp.ge.s32.totalorder %v637_v33, 1 }
 0x130   : > { %v5092_v39 = vmul.f32 %v5027_v18, %v2632_v38  ;;  %4370 = vmatmul.msk.f32.gmra.mxu2 %vm561_vm1, %v1261_v36  ;;  %v493_v48 = vpop.f32.mrf.mxu0  ;;  %v5141_v0 = vsel %vm1017_vm8, 1.0, %v6332_v17 }
 0x131   : > { %4402 = vmatmul.msk.f32.gmra.mxu3 %vm561_vm1, %v1777_v37  ;;  %v494_v49 = vadd.f32 %v4834_v21, %v493_v48  ;;  %v805_v48 = vand.u32 15, %v625_v34 }
 0x132   : > { %6368 = vst [vmem:[#allocation10_spill] sm:$0xff] %v5092_v39  ;;  %v6372_v39 = vmov 0.0  }
 0x133   : > { %v549_v52 = vmax.f32 %v494_v49, 0.0  ;;  %4322 = vmatmul.msk.f32.gmra.mxu0 %vm561_vm1, %v5099_v50  ;;  %v798_v49 = vand.u32 15, %v624_v35  ;;  %vm1041_vm9 = vcmp.ge.s32.totalorder %v805_v48, 1 }
 0x134   : > { %v1295_v63 = vld [vmem:[#allocation2 + $0xb0] sm:$0xff] }
 0x135   : > { %588 = vst.msk [vmem:[#allocation2 + $0xb8] sm:$0xff] %vm561_vm1, %v549_v52  ;;  %4339 = vmatmul.msk.f32.gmra.mxu1 %vm561_vm1, %v1295_v63  ;;  %v1230_v1 = vld [vmem:[#allocation2 + $0xaf] sm:$0xff]  ;;  %vm1136_vm10 = vcmp.le.s32.totalorder %v798_v49, 14 }
 0x136   : > { %v1746_v2 = vld [vmem:[#allocation2 + $0xa9] sm:$0xff] }
 0x137   : > { %v1210_v49 = vld [vmem:[#allocation2 + $0xf] sm:$0xff] }
 0x138   : > { %4371 = vmatmul.msk.f32.gmra.mxu2 %vm561_vm1, %v1230_v1  ;;  %v496_v4 = vpop.f32.mrf.mxu0  ;;  %v1241_v1 = vmul.f32 %v5141_v0, %v1209_v54 }
 0x139   : > { %4403 = vmatmul.msk.f32.gmra.mxu3 %vm561_vm1, %v1746_v2  ;;  %v497_v5 = vadd.f32 %v4834_v21, %v496_v4 }
 0x13b   : > { %v550_v10 = vmax.f32 %v497_v5, 0.0  ;;  %4323 = vmatmul.msk.f32.gmra.mxu0 %vm561_vm1, %v5111_v6 }
 0x13c   : > { %v1296_v13 = vld [vmem:[#allocation2 + $0xb8] sm:$0xff] }
 0x13d   : > { %v1231_v19 = vld [vmem:[#allocation2 + $0xb7] sm:$0xff]  ;;  %589 = vst.msk [vmem:[#allocation2 + $0xc0] sm:$0xff] %vm561_vm1, %v550_v10  ;;  %4340 = vmatmul.msk.f32.gmra.mxu1 %vm561_vm1, %v1296_v13 }
 0x13e   : > { %v1747_v20 = vld [vmem:[#allocation2 + $0xb1] sm:$0xff]  ;;  %v1263_v22 = vmul.f32 %v5114_v7, %v1231_v19  ;;  %v5148_v19 = vsel %vm1041_vm9, 1.0, %v6332_v17 }
 0x13f   : > { %v1779_v23 = vmul.f32 %v5117_v9, %v1747_v20  ;;  %v2634_v27 = vld [vmem:[#allocation2 + $0xb1] sm:$0xff]  ;;  %v5151_v20 = vsel %vm1136_vm10, 1.0, %v6332_v17 }
 0x140   : > { %v5126_v32 = vmul.f32 %v5053_v43, %v2634_v27  ;;  %4372 = vmatmul.msk.f32.gmra.mxu2 %vm561_vm1, %v1263_v22  ;;  %v499_v36 = vpop.f32.mrf.mxu0 }
 0x141   : > { %4404 = vmatmul.msk.f32.gmra.mxu3 %vm561_vm1, %v1779_v23  ;;  %v500_v37 = vadd.f32 %v4834_v21, %v499_v36 }
 0x142   : > { %6369 = vst [vmem:[#allocation11_spill] sm:$0xff] %v5126_v32  ;;  %v1442_v38 = vpop.f32.mrf.mxu1 }
 0x143   : > { %v551_v47 = vmax.f32 %v500_v37, 0.0  ;;  %4324 = vmatmul.msk.f32.gmra.mxu0 %vm561_vm1, %v5134_v40 }
 0x144   : > { %v1297_v52 = vld [vmem:[#allocation2 + $0xc0] sm:$0xff] }
 0x145   : > { %590 = vst.msk [vmem:[#allocation2 + $0xc8] sm:$0xff] %vm561_vm1, %v551_v47  ;;  %4341 = vmatmul.msk.f32.gmra.mxu1 %vm561_vm1, %v1297_v52  ;;  %v1232_v58 = vld [vmem:[#allocation2 + $0xbf] sm:$0xff]  ;;  %v626_v47 = vadd.s32 200, %v4870_v44 }
 0x146   : > { %v1748_v63 = vld [vmem:[#allocation2 + $0xb9] sm:$0xff] }
 0x148   : > { %4373 = vmatmul.msk.f32.gmra.mxu2 %vm561_vm1, %v1232_v58  ;;  %v502_v2 = vpop.f32.mrf.mxu0 }
 0x149   : > { %4405 = vmatmul.msk.f32.gmra.mxu3 %vm561_vm1, %v1748_v63  ;;  %v1651_v4 = vpop.f32.mrf.mxu2  ;;  %v503_v5 = vadd.f32 %v4834_v21, %v502_v2 }
 0x14a   : > { %v1652_v10 = vadd.f32 %v1651_v4, %v1442_v38  ;;  %v1445_v13 = vpop.f32.mrf.mxu1  ;;  %v627_v38 = vadd.s32 208, %v4870_v44 }
 0x14b   : > { %v552_v22 = vmax.f32 %v503_v5, 0.0  ;;  %4350 = vmatmul.msk.f32.vlgmr.msra.gmra.mxu0 %vm561_vm1, %v1241_v1  ;;  %v812_v5 = vand.u32 15, %v626_v47 }
 0x14c   : > { %v1298_v23 = vld [vmem:[#allocation2 + $0xc8] sm:$0xff]  ;;  %v819_v4 = vand.u32 15, %v627_v38 }
 0x14d   : > { %v1233_v27 = vld [vmem:[#allocation2 + $0xc7] sm:$0xff]  ;;  %591 = vst.msk [vmem:[#allocation2 + $0xd0] sm:$0xff] %vm561_vm1, %v552_v22  ;;  %4342 = vmatmul.msk.f32.gmra.mxu1 %vm561_vm1, %v1298_v23  ;;  %vm1138_vm12 = vcmp.le.s32.totalorder %v812_v5, 14 }
 0x14e   : > { %v1749_v33 = vld [vmem:[#allocation2 + $0xc1] sm:$0xff]  ;;  %v1265_v34 = vmul.f32 %v5148_v19, %v1233_v27  ;;  %vm1043_vm11 = vcmp.ge.s32.totalorder %v819_v4, 1 }
 0x14f   : > { %v1781_v35 = vmul.f32 %v5151_v20, %v1749_v33  ;;  %v2636_v36 = vld [vmem:[#allocation2 + $0xc1] sm:$0xff]  ;;  %v5179_v47 = vsel %vm1043_vm11, 1.0, %v6332_v17 }
 0x150   : > { %v5159_v37 = vmul.f32 %v5083_v31, %v2636_v36  ;;  %4374 = vmatmul.msk.f32.gmra.mxu2 %vm561_vm1, %v1265_v34  ;;  %v505_v48 = vpop.f32.mrf.mxu0  ;;  %v5171_v34 = vld [vmem:[#allocation2 + $0x17] sm:$0xff] }
 0x151   : > { %4406 = vmatmul.msk.f32.gmra.mxu3 %vm561_vm1, %v1781_v35  ;;  %v506_v52 = vadd.f32 %v4834_v21, %v505_v48  ;;  %v5182_v48 = vsel %vm1138_vm12, 1.0, %v6332_v17 }
 0x152   : > { %6370 = vst [vmem:[#allocation12_spill] sm:$0xff] %v5159_v37  ;;  %v1448_v54 = vpop.f32.mrf.mxu1 }
 0x153   : > { %v1654_v58 = vpop.f32.mrf.mxu2  ;;  %v553_v63 = vmax.f32 %v506_v52, 0.0  ;;  %4351 = vmatmul.msk.f32.gmra.mxu0 %vm561_vm1, %v1210_v49  ;;  %v605_v49 = vadd.s32 32, %v4870_v44 }
 0x154   : > { %v1655_v1 = vadd.f32 %v1654_v58, %v1445_v13  ;;  %v1926_v2 = vpop.f32.mrf.mxu3  ;;  %v1299_v23 = vld [vmem:[#allocation2 + $0xd0] sm:$0xff] }
 0x155   : > { %v5167_v22 = vadd.f32 %v1926_v2, %v1652_v10  ;;  %592 = vst.msk [vmem:[#allocation2 + $0xd8] sm:$0xff] %vm561_vm1, %v553_v63  ;;  %4343 = vmatmul.msk.f32.gmra.mxu1 %vm561_vm1, %v1299_v23  ;;  %v1234_v27 = vld [vmem:[#allocation2 + $0xcf] sm:$0xff]  ;;  %v1243_v10 = vmul.f32 %v4885_v59, %v5171_v34 }
 0x156   : > { %v1750_v33 = vld [vmem:[#allocation2 + $0xc9] sm:$0xff] }
 0x158   : > { %4375 = vmatmul.msk.f32.gmra.mxu2 %vm561_vm1, %v1234_v27  ;;  %v508_v13 = vpop.f32.mrf.mxu0 }
 0x159   : > { %4407 = vmatmul.msk.f32.gmra.mxu3 %vm561_vm1, %v1750_v33  ;;  %v509_v35 = vadd.f32 %v4834_v21, %v508_v13 }
 0x15a   : > { %v1451_v36 = vpop.f32.mrf.mxu1 }
 0x15b   : > { %v1657_v38 = vpop.f32.mrf.mxu2  ;;  %v554_v52 = vmax.f32 %v509_v35, 0.0  ;;  %4352 = vmatmul.msk.f32.gmra.mxu0 %vm561_vm1, %v1243_v10  ;;  %v665_v35 = vand.u32 15, %v605_v49  ;;  %v628_v10 = vadd.s32 216, %v4870_v44 }
 0x15c   : > { %v1658_v58 = vadd.f32 %v1657_v38, %v1448_v54  ;;  %v1929_v63 = vpop.f32.mrf.mxu3  ;;  %v1300_v4 = vld [vmem:[#allocation2 + $0xd8] sm:$0xff] }
 0x15d   : > { %v5186_v2 = vadd.f32 %v1929_v63, %v1655_v1  ;;  %v1235_v5 = vld [vmem:[#allocation2 + $0xd7] sm:$0xff]  ;;  %593 = vst.msk [vmem:[#allocation2 + $0xe0] sm:$0xff] %vm561_vm1, %v554_v52  ;;  %4344 = vmatmul.msk.f32.gmra.mxu1 %vm561_vm1, %v1300_v4  ;;  %v629_v1 = vadd.s32 224, %v4870_v44  ;;  %vm1021_vm13 = vcmp.ge.s32.totalorder %v665_v35, 1  ;;  %v5214_v35 = vld [vmem:[#allocation2 + $0x27] sm:$0xff] }
 0x15e   : > { %v1751_v23 = vld [vmem:[#allocation2 + $0xd1] sm:$0xff]  ;;  %v1267_v27 = vmul.f32 %v5179_v47, %v1235_v5  ;;  %v5203_v5 = vld [vmem:[#allocation2 + $0x1f] sm:$0xff]  ;;  %v5212_v3 = vsel %vm1021_vm13, 1.0, %v6372_v39 }
 0x15f   : > { %v1783_v33 = vmul.f32 %v5182_v48, %v1751_v23  ;;  %v5192_v13 = vld [vmem:[#allocation2 + $0xd1] sm:$0xff] }
 0x160   : > { %v5196_v54 = vmul.f32 %v5117_v9, %v5192_v13  ;;  %4376 = vmatmul.msk.f32.gmra.mxu2 %vm561_vm1, %v1267_v27  ;;  %v511_v38 = vpop.f32.mrf.mxu0  ;;  %v833_v27 = vand.u32 15, %v629_v1 }
 0x161   : > { %4408 = vmatmul.msk.f32.gmra.mxu3 %vm561_vm1, %v1783_v33  ;;  %v512_v52 = vadd.f32 %v4834_v21, %v511_v38  ;;  %v826_v33 = vand.u32 15, %v628_v10 }
 0x162   : > { %6371 = vst [vmem:[#allocation13_spill] sm:$0xff] %v5196_v54  ;;  %v1454_v63 = vpop.f32.mrf.mxu1  ;;  %vm1045_vm14 = vcmp.ge.s32.totalorder %v833_v27, 1 }
 0x163   : > { %v1660_v4 = vpop.f32.mrf.mxu2  ;;  %v555_v49 = vmax.f32 %v512_v52, 0.0  ;;  %4353 = vmatmul.msk.f32.gmra.mxu0 %vm561_vm1, %v5203_v5  ;;  %vm1140_vm15 = vcmp.le.s32.totalorder %v826_v33, 14  ;;  %v5222_v10 = vsel %vm1045_vm14, 1.0, %v6372_v39 }
 0x164   : > { %v1661_v23 = vadd.f32 %v1660_v4, %v1451_v36  ;;  %v1932_v17 = vpop.f32.mrf.mxu3  ;;  %v1301_v37 = vld [vmem:[#allocation2 + $0xe0] sm:$0xff]  ;;  %6373 = vst [vmem:[#allocation14_spill] sm:$0xff] %v5222_v10  ;;  %v5225_v52 = vsel %vm1140_vm15, 1.0, %v6372_v39  ;;  %v607_v4 = vadd.s32 48, %v4870_v44 }
 0x165   : > { %v5207_v54 = vadd.f32 %v1932_v17, %v1658_v58  ;;  %594 = vst.msk [vmem:[#allocation2 + $0xe8] sm:$0xff] %vm561_vm1, %v555_v49  ;;  %4345 = vmatmul.msk.f32.gmra.mxu1 %vm561_vm1, %v1301_v37  ;;  %v1236_v38 = vld [vmem:[#allocation2 + $0xdf] sm:$0xff]  ;;  %v1245_v58 = vmul.f32 %v5212_v3, %v5214_v35 }
 0x166   : > { %v1752_v32 = vld [vmem:[#allocation2 + $0xd9] sm:$0xff] }
 0x168   : > { %4377 = vmatmul.msk.f32.gmra.mxu2 %vm561_vm1, %v1236_v38  ;;  %v514_v17 = vpop.f32.mrf.mxu0 }
 0x169   : > { %4409 = vmatmul.msk.f32.gmra.mxu3 %vm561_vm1, %v1752_v32  ;;  %v515_v36 = vadd.f32 %v4834_v21, %v514_v17 }
 0x16a   : > { %v1457_v37 = vpop.f32.mrf.mxu1 }
 0x16b   : > { %v1663_v1 = vpop.f32.mrf.mxu2  ;;  %v556_v49 = vmax.f32 %v515_v36, 0.0  ;;  %4354 = vmatmul.msk.f32.gmra.mxu0 %vm561_vm1, %v1245_v58  ;;  %v679_v36 = vand.u32 15, %v607_v4  ;;  %v630_v58 = vadd.s32 232, %v4870_v44 }
 0x16c   : > { %v1664_v32 = vadd.f32 %v1663_v1, %v1454_v63  ;;  %v1935_v27 = vpop.f32.mrf.mxu3  ;;  %v1302_v38 = vld [vmem:[#allocation2 + $0xe8] sm:$0xff]  ;;  %v4580_v1 = vld [vmem:[%s6327_s3 + $0x40] sm:$0xff] }
 0x16d   : > { %v5229_v33 = vadd.f32 %v1935_v27, %v1661_v23  ;;  %v1237_v17 = vld [vmem:[#allocation2 + $0xe7] sm:$0xff]  ;;  %595 = vst.msk [vmem:[#allocation2 + $0xf0] sm:$0xff] %vm561_vm1, %v556_v49  ;;  %4346 = vmatmul.msk.f32.gmra.mxu1 %vm561_vm1, %v1302_v38  ;;  %v631_v23 = vadd.s32 240, %v4870_v44  ;;  %3681 = vmatpush.msra.mxu2 %v4580_v1  ;;  %v5249_v38 = vld [vmem:[#allocation2 + $0x2f] sm:$0xff]  ;;  %vm1023_vm2 = vcmp.ge.s32.totalorder %v679_v36, 1  ;;  %v840_v26 = vand.u32 15, %v630_v58 }
 0x16e   : > { %v1753_v30 = vld [vmem:[#allocation2 + $0xe1] sm:$0xff]  ;;  %v1269_v56 = vmul.f32 %v5222_v10, %v1237_v17 }
 0x16f   : > { %6374 = vst [vmem:[#allocation15_spill] sm:$0xff] %v5229_v33  ;;  %v1785_v25 = vmul.f32 %v5225_v52, %v1753_v30  ;;  %v5235_v55 = vld [vmem:[#allocation2 + $0xe1] sm:$0xff]  ;;  %vm1142_vm4 = vcmp.le.s32.totalorder %v840_v26, 14 }
 0x170   : > { %v5239_v63 = vmul.f32 %v5151_v20, %v5235_v55  ;;  %4378 = vmatmul.msk.f32.gmra.mxu2 %vm561_vm1, %v1269_v56  ;;  %v517_v30 = vpop.f32.mrf.mxu0 }
 0x171   : > { %4410 = vmatmul.msk.f32.gmra.mxu3 %vm561_vm1, %v1785_v25  ;;  %v518_v4 = vadd.f32 %v4834_v21, %v517_v30  ;;  %v4547_v21 = vld [vmem:[%s6327_s3 + $0x38] sm:$0xff] }
 0x172   : > { %6375 = vst [vmem:[#allocation16_spill] sm:$0xff] %v5239_v63  ;;  %v1460_v49 = vpop.f32.mrf.mxu1  ;;  %v847_v63 = vand.u32 15, %v631_v23  ;;  %3374 = vmatpush.msra.mxu1 %v4547_v21 }
 0x173   : > { %v1666_v27 = vpop.f32.mrf.mxu2  ;;  %v557_v56 = vmax.f32 %v518_v4, 0.0  ;;  %4355 = vmatmul.msk.f32.gmra.mxu0 %vm561_vm1, %v5249_v38 }
 0x174   : > { %v1667_v17 = vadd.f32 %v1666_v27, %v1457_v37  ;;  %v1938_v25 = vpop.f32.mrf.mxu3  ;;  %v1303_v10 = vld [vmem:[#allocation2 + $0xf0] sm:$0xff]  ;;  %v5261_v37 = vsel %vm1023_vm2, 1.0, %v6372_v39  ;;  %vm1047_vm3 = vcmp.ge.s32.totalorder %v847_v63, 1 }
 0x175   : > { %v5253_v62 = vadd.f32 %v1938_v25, %v1664_v32  ;;  %596 = vst.msk [vmem:[#allocation2 + $0xf8] sm:$0xff] %vm561_vm1, %v557_v56  ;;  %4347 = vmatmul.msk.f32.gmra.mxu1 %vm561_vm1, %v1303_v10  ;;  %v1238_v36 = vld [vmem:[#allocation2 + $0xef] sm:$0xff]  ;;  %v4664_v10 = vld [vmem:[%s6326_s2] ss:$0 sm:$0xff]  ;;  %v1247_v58 = vmul.f32 %v5261_v37, %v4881_v57  ;;  %v5271_v27 = vsel %vm1047_vm3, 1.0, %v6372_v39  ;;  %v5274_v56 = vsel %vm1142_vm4, 1.0, %v6372_v39 }
 0x176   : > { %v1754_v1 = vld [vmem:[#allocation2 + $0xe9] sm:$0xff]  ;;  %6377 = vst [vmem:[#allocation18_spill] sm:$0xff] %v5271_v27 }
 0x177   : > { %6376 = vst [vmem:[#allocation17_spill] sm:$0xff] %v5253_v62 }
 0x178   : > { %4379 = vmatmul.msk.f32.gmra.mxu2 %vm561_vm1, %v1238_v36  ;;  %v520_v32 = vpop.f32.mrf.mxu0  ;;  %6378 = vst [vmem:[#allocation19_spill] sm:$0xff] %v5274_v56 }
 0x179   : > { %4411 = vmatmul.msk.f32.gmra.mxu3 %vm561_vm1, %v1754_v1  ;;  %v521_v23 = vadd.f32 %v4664_v10, %v520_v32 }
 0x17a   : > { %v1463_v30 = vpop.f32.mrf.mxu1 }
 0x17b   : > { %v1669_v4 = vpop.f32.mrf.mxu2  ;;  %v558_v25 = vmax.f32 %v521_v23, 0.0  ;;  %4356 = vmatmul.msk.f32.gmra.mxu0 %vm561_vm1, %v1247_v58  ;;  %v1726_v58 = vld [vmem:[#allocation2 + $0x9] sm:$0xff] }
 0x17c   : > { %v1670_v63 = vadd.f32 %v1669_v4, %v1460_v49  ;;  %v1941_v26 = vpop.f32.mrf.mxu3  ;;  %v1304_v36 = vld [vmem:[#allocation2 + $0xf8] sm:$0xff] }
 0x17d   : > { %v5277_v21 = vadd.f32 %v1941_v26, %v1667_v17  ;;  %v1239_v1 = vld [vmem:[#allocation2 + $0xf7] sm:$0xff]  ;;  %597 = vst.msk [vmem:[#allocation2 + $0x100] sm:$0xff] %vm561_vm1, %v558_v25  ;;  %4348 = vmatmul.msk.f32.gmra.mxu1 %vm561_vm1, %v1304_v36  ;;  %v632_v17 = vadd.s32 248, %v4870_v44 }
 0x17e   : > { %v1755_v32 = vld [vmem:[#allocation2 + $0xf1] sm:$0xff]  ;;  %v1271_v57 = vmul.f32 %v5271_v27, %v1239_v1 }
 0x17f   : > { %v1787_v62 = vmul.f32 %v5274_v56, %v1755_v32  ;;  %v5283_v33 = vld [vmem:[#allocation2 + $0xf1] sm:$0xff]  ;;  %v854_v56 = vand.u32 15, %v632_v17 }
 0x180   : > { %v5287_v49 = vmul.f32 %v5182_v48, %v5283_v33  ;;  %4380 = vmatmul.msk.f32.gmra.mxu2 %vm561_vm1, %v1271_v57  ;;  %v523_v23 = vpop.f32.mrf.mxu0  ;;  %v1727_v57 = vld [vmem:[#allocation2 + $0x11] sm:$0xff] }
 0x181   : > { %4412 = vmatmul.msk.f32.gmra.mxu3 %vm561_vm1, %v1787_v62  ;;  %v524_v4 = vadd.f32 %v4664_v10, %v523_v23  ;;  %vm1144_vm5 = vcmp.le.s32.totalorder %v854_v56, 14 }
 0x182   : > { %6379 = vst [vmem:[#allocation20_spill] sm:$0xff] %v5287_v49  ;;  %v1466_v25 = vpop.f32.mrf.mxu1 }
 0x183   : > { %v1672_v26 = vpop.f32.mrf.mxu2  ;;  %v559_v36 = vmax.f32 %v524_v4, 0.0  ;;  %4383 = vmatmul.msk.f32.vlgmr.msrb.gmra.mxu0 %vm561_vm1, %v1726_v58  ;;  %v1759_v58 = vmul.f32 %v4888_v60, %v1727_v57  ;;  %v5301_v4 = vsel %vm1144_vm5, 1.0, %v6372_v39  ;;  %v1728_v57 = vld [vmem:[#allocation2 + $0x19] sm:$0xff] }
 0x184   : > { %v1673_v1 = vadd.f32 %v1672_v26, %v1463_v30  ;;  %v1944_v32 = vpop.f32.mrf.mxu3  ;;  %v1305_v49 = vld [vmem:[#allocation2 + $0x100] sm:$0xff]  ;;  %6380 = vst [vmem:[#allocation21_spill] sm:$0xff] %v5301_v4 }
 0x185   : > { %v5293_v27 = vadd.f32 %v1944_v32, %v1670_v63  ;;  %598 = vst.msk [vmem:[#allocation2 + $0x108] sm:$0xff] %vm561_vm1, %v559_v36  ;;  %4349 = vmatmul.msk.f32.gmra.mxu1 %vm561_vm1, %v1305_v49  ;;  %v1240_v62 = vld [vmem:[#allocation2 + $0xff] sm:$0xff]  ;;  %v2065_v32 = vmul.f32 %v5141_v0, %v5171_v34 }
 0x186   : > { %v1756_v44 = vld [vmem:[#allocation2 + $0xf9] sm:$0xff] }
 0x188   : > { %4381 = vmatmul.msk.f32.gmra.mxu2 %vm561_vm1, %v1240_v62  ;;  %v526_v30 = vpop.f32.mrf.mxu0 }
 0x189   : > { %4413 = vmatmul.msk.f32.gmra.mxu3 %vm561_vm1, %v1756_v44  ;;  %v527_v23 = vadd.f32 %v4664_v10, %v526_v30 }
 0x18a   : > { %v1469_v17 = vpop.f32.mrf.mxu1 }
 0x18b   : > { %v1675_v63 = vpop.f32.mrf.mxu2  ;;  %v560_v26 = vmax.f32 %v527_v23, 0.0  ;;  %4384 = vmatmul.msk.f32.gmra.mxu0 %vm561_vm1, %v1759_v58 }
 0x18c   : > { %v1676_v36 = vadd.f32 %v1675_v63, %v1466_v25  ;;  %v1947_v49 = vpop.f32.mrf.mxu3  ;;  %v1757_v56 = vld [vmem:[#allocation2 + $0x101] sm:$0xff] }
 0x18d   : > { %v5306_v62 = vadd.f32 %v1947_v49, %v1673_v1  ;;  %v5308_v44 = vld [vmem:[#allocation2 + $0x101] sm:$0xff]  ;;  %599 = vst.msk [vmem:[#allocation2 + $0x110] sm:$0xff] %vm561_vm1, %v560_v26  ;;  %4416 = vmatmul.msk.f32.vlgmr.msrb.gmra.mxu1 %vm561_vm1, %v2065_v32  ;;  %v1789_v39 = vmul.f32 %v5301_v4, %v1757_v56 }
 0x18e   : > { %v5315_v10 = vmul.f32 %v5225_v52, %v5308_v44  ;;  %v1729_v63 = vld [vmem:[#allocation2 + $0x21] sm:$0xff] }
 0x18f   : > { %v1761_v26 = vmul.f32 %v4920_v24, %v1729_v63 }
 0x190   : > { %6381 = vst [vmem:[#allocation22_spill] sm:$0xff] %v5315_v10  ;;  %4449 = vmatmul.msk.f32.vlgmr.msrb.gmra.mxu2 %vm561_vm1, %v5068_v8  ;;  %v5320_v34 = vpop.f32.mrf.mxu0 }
 0x191   : > { %4414 = vmatmul.msk.f32.gmra.mxu3 %vm561_vm1, %v1789_v39  ;;  %v2648_v39 = vmul.f32 %v4888_v60, %v1729_v63 }
 0x192   : > { %v1472_v25 = vpop.f32.mrf.mxu1 }
 0x193   : > { %v1678_v1 = vpop.f32.mrf.mxu2  ;;  %4385 = vmatmul.msk.f32.gmra.mxu0 %vm561_vm1, %v1728_v57 }
 0x194   : > { %v1679_v30 = vadd.f32 %v1678_v1, %v1469_v17  ;;  %v1950_v23 = vpop.f32.mrf.mxu3 }
 0x195   : > { %v5323_v58 = vadd.f32 %v1950_v23, %v1676_v36  ;;  %4417 = vmatmul.msk.f32.gmra.mxu1 %vm561_vm1, %v5203_v5  ;;  %v4514_v36 = vld [vmem:[%s6327_s3 + $0x30] sm:$0xff]  ;;  %v2067_v5 = vmul.f32 %v4885_v59, %v5214_v35 }
 0x196   : > { %3099 = vmatpush.msra.mxu0 %v4514_v36  ;;  %v5348_v23 = vld [vmem:[#allocation2 + $0x29] sm:$0xff] }
 0x198   : > { %4450 = vmatmul.msk.f32.gmra.mxu2 %vm561_vm1, %v5077_v28  ;;  %v5330_v8 = vpop.f32.mrf.mxu0 }
 0x199   : > { %4482 = vmatmul.msk.f32.vlgmr.msrb.gmra.mxu3 %vm561_vm1, %v1728_v57 }
 0x19a   : > { %v1475_v49 = vpop.f32.mrf.mxu1 }
 0x19b   : > { %v1681_v17 = vpop.f32.mrf.mxu2  ;;  %4386 = vmatmul.msk.f32.gmra.mxu0 %vm561_vm1, %v1761_v26 }
 0x19c   : > { %v1682_v32 = vadd.f32 %v1681_v17, %v1472_v25  ;;  %v1953_v56 = vpop.f32.mrf.mxu3 }
 0x19d   : > { %v5339_v28 = vadd.f32 %v1953_v56, %v1679_v30  ;;  %4418 = vmatmul.msk.f32.gmra.mxu1 %vm561_vm1, %v2067_v5 }
 0x1a0   : > { %4451 = vmatmul.msk.f32.gmra.mxu2 %vm561_vm1, %v5099_v50  ;;  %v5346_v1 = vpop.f32.mrf.mxu0  ;;  %v4665_v50 = vld [vmem:[#allocation2 + $0x31] sm:$0xff] }
 0x1a1   : > { %4483 = vmatmul.msk.f32.gmra.mxu3 %vm561_vm1, %v2648_v39  ;;  %v1763_v63 = vmul.f32 %v4665_v50, %v4951_v53 }
 0x1a2   : > { %v1478_v25 = vpop.f32.mrf.mxu1 }
 0x1a3   : > { %v1684_v57 = vpop.f32.mrf.mxu2  ;;  %4387 = vmatmul.msk.f32.gmra.mxu0 %vm561_vm1, %v5348_v23 }
 0x1a4   : > { %v1685_v26 = vadd.f32 %v1684_v57, %v1475_v49  ;;  %v1956_v59 = vpop.f32.mrf.mxu3 }
 0x1a5   : > { %v5352_v30 = vadd.f32 %v1956_v59, %v1682_v32  ;;  %4419 = vmatmul.msk.f32.gmra.mxu1 %vm561_vm1, %v5249_v38  ;;  %v4666_v32 = vld [vmem:[#allocation2 + $0x37] sm:$0xff] }
 0x1a6   : > { %v2069_v5 = vmul.f32 %v4666_v32, %v5212_v3 }
 0x1a8   : > { %4452 = vmatmul.msk.f32.gmra.mxu2 %vm561_vm1, %v5111_v6  ;;  %v5360_v60 = vpop.f32.mrf.mxu0  ;;  %v2650_v6 = vmul.f32 %v4665_v50, %v4920_v24  ;;  %v5381_v24 = vld [vmem:[#allocation2 + $0x40] sm:$0xff] }
 0x1a9   : > { %4484 = vmatmul.msk.f32.gmra.mxu3 %vm561_vm1, %v5348_v23  ;;  %6385 = vst [vmem:[#allocation26_spill] sm:$0xff] %v5381_v24  ;;  %v2039_v50 = vld [vmem:[#allocation2 + $0x47] sm:$0xff] }
 0x1aa   : > { %v1481_v49 = vpop.f32.mrf.mxu1 }
 0x1ab   : > { %v1687_v17 = vpop.f32.mrf.mxu2  ;;  %4388 = vmatmul.msk.f32.gmra.mxu0 %vm561_vm1, %v1763_v63 }
 0x1ac   : > { %v1688_v36 = vadd.f32 %v1687_v17, %v1478_v25  ;;  %v1959_v56 = vpop.f32.mrf.mxu3  ;;  %v5374_v17 = vld [vmem:[#allocation2 + $0x39] sm:$0xff] }
 0x1ad   : > { %v5365_v39 = vadd.f32 %v1959_v56, %v1685_v26  ;;  %4420 = vmatmul.msk.f32.gmra.mxu1 %vm561_vm1, %v2069_v5  ;;  %6383 = vst [vmem:[#allocation24_spill] sm:$0xff] %v5374_v17  ;;  %v2038_v56 = vld [vmem:[#allocation2 + $0x3f] sm:$0xff] }
 0x1af   : > { %6382 = vst [vmem:[#allocation23_spill] sm:$0xff] %v5365_v39  ;;  %v5397_v39 = vld [vmem:[#allocation2 + $0x48] sm:$0xff] }
 0x1b0   : > { %4453 = vmatmul.msk.f32.gmra.mxu2 %vm561_vm1, %v5134_v40  ;;  %v5372_v57 = vpop.f32.mrf.mxu0  ;;  %6387 = vst [vmem:[#allocation28_spill] sm:$0xff] %v5397_v39 }
 0x1b1   : > { %4485 = vmatmul.msk.f32.gmra.mxu3 %vm561_vm1, %v2650_v6  ;;  %v2071_v6 = vmul.f32 %v5261_v37, %v2039_v50 }
 0x1b2   : > { %v1484_v25 = vpop.f32.mrf.mxu1 }
 0x1b3   : > { %v1690_v59 = vpop.f32.mrf.mxu2  ;;  %4389 = vmatmul.msk.f32.gmra.mxu0 %vm561_vm1, %v5374_v17 }
 0x1b4   : > { %v1691_v63 = vadd.f32 %v1690_v59, %v1481_v49  ;;  %v1962_v10 = vpop.f32.mrf.mxu3  ;;  %v2954_v49 = vmul.f32 %v5141_v0, %v5214_v35 }
 0x1b5   : > { %v5378_v26 = vadd.f32 %v1962_v10, %v1688_v36  ;;  %4421 = vmatmul.msk.f32.gmra.mxu1 %vm561_vm1, %v2038_v56 }
 0x1b7   : > { %6384 = vst [vmem:[#allocation25_spill] sm:$0xff] %v5378_v26  ;;  %v4667_v26 = vld [vmem:[#allocation2 + $0x41] sm:$0xff] }
 0x1b8   : > { %4454 = vmatmul.msk.f32.gmra.mxu2 %vm561_vm1, %v5381_v24  ;;  %v5387_v40 = vpop.f32.mrf.mxu0  ;;  %v2652_v24 = vmul.f32 %v4667_v26, %v4951_v53  ;;  %v5409_v53 = vld [vmem:[#allocation2 + $0x50] sm:$0xff] }
 0x1b9   : > { %4486 = vmatmul.msk.f32.gmra.mxu3 %vm561_vm1, %v5374_v17  ;;  %6389 = vst [vmem:[#allocation30_spill] sm:$0xff] %v5409_v53  ;;  %v5411_v26 = vld [vmem:[#allocation2 + $0x49] sm:$0xff] }
 0x1ba   : > { %v1487_v32 = vpop.f32.mrf.mxu1  ;;  %6390 = vst [vmem:[#allocation31_spill] sm:$0xff] %v5411_v26 }
 0x1bb   : > { %v1693_v10 = vpop.f32.mrf.mxu2  ;;  %4515 = vmatmul.msk.f32.vlgmr.msra.gmra.mxu0 %vm561_vm1, %v2954_v49 }
 0x1bc   : > { %v1694_v36 = vadd.f32 %v1693_v10, %v1484_v25  ;;  %v1965_v5 = vpop.f32.mrf.mxu3 }
 0x1bd   : > { %v5393_v59 = vadd.f32 %v1965_v5, %v1691_v63  ;;  %4422 = vmatmul.msk.f32.gmra.mxu1 %vm561_vm1, %v2071_v6  ;;  %v2040_v5 = vld [vmem:[#allocation2 + $0x4f] sm:$0xff] }
 0x1bf   : > { %6386 = vst [vmem:[#allocation27_spill] sm:$0xff] %v5393_v59 }
 0x1c0   : > { %4455 = vmatmul.msk.f32.gmra.mxu2 %vm561_vm1, %v5397_v39  ;;  %v5402_v0 = vpop.f32.mrf.mxu0 }
 0x1c1   : > { %4487 = vmatmul.msk.f32.gmra.mxu3 %vm561_vm1, %v2652_v24 }
 0x1c2   : > { %v1490_v35 = vpop.f32.mrf.mxu1 }
 0x1c3   : > { %v1696_v25 = vpop.f32.mrf.mxu2  ;;  %4516 = vmatmul.msk.f32.gmra.mxu0 %vm561_vm1, %v5249_v38 }
 0x1c4   : > { %v1697_v49 = vadd.f32 %v1696_v25, %v1487_v32  ;;  %v1968_v10 = vpop.f32.mrf.mxu3  ;;  %v2041_v32 = vld [vmem:[#allocation2 + $0x57] sm:$0xff] }
 0x1c5   : > { %v5406_v63 = vadd.f32 %v1968_v10, %v1694_v36  ;;  %4423 = vmatmul.msk.f32.gmra.mxu1 %vm561_vm1, %v2040_v5  ;;  %v2073_v10 = vmul.f32 %v4909_v14, %v2041_v32 }
 0x1c7   : > { %6388 = vst [vmem:[#allocation29_spill] sm:$0xff] %v5406_v63 }
 0x1c8   : > { %4456 = vmatmul.msk.f32.gmra.mxu2 %vm561_vm1, %v5409_v53  ;;  %v5417_v24 = vpop.f32.mrf.mxu0  ;;  %v4668_v53 = vld [vmem:[#allocation2 + $0x51] sm:$0xff] }
 0x1c9   : > { %4488 = vmatmul.msk.f32.gmra.mxu3 %vm561_vm1, %v5411_v26  ;;  %v2654_v59 = vmul.f32 %v4668_v53, %v4912_v15  ;;  %v5426_v26 = vld [vmem:[#allocation2 + $0x58] sm:$0xff]  ;;  %v5437_v15 = vld [vmem:[#allocation2 + $0x60] sm:$0xff] }
 0x1ca   : > { %v1493_v6 = vpop.f32.mrf.mxu1  ;;  %6392 = vst [vmem:[#allocation33_spill] sm:$0xff] %v5426_v26  ;;  %v5439_v53 = vld [vmem:[#allocation2 + $0x59] sm:$0xff] }
 0x1cb   : > { %v1699_v38 = vpop.f32.mrf.mxu2  ;;  %4517 = vmatmul.msk.f32.gmra.mxu0 %vm561_vm1, %v4892_v61  ;;  %6394 = vst [vmem:[#allocation35_spill] sm:$0xff] %v5437_v15 }
 0x1cc   : > { %v1700_v36 = vadd.f32 %v1699_v38, %v1490_v35  ;;  %v1971_v25 = vpop.f32.mrf.mxu3  ;;  %6395 = vst [vmem:[#allocation36_spill] sm:$0xff] %v5439_v53 }
 0x1cd   : > { %v5422_v63 = vadd.f32 %v1971_v25, %v1697_v49  ;;  %4424 = vmatmul.msk.f32.gmra.mxu1 %vm561_vm1, %v2073_v10  ;;  %v2042_v25 = vld [vmem:[#allocation2 + $0x5f] sm:$0xff] }
 0x1cf   : > { %6391 = vst [vmem:[#allocation32_spill] sm:$0xff] %v5422_v63 }
 0x1d0   : > { %4457 = vmatmul.msk.f32.gmra.mxu2 %vm561_vm1, %v5426_v26  ;;  %v5431_v35 = vpop.f32.mrf.mxu0  ;;  %v5454_v26 = vld [vmem:[#allocation2 + $0x68] sm:$0xff] }
 0x1d1   : > { %4489 = vmatmul.msk.f32.gmra.mxu3 %vm561_vm1, %v2654_v59  ;;  %6397 = vst [vmem:[#allocation38_spill] sm:$0xff] %v5454_v26 }
 0x1d2   : > { %v1496_v38 = vpop.f32.mrf.mxu1 }
 0x1d3   : > { %v1702_v61 = vpop.f32.mrf.mxu2  ;;  %4518 = vmatmul.msk.f32.gmra.mxu0 %vm561_vm1, %v2038_v56  ;;  %v2958_v56 = vmul.f32 %v5212_v3, %v2039_v50 }
 0x1d4   : > { %v1703_v39 = vadd.f32 %v1702_v61, %v1493_v6  ;;  %v1974_v17 = vpop.f32.mrf.mxu3  ;;  %v2043_v6 = vld [vmem:[#allocation2 + $0x67] sm:$0xff] }
 0x1d5   : > { %v5434_v49 = vadd.f32 %v1974_v17, %v1700_v36  ;;  %4425 = vmatmul.msk.f32.gmra.mxu1 %vm561_vm1, %v2042_v25 }
 0x1d7   : > { %6393 = vst [vmem:[#allocation34_spill] sm:$0xff] %v5434_v49  ;;  %v2075_v49 = vmul.f32 %v4940_v45, %v2043_v6 }
 0x1d8   : > { %4458 = vmatmul.msk.f32.gmra.mxu2 %vm561_vm1, %v5437_v15  ;;  %v5445_v59 = vpop.f32.mrf.mxu0  ;;  %v4669_v15 = vld [vmem:[#allocation2 + $0x61] sm:$0xff] }
 0x1d9   : > { %4490 = vmatmul.msk.f32.gmra.mxu3 %vm561_vm1, %v5439_v53  ;;  %v2656_v53 = vmul.f32 %v4669_v15, %v4943_v46  ;;  %v5465_v46 = vld [vmem:[#allocation2 + $0x70] sm:$0xff] }
 0x1da   : > { %v1499_v17 = vpop.f32.mrf.mxu1  ;;  %6399 = vst [vmem:[#allocation40_spill] sm:$0xff] %v5465_v46  ;;  %v5467_v15 = vld [vmem:[#allocation2 + $0x69] sm:$0xff] }
 0x1db   : > { %v1705_v36 = vpop.f32.mrf.mxu2  ;;  %4519 = vmatmul.msk.f32.gmra.mxu0 %vm561_vm1, %v2958_v56  ;;  %6400 = vst [vmem:[#allocation41_spill] sm:$0xff] %v5467_v15 }
 0x1dc   : > { %v1706_v10 = vadd.f32 %v1705_v36, %v1496_v38  ;;  %v1977_v61 = vpop.f32.mrf.mxu3 }
 0x1dd   : > { %v5450_v63 = vadd.f32 %v1977_v61, %v1703_v39  ;;  %4426 = vmatmul.msk.f32.gmra.mxu1 %vm561_vm1, %v2075_v49  ;;  %v2044_v49 = vld [vmem:[#allocation2 + $0x6f] sm:$0xff] }
 0x1df   : > { %6396 = vst [vmem:[#allocation37_spill] sm:$0xff] %v5450_v63 }
 0x1e0   : > { %4459 = vmatmul.msk.f32.gmra.mxu2 %vm561_vm1, %v5454_v26  ;;  %v5459_v3 = vpop.f32.mrf.mxu0  ;;  %v5482_v26 = vld [vmem:[#allocation2 + $0x78] sm:$0xff] }
 0x1e1   : > { %4491 = vmatmul.msk.f32.gmra.mxu3 %vm561_vm1, %v2656_v53  ;;  %6402 = vst [vmem:[#allocation43_spill] sm:$0xff] %v5482_v26 }
 0x1e2   : > { %v1502_v50 = vpop.f32.mrf.mxu1 }
 0x1e3   : > { %v1708_v38 = vpop.f32.mrf.mxu2  ;;  %4520 = vmatmul.msk.f32.gmra.mxu0 %vm561_vm1, %v2040_v5  ;;  %v2960_v5 = vmul.f32 %v5261_v37, %v2041_v32 }
 0x1e4   : > { %v1709_v56 = vadd.f32 %v1708_v38, %v1499_v17  ;;  %v1980_v36 = vpop.f32.mrf.mxu3  ;;  %v2045_v17 = vld [vmem:[#allocation2 + $0x77] sm:$0xff] }
 0x1e5   : > { %v5462_v39 = vadd.f32 %v1980_v36, %v1706_v10  ;;  %4427 = vmatmul.msk.f32.gmra.mxu1 %vm561_vm1, %v2044_v49 }
 0x1e7   : > { %6398 = vst [vmem:[#allocation39_spill] sm:$0xff] %v5462_v39  ;;  %v2077_v39 = vmul.f32 %v4970_v11, %v2045_v17 }
 0x1e8   : > { %4460 = vmatmul.msk.f32.gmra.mxu2 %vm561_vm1, %v5465_v46  ;;  %v5473_v53 = vpop.f32.mrf.mxu0  ;;  %v4670_v46 = vld [vmem:[#allocation2 + $0x71] sm:$0xff] }
 0x1e9   : > { %4492 = vmatmul.msk.f32.gmra.mxu3 %vm561_vm1, %v5467_v15  ;;  %v2658_v15 = vmul.f32 %v4670_v46, %v4973_v12  ;;  %v5493_v12 = vld [vmem:[#allocation2 + $0x80] sm:$0xff] }
 0x1ea   : > { %v1505_v10 = vpop.f32.mrf.mxu1  ;;  %6404 = vst [vmem:[#allocation45_spill] sm:$0xff] %v5493_v12  ;;  %v5495_v46 = vld [vmem:[#allocation2 + $0x79] sm:$0xff] }
 0x1eb   : > { %v1711_v61 = vpop.f32.mrf.mxu2  ;;  %4521 = vmatmul.msk.f32.gmra.mxu0 %vm561_vm1, %v2960_v5  ;;  %6405 = vst [vmem:[#allocation46_spill] sm:$0xff] %v5495_v46 }
 0x1ec   : > { %v1712_v38 = vadd.f32 %v1711_v61, %v1502_v50  ;;  %v1983_v36 = vpop.f32.mrf.mxu3 }
 0x1ed   : > { %v5478_v63 = vadd.f32 %v1983_v36, %v1709_v56  ;;  %4428 = vmatmul.msk.f32.gmra.mxu1 %vm561_vm1, %v2077_v39  ;;  %v2046_v39 = vld [vmem:[#allocation2 + $0x7f] sm:$0xff] }
 0x1ef   : > { %6401 = vst [vmem:[#allocation42_spill] sm:$0xff] %v5478_v63 }
 0x1f0   : > { %4461 = vmatmul.msk.f32.gmra.mxu2 %vm561_vm1, %v5482_v26  ;;  %v5487_v37 = vpop.f32.mrf.mxu0 }
 0x1f1   : > { %4493 = vmatmul.msk.f32.gmra.mxu3 %vm561_vm1, %v2658_v15 }
 0x1f2   : > { %v1508_v32 = vpop.f32.mrf.mxu1 }
 0x1f3   : > { %v1714_v50 = vpop.f32.mrf.mxu2  ;;  %4522 = vmatmul.msk.f32.gmra.mxu0 %vm561_vm1, %v2042_v25  ;;  %v2962_v25 = vmul.f32 %v4909_v14, %v2043_v6  ;;  %v5516_v6 = vld [vmem:[#allocation2 + $0x88] sm:$0xff] }
 0x1f4   : > { %v1715_v5 = vadd.f32 %v1714_v50, %v1505_v10  ;;  %v1986_v61 = vpop.f32.mrf.mxu3  ;;  %v5503_v10 = vld [vmem:[#allocation2 + $0x87] sm:$0xff]  ;;  %6407 = vst [vmem:[#allocation48_spill] sm:$0xff] %v5516_v6 }
 0x1f5   : > { %v5490_v56 = vadd.f32 %v1986_v61, %v1712_v38  ;;  %4429 = vmatmul.msk.f32.gmra.mxu1 %vm561_vm1, %v2046_v39  ;;  %v3879_v38 = vld [vmem:[%s6329_s5] sm:$0xff] }
 0x1f6   : > { %3995 = vmatpush.msra.mxu3 %v3879_v38 }
 0x1f7   : > { %6403 = vst [vmem:[#allocation44_spill] sm:$0xff] %v5490_v56 }
 0x1f8   : > { %4462 = vmatmul.msk.f32.gmra.mxu2 %vm561_vm1, %v5493_v12  ;;  %v5501_v15 = vpop.f32.mrf.mxu0  ;;  %v2079_v12 = vmul.f32 %v4997_v41, %v5503_v10 }
 0x1f9   : > { %4494 = vmatmul.msk.f32.gmra.mxu3 %vm561_vm1, %v5495_v46  ;;  %v4671_v46 = vld [vmem:[#allocation2 + $0x81] sm:$0xff] }
 0x1fa   : > { %v1511_v36 = vpop.f32.mrf.mxu1  ;;  %v2660_v14 = vmul.f32 %v4671_v46, %v5000_v42  ;;  %v5528_v42 = vld [vmem:[#allocation2 + $0x90] sm:$0xff] }
 0x1fb   : > { %v1717_v50 = vpop.f32.mrf.mxu2  ;;  %4523 = vmatmul.msk.f32.gmra.mxu0 %vm561_vm1, %v2962_v25  ;;  %6409 = vst [vmem:[#allocation50_spill] sm:$0xff] %v5528_v42  ;;  %v5536_v46 = vld [vmem:[#allocation2 + $0x97] sm:$0xff] }
 0x1fc   : > { %v1718_v61 = vadd.f32 %v1717_v50, %v1508_v32  ;;  %v1989_v56 = vpop.f32.mrf.mxu3 }
 0x1fd   : > { %v5512_v63 = vadd.f32 %v1989_v56, %v1715_v5  ;;  %4430 = vmatmul.msk.f32.gmra.mxu1 %vm561_vm1, %v2079_v12  ;;  %v5524_v56 = vld [vmem:[#allocation2 + $0x8f] sm:$0xff] }
 0x1fe   : > { %v5530_v12 = vld [vmem:[#allocation2 + $0x89] sm:$0xff] }
 0x1ff   : > { %6406 = vst [vmem:[#allocation47_spill] sm:$0xff] %v5512_v63 }
 0x200   : > { %4463 = vmatmul.msk.f32.gmra.mxu2 %vm561_vm1, %v5516_v6  ;;  %v1905_v32 = vpop.f32.mrf.mxu0  ;;  %6410 = vst [vmem:[#allocation51_spill] sm:$0xff] %v5530_v12  ;;  %v4672_v6 = vld [vmem:[#allocation2 + $0x91] sm:$0xff] }
 0x201   : > { %4495 = vmatmul.msk.f32.gmra.mxu3 %vm561_vm1, %v2660_v14 }
 0x202   : > { %v1514_v38 = vpop.f32.mrf.mxu1 }
 0x203   : > { %v1720_v25 = vpop.f32.mrf.mxu2  ;;  %4524 = vmatmul.msk.f32.gmra.mxu0 %vm561_vm1, %v2044_v49 }
 0x204   : > { %v1721_v50 = vadd.f32 %v1720_v25, %v1511_v36  ;;  %v1992_v26 = vpop.f32.mrf.mxu3  ;;  %v2964_v36 = vmul.f32 %v4940_v45, %v2045_v17 }
 0x205   : > { %v5522_v5 = vadd.f32 %v1992_v26, %v1718_v61  ;;  %4431 = vmatmul.msk.f32.gmra.mxu1 %vm561_vm1, %v5524_v56  ;;  %v1631_v26 = vadd.f32 %v5417_v24, %v5320_v34  ;;  %v2662_v34 = vmul.f32 %v4672_v6, %v5027_v18  ;;  %v5548_v24 = vld [vmem:[#allocation2 + $0x98] sm:$0xff]  ;;  %v5562_v6 = vld [vmem:[#allocation2 + $0xa0] sm:$0xff] }
 0x206   : > { %v5558_v18 = vld [vmem:[#allocation2 + $0x9f] sm:$0xff] }
 0x207   : > { %6408 = vst [vmem:[#allocation49_spill] sm:$0xff] %v5522_v5 }
 0x208   : > { %4464 = vmatmul.msk.f32.gmra.mxu2 %vm561_vm1, %v5528_v42  ;;  %v1908_v49 = vpop.f32.mrf.mxu0  ;;  %v2081_v42 = vmul.f32 %v5024_v16, %v5536_v46 }
 0x209   : > { %4496 = vmatmul.msk.f32.gmra.mxu3 %vm561_vm1, %v5530_v12  ;;  %v2001_v12 = vadd.f32 %v1905_v32, %v1631_v26 }
 0x20a   : > { %v2212_v14 = vpop.f32.mrf.mxu1 }
 0x20b   : > { %v1723_v61 = vpop.f32.mrf.mxu2  ;;  %4525 = vmatmul.msk.f32.gmra.mxu0 %vm561_vm1, %v2964_v36  ;;  %v2308_v45 = vadd.f32 %v2212_v14, %v2001_v12  ;;  %v5564_v12 = vld [vmem:[#allocation2 + $0x99] sm:$0xff] }
 0x20c   : > { %v1724_v25 = vadd.f32 %v1723_v61, %v1514_v38  ;;  %v1995_v5 = vpop.f32.mrf.mxu3 }
 0x20d   : > { %v5544_v63 = vadd.f32 %v1995_v5, %v1721_v50  ;;  %4432 = vmatmul.msk.f32.gmra.mxu1 %vm561_vm1, %v2081_v42  ;;  %v1634_v50 = vadd.f32 %v5431_v35, %v5330_v8  ;;  %v5570_v8 = vld [vmem:[#allocation2 + $0xa7] sm:$0xff] }
 0x20f   : > { %v2002_v36 = vadd.f32 %v1908_v49, %v1634_v50  ;;  %v2083_v49 = vmul.f32 %v5050_v51, %v5570_v8 }
 0x210   : > { %4465 = vmatmul.msk.f32.gmra.mxu2 %vm561_vm1, %v5548_v24  ;;  %v1911_v5 = vpop.f32.mrf.mxu0 }
 0x211   : > { %4497 = vmatmul.msk.f32.gmra.mxu3 %vm561_vm1, %v2662_v34 }
 0x212   : > { %v2215_v17 = vpop.f32.mrf.mxu1 }
 0x213   : > { %v2487_v38 = vpop.f32.mrf.mxu2  ;;  %4526 = vmatmul.msk.f32.gmra.mxu0 %vm561_vm1, %v2046_v39  ;;  %v2309_v35 = vadd.f32 %v2215_v17, %v2002_v36  ;;  %v2966_v39 = vmul.f32 %v4970_v11, %v5503_v10  ;;  %v4673_v17 = vld [vmem:[#allocation2 + $0xa1] sm:$0xff] }
 0x214   : > { %v1998_v32 = vpop.f32.mrf.mxu3  ;;  %v2583_v26 = vadd.f32 %v2487_v38, %v2308_v45  ;;  %v1637_v38 = vadd.f32 %v5445_v59, %v5346_v1  ;;  %v2664_v11 = vmul.f32 %v4673_v17, %v5053_v43  ;;  %v5583_v10 = vld [vmem:[#allocation2 + $0xa8] sm:$0xff]  ;;  %v1640_v43 = vadd.f32 %v5459_v3, %v5360_v60 }
 0x215   : > { %v5556_v42 = vadd.f32 %v1998_v32, %v1724_v25  ;;  %4433 = vmatmul.msk.f32.gmra.mxu1 %vm561_vm1, %v5558_v18  ;;  %v5592_v59 = vld [vmem:[#allocation2 + $0xaf] sm:$0xff]  ;;  %v2968_v60 = vmul.f32 %v4997_v41, %v5536_v46  ;;  %v5619_v41 = vld [vmem:[#allocation2 + $0xb8] sm:$0xff] }
 0x216   : > { %v2003_v32 = vadd.f32 %v1911_v5, %v1637_v38  ;;  %v5598_v5 = vld [vmem:[#allocation2 + $0xb0] sm:$0xff] }
 0x218   : > { %4466 = vmatmul.msk.f32.gmra.mxu2 %vm561_vm1, %v5562_v6  ;;  %v1914_v50 = vpop.f32.mrf.mxu0 }
 0x219   : > { %4498 = vmatmul.msk.f32.gmra.mxu3 %vm561_vm1, %v5564_v12 }
 0x21a   : > { %v2218_v61 = vpop.f32.mrf.mxu1 }
 0x21b   : > { %v2490_v14 = vpop.f32.mrf.mxu2  ;;  %4527 = vmatmul.msk.f32.gmra.mxu0 %vm561_vm1, %v2966_v39  ;;  %v2310_v36 = vadd.f32 %v2218_v61, %v2003_v32  ;;  %v5600_v61 = vld [vmem:[#allocation2 + $0xa9] sm:$0xff] }
 0x21c   : > { %v2584_v25 = vadd.f32 %v2490_v14, %v2309_v35  ;;  %v2794_v34 = vpop.f32.mrf.mxu3 }
 0x21d   : > { %v5577_v45 = vadd.f32 %v2794_v34, %v2583_v26  ;;  %4434 = vmatmul.msk.f32.gmra.mxu1 %vm561_vm1, %v2083_v49  ;;  %v2004_v34 = vadd.f32 %v1914_v50, %v1640_v43 }
 0x220   : > { %4467 = vmatmul.msk.f32.gmra.mxu2 %vm561_vm1, %v5583_v10  ;;  %v1917_v49 = vpop.f32.mrf.mxu0 }
 0x221   : > { %4499 = vmatmul.msk.f32.gmra.mxu3 %vm561_vm1, %v2664_v11 }
 0x222   : > { %v2221_v26 = vpop.f32.mrf.mxu1 }
 0x223   : > { %v2493_v35 = vpop.f32.mrf.mxu2  ;;  %4528 = vmatmul.msk.f32.gmra.mxu0 %vm561_vm1, %v5524_v56  ;;  %v5606_v56 = vld [vmem:[#allocation2 + $0xb7] sm:$0xff] }
 0x224   : > { %v2585_v39 = vadd.f32 %v2493_v35, %v2310_v36  ;;  %v2797_v14 = vpop.f32.mrf.mxu3  ;;  %v2085_v50 = vmul.f32 %v5080_v29, %v5606_v56  ;;  %v1643_v36 = vadd.f32 %v5473_v53, %v5372_v57  ;;  %v1646_v53 = vadd.f32 %v5487_v37, %v5387_v40 }
 0x225   : > { %v5590_v1 = vadd.f32 %v2797_v14, %v2584_v25  ;;  %4435 = vmatmul.msk.f32.gmra.mxu1 %vm561_vm1, %v5592_v59  ;;  %v2311_v25 = vadd.f32 %v2221_v26, %v2004_v34  ;;  %v4674_v26 = vld [vmem:[#allocation2 + $0xb1] sm:$0xff] }
 0x226   : > { %v2666_v35 = vmul.f32 %v4674_v26, %v5083_v31  ;;  %v2005_v46 = vadd.f32 %v1917_v49, %v1643_v36  ;;  %v2054_v31 = vld [vmem:[#allocation2 + $0xbf] sm:$0xff] }
 0x227   : > { %v5631_v49 = vld [vmem:[#allocation2 + $0xc0] sm:$0xff] }
 0x228   : > { %4468 = vmatmul.msk.f32.gmra.mxu2 %vm561_vm1, %v5598_v5  ;;  %v1920_v14 = vpop.f32.mrf.mxu0 }
 0x229   : > { %4500 = vmatmul.msk.f32.gmra.mxu3 %vm561_vm1, %v5600_v61 }
 0x22a   : > { %v2224_v3 = vpop.f32.mrf.mxu1 }
 0x22b   : > { %v2496_v38 = vpop.f32.mrf.mxu2  ;;  %4529 = vmatmul.msk.f32.gmra.mxu0 %vm561_vm1, %v2968_v60  ;;  %v2312_v43 = vadd.f32 %v2224_v3, %v2005_v46  ;;  %v2006_v3 = vadd.f32 %v1920_v14, %v1646_v53  ;;  %v1649_v14 = vadd.f32 %v5501_v15, %v5402_v0  ;;  %v2056_v15 = vld [vmem:[#allocation2 + $0xcf] sm:$0xff] }
 0x22c   : > { %v2586_v17 = vadd.f32 %v2496_v38, %v2311_v25  ;;  %v2800_v11 = vpop.f32.mrf.mxu3  ;;  %v5633_v38 = vld [vmem:[#allocation2 + $0xb9] sm:$0xff] }
 0x22d   : > { %v5613_v32 = vadd.f32 %v2800_v11, %v2585_v39  ;;  %4436 = vmatmul.msk.f32.gmra.mxu1 %vm561_vm1, %v2085_v50  ;;  %v2970_v11 = vmul.f32 %v5024_v16, %v5570_v8  ;;  %v5649_v16 = vld [vmem:[#allocation2 + $0xc8] sm:$0xff] }
 0x230   : > { %4469 = vmatmul.msk.f32.gmra.mxu2 %vm561_vm1, %v5619_v41 }
 0x231   : > { %4501 = vmatmul.msk.f32.gmra.mxu3 %vm561_vm1, %v2666_v35  ;;  %v1923_v35 = vpop.f32.mrf.mxu0 }
 0x232   : > { %v2227_v39 = vpop.f32.mrf.mxu1  ;;  %v2007_v8 = vadd.f32 %v1923_v35, %v1649_v14 }
 0x233   : > { %v2499_v34 = vpop.f32.mrf.mxu2  ;;  %4530 = vmatmul.msk.f32.gmra.mxu0 %vm561_vm1, %v5558_v18  ;;  %v2055_v18 = vld [vmem:[#allocation2 + $0xc7] sm:$0xff] }
 0x234   : > { %v2587_v25 = vadd.f32 %v2499_v34, %v2312_v43  ;;  %v2803_v60 = vpop.f32.mrf.mxu3  ;;  %v2087_v26 = vmul.f32 %v5114_v7, %v2055_v18  ;;  %v4675_v43 = vld [vmem:[#allocation2 + $0xc1] sm:$0xff] }
 0x235   : > { %v5626_v57 = vadd.f32 %v2803_v60, %v2586_v17  ;;  %4437 = vmatmul.msk.f32.gmra.mxu1 %vm561_vm1, %v2054_v31  ;;  %v2313_v17 = vadd.f32 %v2227_v39, %v2006_v3  ;;  %v2668_v39 = vmul.f32 %v4675_v43, %v5117_v9  ;;  %v5659_v9 = vld [vmem:[#allocation2 + $0xd0] sm:$0xff]  ;;  %v2670_v43 = vmul.f32 %v5151_v20, %v5192_v13  ;;  %v5689_v20 = vld [vmem:[#allocation2 + $0xe0] sm:$0xff] }
 0x236   : > { %v5691_v13 = vld [vmem:[#allocation2 + $0xd9] sm:$0xff] }
 0x238   : > { %4470 = vmatmul.msk.f32.gmra.mxu2 %vm561_vm1, %v5631_v49 }
 0x239   : > { %4502 = vmatmul.msk.f32.gmra.mxu3 %vm561_vm1, %v5633_v38 }
 0x23a   : > { %v2230_v50 = vpop.f32.mrf.mxu1 }
 0x23b   : > { %v2502_v40 = vpop.f32.mrf.mxu2  ;;  %4531 = vmatmul.msk.f32.gmra.mxu0 %vm561_vm1, %v2970_v11  ;;  %v2314_v34 = vadd.f32 %v2230_v50, %v2007_v8  ;;  %v2057_v11 = vld [vmem:[#allocation2 + $0xd7] sm:$0xff] }
 0x23c   : > { %v2588_v37 = vadd.f32 %v2502_v40, %v2313_v17  ;;  %v2806_v36 = vpop.f32.mrf.mxu3  ;;  %v5661_v17 = vld [vmem:[#allocation2 + $0xc9] sm:$0xff]  ;;  %v2089_v35 = vmul.f32 %v5148_v19, %v2057_v11 }
 0x23d   : > { %v5643_v46 = vadd.f32 %v2806_v36, %v2587_v25  ;;  %4438 = vmatmul.msk.f32.gmra.mxu1 %vm561_vm1, %v2087_v26 }
 0x240   : > { %4471 = vmatmul.msk.f32.gmra.mxu2 %vm561_vm1, %v5649_v16 }
 0x241   : > { %4503 = vmatmul.msk.f32.gmra.mxu3 %vm561_vm1, %v2668_v39  ;;  %v5677_v39 = vld [vmem:[#allocation2 + $0xd8] sm:$0xff] }
 0x242   : > { %v2233_v60 = vpop.f32.mrf.mxu1 }
 0x243   : > { %v2505_v25 = vpop.f32.mrf.mxu2  ;;  %4532 = vmatmul.msk.f32.gmra.mxu0 %vm561_vm1, %v5592_v59  ;;  %v2315_v50 = vadd.f32 %v2233_v60, %v5167_v22  ;;  %v2972_v59 = vmul.f32 %v5050_v51, %v5606_v56 }
 0x244   : > { %v2589_v53 = vadd.f32 %v2505_v25, %v2314_v34  ;;  %v2809_v3 = vpop.f32.mrf.mxu3  ;;  %v2058_v25 = vld [vmem:[#allocation2 + $0xdf] sm:$0xff] }
 0x245   : > { %v5656_v0 = vadd.f32 %v2809_v3, %v2588_v37  ;;  %4439 = vmatmul.msk.f32.gmra.mxu1 %vm561_vm1, %v2056_v15 }
 0x248   : > { %4472 = vmatmul.msk.f32.gmra.mxu2 %vm561_vm1, %v5659_v9 }
 0x249   : > { %4504 = vmatmul.msk.f32.gmra.mxu3 %vm561_vm1, %v5661_v17 }
 0x24a   : > { %v2236_v40 = vpop.f32.mrf.mxu1 }
 0x24b   : > { %v2508_v37 = vpop.f32.mrf.mxu2  ;;  %4533 = vmatmul.msk.f32.gmra.mxu0 %vm561_vm1, %v2972_v59  ;;  %v2316_v51 = vadd.f32 %v2236_v40, %v5186_v2  ;;  %v2059_v2 = vld [vmem:[#allocation2 + $0xe7] sm:$0xff] }
 0x24c   : > { %v2590_v36 = vadd.f32 %v2508_v37, %v2315_v50  ;;  %v2812_v26 = vpop.f32.mrf.mxu3  ;;  %v2091_v40 = vmul.f32 %v5179_v47, %v2059_v2  ;;  %v2672_v37 = vmul.f32 %v5182_v48, %v5235_v55  ;;  %v5718_v55 = vld [vmem:[#allocation2 + $0xe9] sm:$0xff]  ;;  %v2061_v48 = vld [vmem:[#allocation2 + $0xf7] sm:$0xff] }
 0x24d   : > { %v5672_v14 = vadd.f32 %v2812_v26, %v2589_v53  ;;  %4440 = vmatmul.msk.f32.gmra.mxu1 %vm561_vm1, %v2089_v35 }
 0x250   : > { %4473 = vmatmul.msk.f32.gmra.mxu2 %vm561_vm1, %v5677_v39 }
 0x251   : > { %4505 = vmatmul.msk.f32.gmra.mxu3 %vm561_vm1, %v2670_v43  ;;  %v2060_v43 = vld [vmem:[#allocation2 + $0xef] sm:$0xff] }
 0x252   : > { %v2239_v22 = vpop.f32.mrf.mxu1 }
 0x253   : > { %v2511_v56 = vpop.f32.mrf.mxu2  ;;  %4534 = vmatmul.msk.f32.gmra.mxu0 %vm561_vm1, %v2054_v31  ;;  %v2317_v53 = vadd.f32 %v2239_v22, %v5207_v54  ;;  %v2974_v31 = vmul.f32 %v5080_v29, %v2055_v18  ;;  %v6411_v29 = vld [vmem:[#allocation15_spill] sm:$0xff]  ;;  %v6412_v22 = vld [vmem:[#allocation17_spill] sm:$0xff] }
 0x254   : > { %v5683_v8 = vadd.f32 %v2511_v56, %v2316_v51  ;;  %v2815_v34 = vpop.f32.mrf.mxu3  ;;  %v5716_v51 = vld [vmem:[#allocation2 + $0xf0] sm:$0xff] }
 0x255   : > { %v5686_v60 = vadd.f32 %v2815_v34, %v2590_v36  ;;  %4441 = vmatmul.msk.f32.gmra.mxu1 %vm561_vm1, %v2058_v25  ;;  %v5706_v36 = vld [vmem:[#allocation2 + $0xe8] sm:$0xff]  ;;  %v2976_v34 = vmul.f32 %v5114_v7, %v2057_v11 }
 0x258   : > { %4474 = vmatmul.msk.f32.gmra.mxu2 %vm561_vm1, %v5689_v20 }
 0x259   : > { %4506 = vmatmul.msk.f32.gmra.mxu3 %vm561_vm1, %v5691_v13 }
 0x25a   : > { %v2242_v3 = vpop.f32.mrf.mxu1 }
 0x25b   : > { %v2514_v50 = vpop.f32.mrf.mxu2  ;;  %4535 = vmatmul.msk.f32.gmra.mxu0 %vm561_vm1, %v2974_v31  ;;  %v2318_v54 = vadd.f32 %v2242_v3, %v6411_v29  ;;  %v6413_v3 = vld [vmem:[#allocation14_spill] sm:$0xff]  ;;  %v5735_v29 = vld [vmem:[#allocation2 + $0xf8] sm:$0xff] }
 0x25c   : > { %v5699_v59 = vadd.f32 %v2514_v50, %v2317_v53  ;;  %v2093_v50 = vmul.f32 %v6413_v3, %v2061_v48 }
 0x25d   : > { %4442 = vmatmul.msk.f32.gmra.mxu1 %vm561_vm1, %v2091_v40  ;;  %v5730_v40 = vpop.f32.mrf.mxu0 }
 0x260   : > { %4475 = vmatmul.msk.f32.gmra.mxu2 %vm561_vm1, %v5706_v36 }
 0x261   : > { %4507 = vmatmul.msk.f32.gmra.mxu3 %vm561_vm1, %v2672_v37  ;;  %v2674_v37 = vmul.f32 %v5225_v52, %v5283_v33  ;;  %v5747_v52 = vld [vmem:[#allocation2 + $0xf9] sm:$0xff] }
 0x262   : > { %v2245_v18 = vpop.f32.mrf.mxu1 }
 0x263   : > { %v2517_v26 = vpop.f32.mrf.mxu2  ;;  %4536 = vmatmul.msk.f32.gmra.mxu0 %vm561_vm1, %v2056_v15  ;;  %v2319_v56 = vadd.f32 %v2245_v18, %v6412_v22  ;;  %v5745_v22 = vld [vmem:[#allocation2 + $0x100] sm:$0xff] }
 0x264   : > { %v5712_v35 = vadd.f32 %v2517_v26, %v2318_v54  ;;  %v2062_v26 = vld [vmem:[#allocation2 + $0xff] sm:$0xff] }
 0x265   : > { %4443 = vmatmul.msk.f32.gmra.mxu1 %vm561_vm1, %v2060_v43  ;;  %v5749_v33 = vpop.f32.mrf.mxu0 }
 0x268   : > { %4476 = vmatmul.msk.f32.gmra.mxu2 %vm561_vm1, %v5716_v51 }
 0x269   : > { %4508 = vmatmul.msk.f32.gmra.mxu3 %vm561_vm1, %v5718_v55 }
 0x26a   : > { %v2248_v53 = vpop.f32.mrf.mxu1 }
 0x26b   : > { %v2520_v15 = vpop.f32.mrf.mxu2  ;;  %4537 = vmatmul.msk.f32.gmra.mxu0 %vm561_vm1, %v2976_v34  ;;  %v2320_v7 = vadd.f32 %v2248_v53, %v5277_v21  ;;  %v2063_v21 = vld [vmem:[#allocation2 + $0x107] sm:$0xff] }
 0x26c   : > { %v5726_v31 = vadd.f32 %v2520_v15, %v2319_v56 }
 0x26d   : > { %4444 = vmatmul.msk.f32.gmra.mxu1 %vm561_vm1, %v2093_v50  ;;  %v6416_v50 = vld [vmem:[#allocation18_spill] sm:$0xff] }
 0x270   : > { %4477 = vmatmul.msk.f32.gmra.mxu2 %vm561_vm1, %v5735_v29 }
 0x271   : > { %4509 = vmatmul.msk.f32.gmra.mxu3 %vm561_vm1, %v2674_v37  ;;  %v2095_v37 = vmul.f32 %v6416_v50, %v2063_v21 }
 0x272   : > { %v2251_v11 = vpop.f32.mrf.mxu1 }
 0x273   : > { %v2523_v54 = vpop.f32.mrf.mxu2  ;;  %4538 = vmatmul.msk.f32.gmra.mxu0 %vm561_vm1, %v2058_v25  ;;  %v2321_v56 = vadd.f32 %v2251_v11, %v5293_v27  ;;  %v2978_v25 = vmul.f32 %v5148_v19, %v2059_v2  ;;  %v5769_v19 = vpop.f32.mrf.mxu0 }
 0x274   : > { %v5741_v18 = vadd.f32 %v2523_v54, %v2320_v7  ;;  %v6417_v7 = vld [vmem:[#allocation19_spill] sm:$0xff] }
 0x275   : > { %4445 = vmatmul.msk.f32.gmra.mxu1 %vm561_vm1, %v2062_v26  ;;  %v2676_v54 = vmul.f32 %v6417_v7, %v5308_v44  ;;  %v5776_v44 = vld [vmem:[#allocation2 + $0x110] sm:$0xff] }
 0x276   : > { %6414 = vst [vmem:[#allocation15_spill] sm:$0xff] %v5741_v18  ;;  %v5764_v18 = vld [vmem:[#allocation2 + $0x108] sm:$0xff] }
 0x277   : > { %6419 = vst [vmem:[#allocation18_spill] sm:$0xff] %v5776_v44 }
 0x278   : > { %4478 = vmatmul.msk.f32.gmra.mxu2 %vm561_vm1, %v5745_v22 }
 0x279   : > { %4510 = vmatmul.msk.f32.gmra.mxu3 %vm561_vm1, %v5747_v52 }
 0x27a   : > { %v2254_v34 = vpop.f32.mrf.mxu1 }
 0x27b   : > { %v2526_v53 = vpop.f32.mrf.mxu2  ;;  %4539 = vmatmul.msk.f32.gmra.mxu0 %vm561_vm1, %v2978_v25  ;;  %v2322_v27 = vadd.f32 %v2254_v34, %v5306_v62  ;;  %v2064_v25 = vld [vmem:[#allocation2 + $0x10f] sm:$0xff]  ;;  %v2980_v34 = vmul.f32 %v5179_v47, %v2061_v48 }
 0x27c   : > { %v5757_v15 = vadd.f32 %v2526_v53, %v2321_v56  ;;  %v5778_v53 = vld [vmem:[#allocation2 + $0x109] sm:$0xff] }
 0x27d   : > { %4446 = vmatmul.msk.f32.gmra.mxu1 %vm561_vm1, %v2095_v37  ;;  %6420 = vst [vmem:[#allocation52_spill] sm:$0xff] %v5778_v53 }
 0x27e   : > { %6415 = vst [vmem:[#allocation17_spill] sm:$0xff] %v5757_v15 }
 0x280   : > { %4479 = vmatmul.msk.f32.gmra.mxu2 %vm561_vm1, %v5764_v18 }
 0x281   : > { %4511 = vmatmul.msk.f32.gmra.mxu3 %vm561_vm1, %v2676_v54 }
 0x282   : > { %v2257_v2 = vpop.f32.mrf.mxu1 }
 0x283   : > { %v2529_v11 = vpop.f32.mrf.mxu2  ;;  %4540 = vmatmul.msk.f32.gmra.mxu0 %vm561_vm1, %v2060_v43  ;;  %v2323_v62 = vadd.f32 %v2257_v2, %v5323_v58  ;;  %v5786_v43 = vld [vmem:[#allocation2 + $0x111] sm:$0xff] }
 0x284   : > { %v5772_v56 = vadd.f32 %v2529_v11, %v2322_v27  ;;  %6421 = vst [vmem:[#allocation53_spill] sm:$0xff] %v5786_v43  ;;  %v5788_v27 = vpop.f32.mrf.mxu0  ;;  %v2678_v7 = vmul.f32 %v5301_v4, %v5786_v43 }
 0x285   : > { %4447 = vmatmul.msk.f32.gmra.mxu1 %vm561_vm1, %v2064_v25 }
 0x286   : > { %6418 = vst [vmem:[#allocation14_spill] sm:$0xff] %v5772_v56  ;;  %v3229_v56 = vld [vmem:[#allocation2 + $0x28] sm:$0xff] }
 0x288   : > { %4480 = vmatmul.msk.f32.gmra.mxu2 %vm561_vm1, %v5776_v44  ;;  %v6449_v44 = vld [vmem:[#allocation38_spill] sm:$0xff] }
 0x289   : > { %4512 = vmatmul.msk.f32.gmra.mxu3 %vm561_vm1, %v5778_v53 }
 0x28a   : > { %v2260_v37 = vpop.f32.mrf.mxu1 }
 0x28b   : > { %v2532_v54 = vpop.f32.mrf.mxu2  ;;  %4541 = vmatmul.msk.f32.gmra.mxu0 %vm561_vm1, %v2980_v34  ;;  %v2324_v47 = vadd.f32 %v2260_v37, %v5339_v28 }
 0x28c   : > { %v5790_v11 = vadd.f32 %v2532_v54, %v2323_v62  ;;  %v3230_v62 = vld [vmem:[#allocation2 + $0x30] sm:$0xff]  ;;  %v5803_v34 = vpop.f32.mrf.mxu0 }
 0x28d   : > { %4548 = vmatmul.msk.f32.vlgmr.msra.gmra.mxu1 %vm561_vm1, %v3229_v56  ;;  %v6424_v56 = vld [vmem:[#allocation3_spill] sm:$0xff] }
 0x28e   : > { %6422 = vst [vmem:[#allocation54_spill] sm:$0xff] %v5790_v11  ;;  %v6441_v11 = vld [vmem:[#allocation33_spill] sm:$0xff] }
 0x290   : > { %4581 = vmatmul.msk.f32.vlgmr.msra.gmra.mxu2 %vm561_vm1, %v5348_v23  ;;  %v2982_v23 = vmul.f32 %v6413_v3, %v2063_v21  ;;  %v6429_v3 = vld [vmem:[#allocation26_spill] sm:$0xff]  ;;  %v2952_v21 = vld [vmem:[#allocation2 + $0x117] sm:$0xff] }
 0x291   : > { %4513 = vmatmul.msk.f32.gmra.mxu3 %vm561_vm1, %v2678_v7 }
 0x292   : > { %v2263_v58 = vpop.f32.mrf.mxu1 }
 0x293   : > { %v2535_v48 = vpop.f32.mrf.mxu2  ;;  %4542 = vmatmul.msk.f32.gmra.mxu0 %vm561_vm1, %v2062_v26  ;;  %v2325_v7 = vadd.f32 %v2263_v58, %v5352_v30 }
 0x294   : > { %v5800_v2 = vadd.f32 %v2535_v48, %v2324_v47  ;;  %v3231_v47 = vld [vmem:[#allocation2 + $0x38] sm:$0xff]  ;;  %v5814_v26 = vpop.f32.mrf.mxu0 }
 0x295   : > { %4549 = vmatmul.msk.f32.gmra.mxu1 %vm561_vm1, %v3230_v62  ;;  %v6426_v48 = vld [vmem:[#allocation24_spill] sm:$0xff]  ;;  %v6427_v62 = vld [vmem:[#allocation23_spill] sm:$0xff] }
 0x296   : > { %6423 = vst [vmem:[#allocation55_spill] sm:$0xff] %v5800_v2 }
 0x298   : > { %4582 = vmatmul.msk.f32.gmra.mxu2 %vm561_vm1, %v6424_v56 }
 0x29a   : > { %v2266_v54 = vpop.f32.mrf.mxu1 }
 0x29b   : > { %v2538_v28 = vpop.f32.mrf.mxu2  ;;  %4543 = vmatmul.msk.f32.gmra.mxu0 %vm561_vm1, %v2982_v23  ;;  %v2326_v56 = vadd.f32 %v2266_v54, %v6427_v62 }
 0x29c   : > { %v5810_v37 = vadd.f32 %v2538_v28, %v2325_v7  ;;  %v6430_v7 = vld [vmem:[#allocation4_spill] sm:$0xff]  ;;  %v5826_v23 = vpop.f32.mrf.mxu0  ;;  %v6431_v28 = vld [vmem:[#allocation25_spill] sm:$0xff] }
 0x29d   : > { %4550 = vmatmul.msk.f32.gmra.mxu1 %vm561_vm1, %v3231_v47 }
 0x29e   : > { %6425 = vst [vmem:[#allocation3_spill] sm:$0xff] %v5810_v37 }
 0x2a0   : > { %4583 = vmatmul.msk.f32.gmra.mxu2 %vm561_vm1, %v6426_v48  ;;  %v2984_v48 = vmul.f32 %v6416_v50, %v2952_v21 }
 0x2a2   : > { %v2269_v2 = vpop.f32.mrf.mxu1 }
 0x2a3   : > { %v2541_v30 = vpop.f32.mrf.mxu2  ;;  %4544 = vmatmul.msk.f32.gmra.mxu0 %vm561_vm1, %v2064_v25  ;;  %v2327_v47 = vadd.f32 %v2269_v2, %v6431_v28  ;;  %v5833_v25 = vpop.f32.mrf.mxu3 }
 0x2a4   : > { %v5819_v58 = vadd.f32 %v2541_v30, %v2326_v56  ;;  %v6433_v56 = vld [vmem:[#allocation28_spill] sm:$0xff]  ;;  %v6434_v30 = vld [vmem:[#allocation31_spill] sm:$0xff]  ;;  %v5840_v50 = vpop.f32.mrf.mxu0 }
 0x2a5   : > { %4551 = vmatmul.msk.f32.gmra.mxu1 %vm561_vm1, %v6429_v3  ;;  %v2953_v3 = vld [vmem:[#allocation2 + $0x11f] sm:$0xff] }
 0x2a6   : > { %6428 = vst [vmem:[#allocation24_spill] sm:$0xff] %v5819_v58 }
 0x2a8   : > { %4584 = vmatmul.msk.f32.gmra.mxu2 %vm561_vm1, %v6430_v7  ;;  %v6435_v7 = vld [vmem:[#allocation27_spill] sm:$0xff] }
 0x2aa   : > { %v2272_v54 = vpop.f32.mrf.mxu1 }
 0x2ab   : > { %v2544_v62 = vpop.f32.mrf.mxu2  ;;  %4545 = vmatmul.msk.f32.gmra.mxu0 %vm561_vm1, %v2984_v48  ;;  %v2328_v58 = vadd.f32 %v2272_v54, %v6435_v7  ;;  %v5847_v48 = vpop.f32.mrf.mxu3 }
 0x2ac   : > { %v5830_v37 = vadd.f32 %v2544_v62, %v2327_v47  ;;  %v6437_v47 = vld [vmem:[#allocation30_spill] sm:$0xff]  ;;  %v6438_v62 = vld [vmem:[#allocation5_spill] sm:$0xff] }
 0x2ad   : > { %4552 = vmatmul.msk.f32.gmra.mxu1 %vm561_vm1, %v6433_v56  ;;  %v6439_v56 = vld [vmem:[#allocation29_spill] sm:$0xff] }
 0x2ae   : > { %6432 = vst [vmem:[#allocation23_spill] sm:$0xff] %v5830_v37 }
 0x2b0   : > { %4585 = vmatmul.msk.f32.gmra.mxu2 %vm561_vm1, %v6434_v30 }
 0x2b2   : > { %v2275_v2 = vpop.f32.mrf.mxu1 }
 0x2b3   : > { %v2547_v28 = vpop.f32.mrf.mxu2  ;;  %4546 = vmatmul.msk.f32.gmra.mxu0 %vm561_vm1, %v2953_v3  ;;  %v2329_v30 = vadd.f32 %v2275_v2, %v6439_v56  ;;  %v5858_v3 = vpop.f32.mrf.mxu3  ;;  %v6446_v2 = vld [vmem:[#allocation6_spill] sm:$0xff] }
 0x2b4   : > { %v5842_v21 = vadd.f32 %v2547_v28, %v2328_v58  ;;  %v6442_v58 = vld [vmem:[#allocation36_spill] sm:$0xff]  ;;  %v6447_v56 = vld [vmem:[#allocation34_spill] sm:$0xff] }
 0x2b5   : > { %4553 = vmatmul.msk.f32.gmra.mxu1 %vm561_vm1, %v6437_v47  ;;  %v6443_v28 = vld [vmem:[#allocation32_spill] sm:$0xff] }
 0x2b6   : > { %6436 = vst [vmem:[#allocation26_spill] sm:$0xff] %v5842_v21 }
 0x2b8   : > { %4586 = vmatmul.msk.f32.gmra.mxu2 %vm561_vm1, %v6438_v62  ;;  %v6445_v62 = vld [vmem:[#allocation35_spill] sm:$0xff] }
 0x2ba   : > { %v2278_v37 = vpop.f32.mrf.mxu1 }
 0x2bb   : > { %v2550_v54 = vpop.f32.mrf.mxu2  ;;  %v2330_v47 = vadd.f32 %v2278_v37, %v6443_v28  ;;  %v6450_v37 = vld [vmem:[#allocation41_spill] sm:$0xff] }
 0x2bc   : > { %v5852_v7 = vadd.f32 %v2550_v54, %v2329_v30 }
 0x2bd   : > { %4554 = vmatmul.msk.f32.gmra.mxu1 %vm561_vm1, %v6441_v11 }
 0x2be   : > { %6440 = vst [vmem:[#allocation4_spill] sm:$0xff] %v5852_v7  ;;  %v5868_v7 = vpop.f32.mrf.mxu3 }
 0x2c0   : > { %4587 = vmatmul.msk.f32.gmra.mxu2 %vm561_vm1, %v6442_v58 }
 0x2c2   : > { %v2281_v21 = vpop.f32.mrf.mxu1 }
 0x2c3   : > { %v2553_v4 = vpop.f32.mrf.mxu2  ;;  %v2331_v30 = vadd.f32 %v2281_v21, %v6447_v56  ;;  %v6453_v21 = vld [vmem:[#allocation40_spill] sm:$0xff]  ;;  %v6454_v56 = vld [vmem:[#allocation7_spill] sm:$0xff] }
 0x2c4   : > { %v5861_v43 = vadd.f32 %v2553_v4, %v2330_v47  ;;  %v6451_v4 = vld [vmem:[#allocation37_spill] sm:$0xff] }
 0x2c5   : > { %4555 = vmatmul.msk.f32.gmra.mxu1 %vm561_vm1, %v6445_v62 }
 0x2c6   : > { %6444 = vst [vmem:[#allocation25_spill] sm:$0xff] %v5861_v43 }
 0x2c8   : > { %4588 = vmatmul.msk.f32.gmra.mxu2 %vm561_vm1, %v6446_v2  ;;  %v5879_v2 = vpop.f32.mrf.mxu3 }
 0x2ca   : > { %v2284_v11 = vpop.f32.mrf.mxu1 }
 0x2cb   : > { %v2556_v54 = vpop.f32.mrf.mxu2  ;;  %v2332_v28 = vadd.f32 %v2284_v11, %v6451_v4  ;;  %v6459_v4 = vld [vmem:[#allocation46_spill] sm:$0xff] }
 0x2cc   : > { %v5870_v58 = vadd.f32 %v2556_v54, %v2331_v30  ;;  %v6455_v30 = vld [vmem:[#allocation39_spill] sm:$0xff] }
 0x2cd   : > { %4556 = vmatmul.msk.f32.gmra.mxu1 %vm561_vm1, %v6449_v44 }
 0x2ce   : > { %6448 = vst [vmem:[#allocation28_spill] sm:$0xff] %v5870_v58 }
 0x2d0   : > { %4589 = vmatmul.msk.f32.gmra.mxu2 %vm561_vm1, %v6450_v37  ;;  %v6457_v37 = vld [vmem:[#allocation43_spill] sm:$0xff]  ;;  %v5890_v11 = vpop.f32.mrf.mxu3 }
 0x2d1   : > { %6458 = vst [vmem:[#allocation30_spill] sm:$0xff] %v5890_v11 }
 0x2d2   : > { %v2287_v47 = vpop.f32.mrf.mxu1 }
 0x2d3   : > { %v2559_v62 = vpop.f32.mrf.mxu2  ;;  %v2333_v54 = vadd.f32 %v2287_v47, %v6455_v30  ;;  %v6463_v47 = vld [vmem:[#allocation8_spill] sm:$0xff] }
 0x2d4   : > { %v5877_v43 = vadd.f32 %v2559_v62, %v2332_v28  ;;  %v6460_v28 = vld [vmem:[#allocation42_spill] sm:$0xff]  ;;  %v6465_v30 = vld [vmem:[#allocation44_spill] sm:$0xff] }
 0x2d5   : > { %4557 = vmatmul.msk.f32.gmra.mxu1 %vm561_vm1, %v6453_v21 }
 0x2d6   : > { %6452 = vst [vmem:[#allocation31_spill] sm:$0xff] %v5877_v43 }
 0x2d8   : > { %4590 = vmatmul.msk.f32.gmra.mxu2 %vm561_vm1, %v6454_v56  ;;  %v6462_v56 = vld [vmem:[#allocation45_spill] sm:$0xff] }
 0x2da   : > { %v2290_v44 = vpop.f32.mrf.mxu1 }
 0x2db   : > { %v2562_v58 = vpop.f32.mrf.mxu2  ;;  %v2334_v62 = vadd.f32 %v2290_v44, %v6460_v28  ;;  %v6468_v44 = vld [vmem:[#allocation51_spill] sm:$0xff] }
 0x2dc   : > { %v5886_v15 = vadd.f32 %v2562_v58, %v2333_v54  ;;  %v5901_v58 = vpop.f32.mrf.mxu3 }
 0x2dd   : > { %4558 = vmatmul.msk.f32.gmra.mxu1 %vm561_vm1, %v6457_v37  ;;  %6464 = vst [vmem:[#allocation29_spill] sm:$0xff] %v5901_v58  ;;  %v6470_v58 = vld [vmem:[#allocation50_spill] sm:$0xff] }
 0x2de   : > { %6456 = vst [vmem:[#allocation27_spill] sm:$0xff] %v5886_v15 }
 0x2e0   : > { %4591 = vmatmul.msk.f32.gmra.mxu2 %vm561_vm1, %v6459_v4  ;;  %v6467_v4 = vld [vmem:[#allocation48_spill] sm:$0xff] }
 0x2e2   : > { %v2293_v21 = vpop.f32.mrf.mxu1 }
 0x2e3   : > { %v2565_v43 = vpop.f32.mrf.mxu2  ;;  %v2335_v54 = vadd.f32 %v2293_v21, %v6465_v30  ;;  %v6471_v21 = vld [vmem:[#allocation9_spill] sm:$0xff] }
 0x2e4   : > { %v5895_v53 = vadd.f32 %v2565_v43, %v2334_v62  ;;  %v6469_v43 = vld [vmem:[#allocation47_spill] sm:$0xff] }
 0x2e5   : > { %4559 = vmatmul.msk.f32.gmra.mxu1 %vm561_vm1, %v6462_v56 }
 0x2e6   : > { %6461 = vst [vmem:[#allocation5_spill] sm:$0xff] %v5895_v53  ;;  %v5911_v53 = vpop.f32.mrf.mxu3 }
 0x2e8   : > { %4592 = vmatmul.msk.f32.gmra.mxu2 %vm561_vm1, %v6463_v47 }
 0x2ea   : > { %v2296_v37 = vpop.f32.mrf.mxu1 }
 0x2eb   : > { %v2568_v15 = vpop.f32.mrf.mxu2  ;;  %v2336_v28 = vadd.f32 %v2296_v37, %v6469_v43 }
 0x2ec   : > { %v5904_v11 = vadd.f32 %v2568_v15, %v2335_v54  ;;  %v6472_v15 = vld [vmem:[#allocation49_spill] sm:$0xff] }
 0x2ed   : > { %4560 = vmatmul.msk.f32.gmra.mxu1 %vm561_vm1, %v6467_v4 }
 0x2ee   : > { %6466 = vst [vmem:[#allocation33_spill] sm:$0xff] %v5904_v11 }
 0x2f0   : > { %4593 = vmatmul.msk.f32.gmra.mxu2 %vm561_vm1, %v6468_v44  ;;  %v5922_v44 = vpop.f32.mrf.mxu3 }
 0x2f2   : > { %v2299_v62 = vpop.f32.mrf.mxu1 }
 0x2f3   : > { %v2571_v56 = vpop.f32.mrf.mxu2  ;;  %v2337_v30 = vadd.f32 %v2299_v62, %v6472_v15 }
 0x2f4   : > { %v5913_v47 = vadd.f32 %v2571_v56, %v2336_v28  ;;  %v6473_v56 = vld [vmem:[#allocation10_spill] sm:$0xff] }
 0x2f5   : > { %4561 = vmatmul.msk.f32.gmra.mxu1 %vm561_vm1, %v6470_v58 }
 0x2f8   : > { %4594 = vmatmul.msk.f32.gmra.mxu2 %vm561_vm1, %v6471_v21  ;;  %v5933_v62 = vpop.f32.mrf.mxu3 }
 0x2fa   : > { %v2302_v54 = vpop.f32.mrf.mxu1 }
 0x2fb   : > { %v2574_v4 = vpop.f32.mrf.mxu2  ;;  %v2338_v37 = vadd.f32 %v2302_v54, %v5544_v63  ;;  %v3197_v63 = vadd.f32 %v5730_v40, %v5577_v45  ;;  %v3198_v45 = vadd.f32 %v5749_v33, %v5590_v1  ;;  %v3199_v1 = vadd.f32 %v5769_v19, %v5613_v32 }
 0x2fc   : > { %v5920_v11 = vadd.f32 %v2574_v4, %v2337_v30  ;;  %v3200_v32 = vadd.f32 %v5788_v27, %v5626_v57  ;;  %v3201_v57 = vadd.f32 %v5803_v34, %v5643_v46  ;;  %v3202_v46 = vadd.f32 %v5814_v26, %v5656_v0  ;;  %v6476_v34 = vld [vmem:[#allocation13_spill] sm:$0xff] }
 0x2fd   : > { %4562 = vmatmul.msk.f32.gmra.mxu1 %vm561_vm1, %v5548_v24  ;;  %v3203_v0 = vadd.f32 %v5826_v23, %v5672_v14  ;;  %v3204_v14 = vadd.f32 %v5840_v50, %v5686_v60 }
 0x300   : > { %4595 = vmatmul.msk.f32.gmra.mxu2 %vm561_vm1, %v5564_v12 }
 0x302   : > { %v2305_v58 = vpop.f32.mrf.mxu1 }
 0x303   : > { %v2577_v43 = vpop.f32.mrf.mxu2  ;;  %v2339_v21 = vadd.f32 %v2305_v58, %v5556_v42  ;;  %v5951_v42 = vld [vmem:[%s6328_s4] ss:$0 sm:$0xff] }
 0x304   : > { %v5929_v28 = vadd.f32 %v2577_v43, %v2338_v37 }
 0x305   : > { %4563 = vmatmul.msk.f32.gmra.mxu1 %vm561_vm1, %v5562_v6  ;;  %v5946_v6 = vpop.f32.mrf.mxu3 }
 0x308   : > { %4596 = vmatmul.msk.f32.gmra.mxu2 %vm561_vm1, %v6473_v56 }
 0x30a   : > { %v3376_v15 = vpop.f32.mrf.mxu1 }
 0x30b   : > { %v2580_v24 = vpop.f32.mrf.mxu2  ;;  %v3472_v12 = vadd.f32 %v3376_v15, %v3197_v63  ;;  %v5963_v15 = vpop.f32.mrf.mxu0 }
 0x30c   : > { %v5938_v30 = vadd.f32 %v2580_v24, %v2339_v21 }
 0x30d   : > { %4564 = vmatmul.msk.f32.gmra.mxu1 %vm561_vm1, %v5583_v10  ;;  %v5961_v21 = vpop.f32.mrf.mxu3 }
 0x310   : > { %4597 = vmatmul.msk.f32.gmra.mxu2 %vm561_vm1, %v5600_v61  ;;  %v6474_v61 = vld [vmem:[#allocation11_spill] sm:$0xff] }
 0x312   : > { %v3379_v54 = vpop.f32.mrf.mxu1 }
 0x313   : > { %v3683_v4 = vpop.f32.mrf.mxu2  ;;  %v3473_v40 = vadd.f32 %v3379_v54, %v3198_v45 }
 0x314   : > { %v3779_v37 = vadd.f32 %v3683_v4, %v3472_v12 }
 0x315   : > { %4565 = vmatmul.msk.f32.gmra.mxu1 %vm561_vm1, %v5598_v5 }
 0x316   : > { %v3815_v58 = vadd.f32 %v5951_v42, %v3779_v37  ;;  %v5973_v37 = vpop.f32.mrf.mxu3 }
 0x318   : > { %v3847_v10 = vmax.f32 %v3815_v58, 0.0  ;;  %4598 = vmatmul.msk.f32.gmra.mxu2 %vm561_vm1, %v6474_v61 }
 0x31a   : > { %4613 = vmatmul.msk.f32.vlgmr.msra.gmra.mxu3 %vm561_vm1, %v3847_v10  ;;  %v3382_v43 = vpop.f32.mrf.mxu1 }
 0x31b   : > { %v3686_v56 = vpop.f32.mrf.mxu2  ;;  %v3474_v33 = vadd.f32 %v3382_v43, %v3199_v1 }
 0x31c   : > { %v3780_v24 = vadd.f32 %v3686_v56, %v3473_v40 }
 0x31d   : > { %4566 = vmatmul.msk.f32.gmra.mxu1 %vm561_vm1, %v5619_v41  ;;  %v5980_v41 = vpop.f32.mrf.mxu0 }
 0x31e   : > { %v3816_v63 = vadd.f32 %v5951_v42, %v3780_v24 }
 0x320   : > { %v3848_v5 = vmax.f32 %v3816_v63, 0.0  ;;  %4599 = vmatmul.msk.f32.gmra.mxu2 %vm561_vm1, %v5633_v38  ;;  %v6475_v38 = vld [vmem:[#allocation12_spill] sm:$0xff] }
 0x322   : > { %4614 = vmatmul.msk.f32.gmra.mxu3 %vm561_vm1, %v3848_v5  ;;  %v3385_v12 = vpop.f32.mrf.mxu1 }
 0x323   : > { %v3689_v54 = vpop.f32.mrf.mxu2  ;;  %v3475_v45 = vadd.f32 %v3385_v12, %v3200_v32 }
 0x324   : > { %v3781_v4 = vadd.f32 %v3689_v54, %v3474_v33 }
 0x325   : > { %4567 = vmatmul.msk.f32.gmra.mxu1 %vm561_vm1, %v5631_v49  ;;  %v5990_v49 = vpop.f32.mrf.mxu3  ;;  %v5994_v56 = vpop.f32.mrf.mxu0 }
 0x326   : > { %v3817_v58 = vadd.f32 %v5951_v42, %v3781_v4 }
 0x328   : > { %v3849_v19 = vmax.f32 %v3817_v58, 0.0  ;;  %4600 = vmatmul.msk.f32.gmra.mxu2 %vm561_vm1, %v6475_v38 }
 0x32a   : > { %4615 = vmatmul.msk.f32.gmra.mxu3 %vm561_vm1, %v3849_v19  ;;  %v3388_v10 = vpop.f32.mrf.mxu1 }
 0x32b   : > { %v3692_v61 = vpop.f32.mrf.mxu2  ;;  %v3476_v24 = vadd.f32 %v3388_v10, %v3201_v57 }
 0x32c   : > { %v3782_v40 = vadd.f32 %v3692_v61, %v3475_v45 }
 0x32d   : > { %4568 = vmatmul.msk.f32.gmra.mxu1 %vm561_vm1, %v5649_v16  ;;  %v6007_v58 = vpop.f32.mrf.mxu0 }
 0x32e   : > { %v3818_v43 = vadd.f32 %v5951_v42, %v3782_v40 }
 0x330   : > { %v3850_v27 = vmax.f32 %v3818_v43, 0.0  ;;  %4601 = vmatmul.msk.f32.gmra.mxu2 %vm561_vm1, %v5661_v17  ;;  %v6004_v17 = vpop.f32.mrf.mxu3 }
 0x332   : > { %4616 = vmatmul.msk.f32.gmra.mxu3 %vm561_vm1, %v3850_v27  ;;  %v3391_v63 = vpop.f32.mrf.mxu1 }
 0x333   : > { %v3695_v1 = vpop.f32.mrf.mxu2  ;;  %v3477_v12 = vadd.f32 %v3391_v63, %v3202_v46  ;;  %v2898_v63 = vadd.f32 %v5833_v25, %v5683_v8 }
 0x334   : > { %v3783_v5 = vadd.f32 %v3695_v1, %v3476_v24 }
 0x335   : > { %4569 = vmatmul.msk.f32.gmra.mxu1 %vm561_vm1, %v5659_v9  ;;  %v6019_v40 = vpop.f32.mrf.mxu0  ;;  %v3205_v60 = vadd.f32 %v5963_v15, %v2898_v63  ;;  %v6481_v63 = vld [vmem:[#allocation52_spill] sm:$0xff] }
 0x336   : > { %v3819_v33 = vadd.f32 %v5951_v42, %v3783_v5 }
 0x338   : > { %v3851_v16 = vmax.f32 %v3819_v33, 0.0  ;;  %4602 = vmatmul.msk.f32.gmra.mxu2 %vm561_vm1, %v6476_v34  ;;  %v6017_v10 = vpop.f32.mrf.mxu3 }
 0x33a   : > { %4617 = vmatmul.msk.f32.gmra.mxu3 %vm561_vm1, %v3851_v16  ;;  %v3394_v54 = vpop.f32.mrf.mxu1  ;;  %v2899_v16 = vadd.f32 %v5847_v48, %v5699_v59  ;;  %v2900_v48 = vadd.f32 %v5858_v3, %v5712_v35  ;;  %v2901_v3 = vadd.f32 %v5868_v7, %v5726_v31  ;;  %v6480_v31 = vld [vmem:[#allocation15_spill] sm:$0xff] }
 0x33b   : > { %v3698_v4 = vpop.f32.mrf.mxu2  ;;  %v3478_v26 = vadd.f32 %v3394_v54, %v3203_v0  ;;  %v2902_v7 = vadd.f32 %v5879_v2, %v6480_v31  ;;  %v6483_v2 = vld [vmem:[#allocation30_spill] sm:$0xff] }
 0x33c   : > { %v3784_v32 = vadd.f32 %v3698_v4, %v3477_v12 }
 0x33d   : > { %4570 = vmatmul.msk.f32.gmra.mxu1 %vm561_vm1, %v5677_v39  ;;  %v6037_v50 = vpop.f32.mrf.mxu0 }
 0x33e   : > { %v3820_v19 = vadd.f32 %v5951_v42, %v3784_v32 }
 0x340   : > { %v3852_v9 = vmax.f32 %v3820_v19, 0.0  ;;  %4603 = vmatmul.msk.f32.gmra.mxu2 %vm561_vm1, %v5691_v13  ;;  %v6477_v13 = vld [vmem:[#allocation16_spill] sm:$0xff]  ;;  %v6031_v1 = vpop.f32.mrf.mxu3 }
 0x342   : > { %4618 = vmatmul.msk.f32.gmra.mxu3 %vm561_vm1, %v3852_v9  ;;  %v3397_v38 = vpop.f32.mrf.mxu1 }
 0x343   : > { %v3701_v45 = vpop.f32.mrf.mxu2  ;;  %v3479_v23 = vadd.f32 %v3397_v38, %v3204_v14 }
 0x344   : > { %v3785_v61 = vadd.f32 %v3701_v45, %v3478_v26 }
 0x345   : > { %4571 = vmatmul.msk.f32.gmra.mxu1 %vm561_vm1, %v5689_v20  ;;  %v3143_v54 = vpop.f32.mrf.mxu0 }
 0x346   : > { %v3821_v43 = vadd.f32 %v5951_v42, %v3785_v61 }
 0x348   : > { %v3853_v39 = vmax.f32 %v3821_v43, 0.0  ;;  %4604 = vmatmul.msk.f32.gmra.mxu2 %vm561_vm1, %v6477_v13  ;;  %v6048_v15 = vpop.f32.mrf.mxu3  ;;  %v6479_v43 = vld [vmem:[#allocation22_spill] sm:$0xff] }
 0x34a   : > { %4619 = vmatmul.msk.f32.gmra.mxu3 %vm561_vm1, %v3853_v39  ;;  %v3400_v57 = vpop.f32.mrf.mxu1 }
 0x34b   : > { %v3704_v27 = vpop.f32.mrf.mxu2  ;;  %v3480_v33 = vadd.f32 %v3400_v57, %v3205_v60 }
 0x34c   : > { %v3786_v24 = vadd.f32 %v3704_v27, %v3479_v23 }
 0x34d   : > { %4572 = vmatmul.msk.f32.gmra.mxu1 %vm561_vm1, %v5706_v36  ;;  %v3206_v36 = vadd.f32 %v5980_v41, %v2899_v16  ;;  %v3207_v41 = vadd.f32 %v5994_v56, %v2900_v48  ;;  %v3146_v61 = vpop.f32.mrf.mxu0  ;;  %v3208_v56 = vadd.f32 %v6007_v58, %v2901_v3  ;;  %v3209_v58 = vadd.f32 %v6019_v40, %v2902_v7  ;;  %v6485_v40 = vld [vmem:[#allocation53_spill] sm:$0xff]  ;;  %v3259_v48 = vld [vmem:[#allocation2 + $0x118] sm:$0xff]  ;;  %v6490_v7 = vld [vmem:[#allocation54_spill] sm:$0xff] }
 0x34e   : > { %v3822_v20 = vadd.f32 %v5951_v42, %v3786_v24 }
 0x350   : > { %v3854_v5 = vmax.f32 %v3822_v20, 0.0  ;;  %4605 = vmatmul.msk.f32.gmra.mxu2 %vm561_vm1, %v5718_v55  ;;  %v6478_v55 = vld [vmem:[#allocation20_spill] sm:$0xff]  ;;  %v6061_v9 = vpop.f32.mrf.mxu3 }
 0x352   : > { %4620 = vmatmul.msk.f32.gmra.mxu3 %vm561_vm1, %v3854_v5  ;;  %v3403_v46 = vpop.f32.mrf.mxu1 }
 0x353   : > { %v3707_v8 = vpop.f32.mrf.mxu2  ;;  %v3481_v4 = vadd.f32 %v3403_v46, %v3206_v36  ;;  %v6482_v46 = vld [vmem:[#allocation17_spill] sm:$0xff] }
 0x354   : > { %v3787_v25 = vadd.f32 %v3707_v8, %v3480_v33  ;;  %v2903_v8 = vadd.f32 %v6483_v2, %v6482_v46  ;;  %v6491_v2 = vld [vmem:[#allocation55_spill] sm:$0xff] }
 0x355   : > { %4573 = vmatmul.msk.f32.gmra.mxu1 %vm561_vm1, %v5716_v51  ;;  %v3149_v27 = vpop.f32.mrf.mxu0 }
 0x356   : > { %v3823_v34 = vadd.f32 %v5951_v42, %v3787_v25 }
 0x358   : > { %v3855_v12 = vmax.f32 %v3823_v34, 0.0  ;;  %4606 = vmatmul.msk.f32.gmra.mxu2 %vm561_vm1, %v6478_v55  ;;  %v6073_v23 = vpop.f32.mrf.mxu3  ;;  %v6486_v34 = vld [vmem:[#allocation19_spill] sm:$0xff] }
 0x359   : > { %v3565_v36 = vmul.f32 %v6486_v34, %v6485_v40 }
 0x35a   : > { %4621 = vmatmul.msk.f32.gmra.mxu3 %vm561_vm1, %v3855_v12  ;;  %v3406_v32 = vpop.f32.mrf.mxu1  ;;  %v3210_v12 = vadd.f32 %v6037_v50, %v2903_v8 }
 0x35b   : > { %v3710_v19 = vpop.f32.mrf.mxu2  ;;  %v3482_v26 = vadd.f32 %v3406_v32, %v3207_v41  ;;  %v3534_v41 = vld [vmem:[#allocation2 + $0x119] sm:$0xff] }
 0x35c   : > { %v3788_v59 = vadd.f32 %v3710_v19, %v3481_v4 }
 0x35d   : > { %4574 = vmatmul.msk.f32.gmra.mxu1 %vm561_vm1, %v5735_v29  ;;  %v3152_v55 = vpop.f32.mrf.mxu0 }
 0x35e   : > { %v3824_v51 = vadd.f32 %v5951_v42, %v3788_v59 }
 0x360   : > { %v3856_v0 = vmax.f32 %v3824_v51, 0.0  ;;  %4607 = vmatmul.msk.f32.gmra.mxu2 %vm561_vm1, %v5747_v52  ;;  %v6086_v25 = vpop.f32.mrf.mxu3 }
 0x362   : > { %4622 = vmatmul.msk.f32.gmra.mxu3 %vm561_vm1, %v3856_v0  ;;  %v3409_v38 = vpop.f32.mrf.mxu1  ;;  %v6487_v0 = vld [vmem:[#allocation14_spill] sm:$0xff] }
 0x363   : > { %v3713_v45 = vpop.f32.mrf.mxu2  ;;  %v3483_v14 = vadd.f32 %v3409_v38, %v3208_v56 }
 0x364   : > { %v3789_v35 = vadd.f32 %v3713_v45, %v3482_v26  ;;  %v6488_v26 = vld [vmem:[#allocation29_spill] sm:$0xff] }
 0x365   : > { %4575 = vmatmul.msk.f32.gmra.mxu1 %vm561_vm1, %v5745_v22  ;;  %v2904_v38 = vadd.f32 %v6488_v26, %v6487_v0  ;;  %v3155_v56 = vpop.f32.mrf.mxu0 }
 0x366   : > { %v3825_v29 = vadd.f32 %v5951_v42, %v3789_v35 }
 0x367   : > { %v3211_v50 = vadd.f32 %v3143_v54, %v2904_v38 }
 0x368   : > { %v3857_v52 = vmax.f32 %v3825_v29, 0.0  ;;  %4608 = vmatmul.msk.f32.gmra.mxu2 %vm561_vm1, %v6479_v43  ;;  %v6100_v35 = vpop.f32.mrf.mxu3  ;;  %v3535_v29 = vld [vmem:[#allocation2 + $0x121] sm:$0xff] }
 0x36a   : > { %4623 = vmatmul.msk.f32.gmra.mxu3 %vm561_vm1, %v3857_v52  ;;  %v3412_v39 = vpop.f32.mrf.mxu1 }
 0x36b   : > { %v3716_v13 = vpop.f32.mrf.mxu2  ;;  %v3484_v20 = vadd.f32 %v3412_v39, %v3209_v58  ;;  %v3260_v39 = vld [vmem:[#allocation2 + $0x120] sm:$0xff] }
 0x36c   : > { %v3790_v57 = vadd.f32 %v3716_v13, %v3483_v14 }
 0x36d   : > { %4576 = vmatmul.msk.f32.gmra.mxu1 %vm561_vm1, %v5764_v18  ;;  %v6484_v18 = vld [vmem:[#allocation18_spill] sm:$0xff] }
 0x36e   : > { %v3826_v22 = vadd.f32 %v5951_v42, %v3790_v57  ;;  %v6489_v57 = vld [vmem:[#allocation21_spill] sm:$0xff] }
 0x36f   : > { %v3567_v31 = vmul.f32 %v6489_v57, %v3535_v29 }
 0x370   : > { %v3858_v24 = vmax.f32 %v3826_v22, 0.0  ;;  %4609 = vmatmul.msk.f32.gmra.mxu2 %vm561_vm1, %v6481_v63  ;;  %v2905_v22 = vadd.f32 %v5911_v53, %v6490_v7  ;;  %v6110_v63 = vpop.f32.mrf.mxu3  ;;  %v2906_v53 = vadd.f32 %v5922_v44, %v6491_v2  ;;  %v6494_v7 = vld [vmem:[#allocation23_spill] sm:$0xff] }
 0x372   : > { %4624 = vmatmul.msk.f32.gmra.mxu3 %vm561_vm1, %v3858_v24  ;;  %v3415_v60 = vpop.f32.mrf.mxu1  ;;  %v3212_v58 = vadd.f32 %v3146_v61, %v2905_v22  ;;  %v2909_v22 = vadd.f32 %v5961_v21, %v6494_v7 }
 0x373   : > { %v3719_v5 = vpop.f32.mrf.mxu2  ;;  %v3485_v32 = vadd.f32 %v3415_v60, %v3210_v12 }
 0x374   : > { %v3791_v33 = vadd.f32 %v3719_v5, %v3484_v20 }
 0x375   : > { %4577 = vmatmul.msk.f32.gmra.mxu1 %vm561_vm1, %v6484_v18 }
 0x376   : > { %v3827_v16 = vadd.f32 %v5951_v42, %v3791_v33  ;;  %v3158_v33 = vpop.f32.mrf.mxu0 }
 0x378   : > { %v3859_v4 = vmax.f32 %v3827_v16, 0.0  ;;  %4610 = vmatmul.msk.f32.gmra.mxu2 %vm561_vm1, %v3565_v36  ;;  %v3213_v16 = vadd.f32 %v3149_v27, %v2906_v53  ;;  %v6117_v12 = vpop.f32.mrf.mxu3 }
 0x37a   : > { %4625 = vmatmul.msk.f32.gmra.mxu3 %vm561_vm1, %v3859_v4  ;;  %v3418_v19 = vpop.f32.mrf.mxu1  ;;  %v6492_v4 = vld [vmem:[#allocation3_spill] sm:$0xff] }
 0x37b   : > { %v3722_v59 = vpop.f32.mrf.mxu2  ;;  %v3486_v52 = vadd.f32 %v3418_v19, %v3211_v50 }
 0x37c   : > { %v3792_v51 = vadd.f32 %v3722_v59, %v3485_v32  ;;  %v2907_v32 = vadd.f32 %v5933_v62, %v6492_v4  ;;  %v6493_v62 = vld [vmem:[#allocation24_spill] sm:$0xff] }
 0x37d   : > { %4578 = vmatmul.msk.f32.gmra.mxu1 %vm561_vm1, %v3259_v48 }
 0x37e   : > { %v3828_v45 = vadd.f32 %v5951_v42, %v3792_v51  ;;  %v3161_v19 = vpop.f32.mrf.mxu0  ;;  %v3214_v44 = vadd.f32 %v3152_v55, %v2907_v32  ;;  %v6126_v51 = vld [vmem:[%s6330_s6] ss:$0 sm:$0xff]  ;;  %v4678_v32 = vld [vmem:[%s4785_s14 + $0x10] sm:$0xff] }
 0x380   : > { %v3860_v3 = vmax.f32 %v3828_v45, 0.0  ;;  %4611 = vmatmul.msk.f32.gmra.mxu2 %vm561_vm1, %v3534_v41  ;;  %v2908_v45 = vadd.f32 %v5946_v6, %v6493_v62 }
 0x382   : > { %4626 = vmatmul.msk.f32.gmra.mxu3 %vm561_vm1, %v3860_v3  ;;  %v3421_v43 = vpop.f32.mrf.mxu1  ;;  %v3215_v3 = vadd.f32 %v3155_v56, %v2908_v45 }
 0x383   : > { %v3725_v14 = vpop.f32.mrf.mxu2  ;;  %v3487_v20 = vadd.f32 %v3421_v43, %v3212_v58  ;;  %v4676_v43 = vld [vmem:[%s4785_s14] sm:$0xff] }
 0x384   : > { %v3793_v13 = vadd.f32 %v3725_v14, %v3486_v52 }
 0x385   : > { %4579 = vmatmul.msk.f32.gmra.mxu1 %vm561_vm1, %v3260_v39 }
 0x386   : > { %v3829_v54 = vadd.f32 %v5951_v42, %v3793_v13  ;;  %v3164_v29 = vpop.f32.mrf.mxu0 }
 0x388   : > { %v3861_v24 = vmax.f32 %v3829_v54, 0.0  ;;  %4612 = vmatmul.msk.f32.gmra.mxu2 %vm561_vm1, %v3567_v31 }
 0x38a   : > { %4627 = vmatmul.msk.f32.gmra.mxu3 %vm561_vm1, %v3861_v24  ;;  %v3424_v60 = vpop.f32.mrf.mxu1  ;;  %v3216_v24 = vadd.f32 %v3158_v33, %v2909_v22 }
 0x38b   : > { %v3728_v5 = vpop.f32.mrf.mxu2  ;;  %v3488_v61 = vadd.f32 %v3424_v60, %v3213_v16  ;;  %v4677_v60 = vld [vmem:[%s4785_s14 + $0x8] sm:$0xff] }
 0x38c   : > { %v3794_v46 = vadd.f32 %v3728_v5, %v3487_v20 }
 0x38e   : > { %v3830_v8 = vadd.f32 %v5951_v42, %v3794_v46  ;;  %v3167_v46 = vpop.f32.mrf.mxu0 }
 0x390   : > { %v3862_v18 = vmax.f32 %v3830_v8, 0.0 }
 0x392   : > { %4628 = vmatmul.msk.f32.gmra.mxu3 %vm561_vm1, %v3862_v18  ;;  %v3427_v40 = vpop.f32.mrf.mxu1 }
 0x393   : > { %v3731_v34 = vpop.f32.mrf.mxu2  ;;  %v3489_v27 = vadd.f32 %v3427_v40, %v3214_v44 }
 0x394   : > { %v3795_v36 = vadd.f32 %v3731_v34, %v3488_v61  ;;  %v6495_v61 = vld [vmem:[#allocation26_spill] sm:$0xff] }
 0x395   : > { %v2910_v40 = vadd.f32 %v5973_v37, %v6495_v61 }
 0x396   : > { %v3831_v59 = vadd.f32 %v5951_v42, %v3795_v36 }
 0x397   : > { %v3217_v36 = vadd.f32 %v3161_v19, %v2910_v40 }
 0x398   : > { %v3863_v48 = vmax.f32 %v3831_v59, 0.0 }
 0x39a   : > { %4629 = vmatmul.msk.f32.gmra.mxu3 %vm561_vm1, %v3863_v48  ;;  %v3430_v41 = vpop.f32.mrf.mxu1 }
 0x39b   : > { %v3734_v0 = vpop.f32.mrf.mxu2  ;;  %v3490_v39 = vadd.f32 %v3430_v41, %v3215_v3  ;;  %v4679_v3 = vld [vmem:[%s4785_s14 + $0x18] sm:$0xff] }
 0x39c   : > { %v3796_v26 = vadd.f32 %v3734_v0, %v3489_v27  ;;  %v3170_v0 = vpop.f32.mrf.mxu0 }
 0x39d   : > { %v3997_v38 = vpop.f32.mrf.mxu3 }
 0x39e   : > { %v3832_v50 = vadd.f32 %v5951_v42, %v3796_v26  ;;  %v3998_v55 = vadd.f32 %v6126_v51, %v3997_v38  ;;  %v6496_v38 = vld [vmem:[#allocation4_spill] sm:$0xff] }
 0x39f   : > { %v2911_v62 = vadd.f32 %v5990_v49, %v6496_v38  ;;  %v4682_v38 = vld [vmem:[%s4785_s14 + $0x30] sm:$0xff] }
 0x3a0   : > { %v3864_v52 = vmax.f32 %v3832_v50, 0.0  ;;  %v4093_v14 = vadd.f32 %v4676_v43, %v3998_v55 }
 0x3a1   : > { %v3218_v50 = vadd.f32 %v3164_v29, %v2911_v62 }
 0x3a2   : > { %v4125_v13 = vmax.f32 %v4093_v14, 0.0  ;;  %4630 = vmatmul.msk.f32.gmra.mxu3 %vm561_vm1, %v3864_v52  ;;  %v3433_v6 = vpop.f32.mrf.mxu1 }
 0x3a3   : > { %v3737_v57 = vpop.f32.mrf.mxu2  ;;  %v3491_v2 = vadd.f32 %v3433_v6, %v3216_v24 }
 0x3a4   : > { %4157 = vst.msk [vmem:[%s6138_s28] sm:$0xff] %vm319_vm0, %v4125_v13  ;;  %v3797_v56 = vadd.f32 %v3737_v57, %v3490_v39  ;;  %v6497_v57 = vld [vmem:[#allocation25_spill] sm:$0xff] }
 0x3a5   : > { %v4000_v31 = vpop.f32.mrf.mxu3 }
 0x3a6   : > { %v3833_v54 = vadd.f32 %v5951_v42, %v3797_v56  ;;  %v4001_v58 = vadd.f32 %v6126_v51, %v4000_v31  ;;  %v2912_v56 = vadd.f32 %v6004_v17, %v6497_v57  ;;  %v3173_v31 = vpop.f32.mrf.mxu0  ;;  %v4683_v57 = vld [vmem:[%s4785_s14 + $0x38] sm:$0xff] }
 0x3a8   : > { %v3865_v20 = vmax.f32 %v3833_v54, 0.0  ;;  %v4094_v5 = vadd.f32 %v4677_v60, %v4001_v58  ;;  %v3219_v22 = vadd.f32 %v3167_v46, %v2912_v56  ;;  %v4680_v58 = vld [vmem:[%s4785_s14 + $0x20] sm:$0xff] }
 0x3aa   : > { %v4126_v53 = vmax.f32 %v4094_v5, 0.0  ;;  %4631 = vmatmul.msk.f32.gmra.mxu3 %vm561_vm1, %v3865_v20  ;;  %v3436_v8 = vpop.f32.mrf.mxu1 }
 0x3ab   : > { %v3740_v16 = vpop.f32.mrf.mxu2  ;;  %v3492_v44 = vadd.f32 %v3436_v8, %v3217_v36  ;;  %v6498_v8 = vld [vmem:[#allocation28_spill] sm:$0xff] }
 0x3ac   : > { %4158 = vst.msk [vmem:[%s6138_s28 + $0x8] sm:$0xff] %vm319_vm0, %v4126_v53  ;;  %v3798_v21 = vadd.f32 %v3740_v16, %v3491_v2  ;;  %v2913_v16 = vadd.f32 %v6017_v10, %v6498_v8 }
 0x3ad   : > { %v4003_v18 = vpop.f32.mrf.mxu3 }
 0x3ae   : > { %v3834_v33 = vadd.f32 %v5951_v42, %v3798_v21  ;;  %v4004_v34 = vadd.f32 %v6126_v51, %v4003_v18  ;;  %v3220_v18 = vadd.f32 %v3170_v0, %v2913_v16  ;;  %v3176_v61 = vpop.f32.mrf.mxu0 }
 0x3b0   : > { %v3866_v4 = vmax.f32 %v3834_v33, 0.0  ;;  %v4095_v59 = vadd.f32 %v4678_v32, %v4004_v34  ;;  %v4681_v33 = vld [vmem:[%s4785_s14 + $0x28] sm:$0xff] }
 0x3b2   : > { %v4127_v48 = vmax.f32 %v4095_v59, 0.0  ;;  %4632 = vmatmul.msk.f32.gmra.mxu3 %vm561_vm1, %v3866_v4  ;;  %v3439_v27 = vpop.f32.mrf.mxu1 }
 0x3b3   : > { %v3743_v41 = vpop.f32.mrf.mxu2  ;;  %v3493_v43 = vadd.f32 %v3439_v27, %v3218_v50 }
 0x3b4   : > { %4159 = vst.msk [vmem:[%s6138_s28 + $0x10] sm:$0xff] %vm319_vm0, %v4127_v48  ;;  %v3799_v37 = vadd.f32 %v3743_v41, %v3492_v44  ;;  %v6499_v48 = vld [vmem:[#allocation31_spill] sm:$0xff] }
 0x3b5   : > { %v4006_v26 = vpop.f32.mrf.mxu3  ;;  %v2914_v27 = vadd.f32 %v6031_v1, %v6499_v48 }
 0x3b6   : > { %v3835_v19 = vadd.f32 %v5951_v42, %v3799_v37  ;;  %v4007_v45 = vadd.f32 %v6126_v51, %v4006_v26 }
 0x3b7   : > { %v3221_v37 = vadd.f32 %v3173_v31, %v2914_v27 }
 0x3b8   : > { %v3867_v55 = vmax.f32 %v3835_v19, 0.0  ;;  %v4096_v52 = vadd.f32 %v4679_v3, %v4007_v45  ;;  %v3179_v19 = vpop.f32.mrf.mxu0 }
 0x3ba   : > { %v4128_v14 = vmax.f32 %v4096_v52, 0.0  ;;  %4633 = vmatmul.msk.f32.gmra.mxu3 %vm561_vm1, %v3867_v55  ;;  %v3442_v39 = vpop.f32.mrf.mxu1 }
 0x3bb   : > { %v3746_v13 = vpop.f32.mrf.mxu2  ;;  %v3494_v20 = vadd.f32 %v3442_v39, %v3219_v22 }
 0x3bc   : > { %4160 = vst.msk [vmem:[%s6138_s28 + $0x18] sm:$0xff] %vm319_vm0, %v4128_v14  ;;  %v3800_v6 = vadd.f32 %v3746_v13, %v3493_v43  ;;  %v6500_v43 = vld [vmem:[#allocation27_spill] sm:$0xff] }
 0x3bd   : > { %v4009_v49 = vpop.f32.mrf.mxu3  ;;  %v2915_v14 = vadd.f32 %v6048_v15, %v6500_v43 }
 0x3be   : > { %v3836_v29 = vadd.f32 %v5951_v42, %v3800_v6  ;;  %v4010_v7 = vadd.f32 %v6126_v51, %v4009_v49 }
 0x3bf   : > { %v3222_v6 = vadd.f32 %v3176_v61, %v2915_v14 }
 0x3c0   : > { %v3868_v54 = vmax.f32 %v3836_v29, 0.0  ;;  %v4097_v24 = vadd.f32 %v4680_v58, %v4010_v7  ;;  %v3182_v15 = vpop.f32.mrf.mxu0 }
 0x3c2   : > { %v4129_v60 = vmax.f32 %v4097_v24, 0.0  ;;  %4634 = vmatmul.msk.f32.gmra.mxu3 %vm561_vm1, %v3868_v54  ;;  %v3445_v5 = vpop.f32.mrf.mxu1  ;;  %v6501_v24 = vld [vmem:[#allocation5_spill] sm:$0xff] }
 0x3c3   : > { %v3749_v2 = vpop.f32.mrf.mxu2  ;;  %v3495_v36 = vadd.f32 %v3445_v5, %v3220_v18 }
 0x3c4   : > { %4161 = vst.msk [vmem:[%s6138_s28 + $0x20] sm:$0xff] %vm319_vm0, %v4129_v60  ;;  %v3801_v17 = vadd.f32 %v3749_v2, %v3494_v20  ;;  %v2916_v20 = vadd.f32 %v6061_v9, %v6501_v24 }
 0x3c5   : > { %v4012_v53 = vpop.f32.mrf.mxu3 }
 0x3c6   : > { %v3837_v46 = vadd.f32 %v5951_v42, %v3801_v17  ;;  %v4013_v21 = vadd.f32 %v6126_v51, %v4012_v53  ;;  %v3223_v2 = vadd.f32 %v3179_v19, %v2916_v20  ;;  %v4684_v53 = vld [vmem:[%s4785_s14 + $0x40] sm:$0xff] }
 0x3c8   : > { %v3869_v40 = vmax.f32 %v3837_v46, 0.0  ;;  %v4098_v34 = vadd.f32 %v4681_v33, %v4013_v21 }
 0x3ca   : > { %v4130_v4 = vmax.f32 %v4098_v34, 0.0  ;;  %4635 = vmatmul.msk.f32.gmra.mxu3 %vm561_vm1, %v3869_v40  ;;  %v3448_v32 = vpop.f32.mrf.mxu1  ;;  %v6502_v40 = vld [vmem:[#allocation33_spill] sm:$0xff] }
 0x3cb   : > { %v3752_v59 = vpop.f32.mrf.mxu2  ;;  %v3496_v45 = vadd.f32 %v3448_v32, %v3221_v37  ;;  %v2917_v33 = vadd.f32 %v6073_v23, %v6502_v40 }
 0x3cc   : > { %4162 = vst.msk [vmem:[%s6138_s28 + $0x28] sm:$0xff] %vm319_vm0, %v4130_v4  ;;  %v3802_v10 = vadd.f32 %v3752_v59, %v3495_v36  ;;  %v3185_v4 = vpop.f32.mrf.mxu0 }
 0x3cd   : > { %v4015_v44 = vpop.f32.mrf.mxu3  ;;  %v3224_v32 = vadd.f32 %v3182_v15, %v2917_v33 }
 0x3ce   : > { %v3838_v41 = vadd.f32 %v5951_v42, %v3802_v10  ;;  %v4016_v0 = vadd.f32 %v6126_v51, %v4015_v44  ;;  %v4685_v10 = vld [vmem:[%s4785_s14 + $0x48] sm:$0xff] }
 0x3d0   : > { %v3870_v26 = vmax.f32 %v3838_v41, 0.0  ;;  %v4099_v62 = vadd.f32 %v4682_v38, %v4016_v0 }
 0x3d2   : > { %v4131_v50 = vmax.f32 %v4099_v62, 0.0  ;;  %4636 = vmatmul.msk.f32.gmra.mxu3 %vm561_vm1, %v3870_v26  ;;  %v3451_v55 = vpop.f32.mrf.mxu1  ;;  %v2918_v26 = vadd.f32 %v6086_v25, %v5913_v47 }
 0x3d3   : > { %v3755_v3 = vpop.f32.mrf.mxu2  ;;  %v3497_v31 = vadd.f32 %v3451_v55, %v3222_v6 }
 0x3d4   : > { %4163 = vst.msk [vmem:[%s6138_s28 + $0x30] sm:$0xff] %vm319_vm0, %v4131_v50  ;;  %v3803_v1 = vadd.f32 %v3755_v3, %v3496_v45  ;;  %v3225_v19 = vadd.f32 %v3185_v4, %v2918_v26  ;;  %v4686_v50 = vld [vmem:[%s4785_s14 + $0x50] sm:$0xff]  ;;  %v3188_v3 = vpop.f32.mrf.mxu0  ;;  %v4691_v26 = vld [vmem:[%s4785_s14 + $0x78] sm:$0xff] }
 0x3d5   : > { %v4018_v52 = vpop.f32.mrf.mxu3 }
 0x3d6   : > { %v3839_v39 = vadd.f32 %v5951_v42, %v3803_v1  ;;  %v4019_v13 = vadd.f32 %v6126_v51, %v4018_v52 }
 0x3d8   : > { %v3871_v49 = vmax.f32 %v3839_v39, 0.0  ;;  %v4100_v56 = vadd.f32 %v4683_v57, %v4019_v13  ;;  %v2919_v39 = vadd.f32 %v6100_v35, %v5920_v11 }
 0x3da   : > { %v4132_v29 = vmax.f32 %v4100_v56, 0.0  ;;  %4637 = vmatmul.msk.f32.gmra.mxu3 %vm561_vm1, %v3871_v49  ;;  %v3454_v7 = vpop.f32.mrf.mxu1  ;;  %v3226_v49 = vadd.f32 %v3188_v3, %v2919_v39  ;;  %v4687_v56 = vld [vmem:[%s4785_s14 + $0x58] sm:$0xff]  ;;  %v4694_v39 = vld [vmem:[%s4785_s14 + $0x90] sm:$0xff] }
 0x3db   : > { %v3758_v22 = vpop.f32.mrf.mxu2  ;;  %v3498_v16 = vadd.f32 %v3454_v7, %v3223_v2  ;;  %v4688_v2 = vld [vmem:[%s4785_s14 + $0x60] sm:$0xff] }
 0x3dc   : > { %4164 = vst.msk [vmem:[%s6138_s28 + $0x38] sm:$0xff] %vm319_vm0, %v4132_v29  ;;  %v3804_v54 = vadd.f32 %v3758_v22, %v3497_v31  ;;  %v3191_v22 = vpop.f32.mrf.mxu0 }
 0x3dd   : > { %v4021_v58 = vpop.f32.mrf.mxu3 }
 0x3de   : > { %v3840_v60 = vadd.f32 %v5951_v42, %v3804_v54  ;;  %v4022_v5 = vadd.f32 %v6126_v51, %v4021_v58  ;;  %v2920_v58 = vadd.f32 %v6110_v63, %v5929_v28  ;;  %v2921_v63 = vadd.f32 %v6117_v12, %v5938_v30 }
 0x3e0   : > { %v3872_v17 = vmax.f32 %v3840_v60, 0.0  ;;  %v4101_v8 = vadd.f32 %v4684_v53, %v4022_v5  ;;  %v3227_v60 = vadd.f32 %v3191_v22, %v2920_v58 }
 0x3e2   : > { %v4133_v46 = vmax.f32 %v4101_v8, 0.0  ;;  %4638 = vmatmul.msk.f32.gmra.mxu3 %vm561_vm1, %v3872_v17  ;;  %v3457_v21 = vpop.f32.mrf.mxu1 }
 0x3e3   : > { %v3761_v18 = vpop.f32.mrf.mxu2  ;;  %v3499_v48 = vadd.f32 %v3457_v21, %v3224_v32 }
 0x3e4   : > { %4165 = vst.msk [vmem:[%s6138_s28 + $0x40] sm:$0xff] %vm319_vm0, %v4133_v46  ;;  %v3805_v61 = vadd.f32 %v3761_v18, %v3498_v16  ;;  %v3194_v21 = vpop.f32.mrf.mxu0 }
 0x3e5   : > { %v4024_v9 = vpop.f32.mrf.mxu3  ;;  %v3228_v40 = vadd.f32 %v3194_v21, %v2921_v63  ;;  %v4699_v21 = vld [vmem:[%s4785_s14 + $0xb8] sm:$0xff] }
 0x3e6   : > { %v3841_v34 = vadd.f32 %v5951_v42, %v3805_v61  ;;  %v4025_v36 = vadd.f32 %v6126_v51, %v4024_v9 }
 0x3e8   : > { %v3873_v59 = vmax.f32 %v3841_v34, 0.0  ;;  %v4102_v44 = vadd.f32 %v4685_v10, %v4025_v36  ;;  %v4689_v34 = vld [vmem:[%s4785_s14 + $0x68] sm:$0xff] }
 0x3ea   : > { %v4134_v27 = vmax.f32 %v4102_v44, 0.0  ;;  %4639 = vmatmul.msk.f32.gmra.mxu3 %vm561_vm1, %v3873_v59  ;;  %v3460_v41 = vpop.f32.mrf.mxu1 }
 0x3eb   : > { %v3764_v0 = vpop.f32.mrf.mxu2  ;;  %v3500_v1 = vadd.f32 %v3460_v41, %v3225_v19 }
 0x3ec   : > { %4166 = vst.msk [vmem:[%s6138_s28 + $0x48] sm:$0xff] %vm319_vm0, %v4134_v27  ;;  %v3806_v23 = vadd.f32 %v3764_v0, %v3499_v48  ;;  %v4690_v27 = vld [vmem:[%s4785_s14 + $0x70] sm:$0xff] }
 0x3ed   : > { %v4027_v37 = vpop.f32.mrf.mxu3 }
 0x3ee   : > { %v3842_v38 = vadd.f32 %v5951_v42, %v3806_v23  ;;  %v4028_v62 = vadd.f32 %v6126_v51, %v4027_v37 }
 0x3f0   : > { %v3874_v45 = vmax.f32 %v3842_v38, 0.0  ;;  %v4103_v55 = vadd.f32 %v4686_v50, %v4028_v62 }
 0x3f2   : > { %v4135_v52 = vmax.f32 %v4103_v55, 0.0  ;;  %4640 = vmatmul.msk.f32.gmra.mxu3 %vm561_vm1, %v3874_v45  ;;  %v3463_v43 = vpop.f32.mrf.mxu1  ;;  %v4692_v45 = vld [vmem:[%s4785_s14 + $0x80] sm:$0xff] }
 0x3f3   : > { %v3767_v14 = vpop.f32.mrf.mxu2  ;;  %v3501_v29 = vadd.f32 %v3463_v43, %v3226_v49 }
 0x3f4   : > { %4167 = vst.msk [vmem:[%s6138_s28 + $0x50] sm:$0xff] %vm319_vm0, %v4135_v52  ;;  %v3807_v47 = vadd.f32 %v3767_v14, %v3500_v1  ;;  %v4693_v52 = vld [vmem:[%s4785_s14 + $0x88] sm:$0xff] }
 0x3f5   : > { %v4030_v25 = vpop.f32.mrf.mxu3 }
 0x3f6   : > { %v3843_v13 = vadd.f32 %v5951_v42, %v3807_v47  ;;  %v4031_v6 = vadd.f32 %v6126_v51, %v4030_v25 }
 0x3f8   : > { %v3875_v57 = vmax.f32 %v3843_v13, 0.0  ;;  %v4104_v31 = vadd.f32 %v4687_v56, %v4031_v6  ;;  %v4695_v56 = vld [vmem:[%s4785_s14 + $0x98] sm:$0xff] }
 0x3fa   : > { %v4136_v7 = vmax.f32 %v4104_v31, 0.0  ;;  %4641 = vmatmul.msk.f32.gmra.mxu3 %vm561_vm1, %v3875_v57  ;;  %v3466_v11 = vpop.f32.mrf.mxu1 }
 0x3fb   : > { %v3770_v54 = vpop.f32.mrf.mxu2  ;;  %v3502_v53 = vadd.f32 %v3466_v11, %v3227_v60 }
 0x3fc   : > { %4168 = vst.msk [vmem:[%s6138_s28 + $0x58] sm:$0xff] %vm319_vm0, %v4136_v7  ;;  %v3808_v15 = vadd.f32 %v3770_v54, %v3501_v29  ;;  %v4696_v54 = vld [vmem:[%s4785_s14 + $0xa0] sm:$0xff] }
 0x3fd   : > { %v4033_v35 = vpop.f32.mrf.mxu3 }
 0x3fe   : > { %v3844_v24 = vadd.f32 %v5951_v42, %v3808_v15  ;;  %v4034_v20 = vadd.f32 %v6126_v51, %v4033_v35 }
 0x400   : > { %v3876_v5 = vmax.f32 %v3844_v24, 0.0  ;;  %v4105_v17 = vadd.f32 %v4688_v2, %v4034_v20  ;;  %v4697_v24 = vld [vmem:[%s4785_s14 + $0xa8] sm:$0xff] }
 0x402   : > { %v4137_v8 = vmax.f32 %v4105_v17, 0.0  ;;  %4642 = vmatmul.msk.f32.gmra.mxu3 %vm561_vm1, %v3876_v5  ;;  %v3469_v9 = vpop.f32.mrf.mxu1  ;;  %v4698_v17 = vld [vmem:[%s4785_s14 + $0xb0] sm:$0xff] }
 0x403   : > { %v3773_v16 = vpop.f32.mrf.mxu2  ;;  %v3503_v4 = vadd.f32 %v3469_v9, %v3228_v40  ;;  %v4700_v9 = vld [vmem:[%s4785_s14 + $0xc0] sm:$0xff] }
 0x404   : > { %4169 = vst.msk [vmem:[%s6138_s28 + $0x60] sm:$0xff] %vm319_vm0, %v4137_v8  ;;  %v3809_v46 = vadd.f32 %v3773_v16, %v3502_v53 }
 0x405   : > { %v4036_v28 = vpop.f32.mrf.mxu3 }
 0x406   : > { %v3845_v18 = vadd.f32 %v5951_v42, %v3809_v46  ;;  %v4037_v61 = vadd.f32 %v6126_v51, %v4036_v28 }
 0x408   : > { %v3877_v33 = vmax.f32 %v3845_v18, 0.0  ;;  %v4106_v36 = vadd.f32 %v4689_v34, %v4037_v61 }
 0x40a   : > { %v4138_v32 = vmax.f32 %v4106_v36, 0.0  ;;  %4643 = vmatmul.msk.f32.gmra.mxu3 %vm561_vm1, %v3877_v33 }
 0x40b   : > { %v3776_v59 = vpop.f32.mrf.mxu2 }
 0x40c   : > { %4170 = vst.msk [vmem:[%s6138_s28 + $0x68] sm:$0xff] %vm319_vm0, %v4138_v32  ;;  %v3810_v30 = vadd.f32 %v3776_v59, %v3503_v4  ;;  %v4701_v4 = vld [vmem:[%s4785_s14 + $0xc8] sm:$0xff] }
 0x40d   : > { %v4039_v12 = vpop.f32.mrf.mxu3 }
 0x40e   : > { %v3846_v10 = vadd.f32 %v5951_v42, %v3810_v30  ;;  %v4040_v44 = vadd.f32 %v6126_v51, %v4039_v12 }
 0x410   : > { %v3878_v48 = vmax.f32 %v3846_v10, 0.0  ;;  %v4107_v41 = vadd.f32 %v4690_v27, %v4040_v44  ;;  %v4702_v10 = vld [vmem:[%s4785_s14 + $0xd0] sm:$0xff] }
 0x412   : > { %v4139_v0 = vmax.f32 %v4107_v41, 0.0  ;;  %4644 = vmatmul.msk.f32.gmra.mxu3 %vm561_vm1, %v3878_v48 }
 0x414   : > { %4171 = vst.msk [vmem:[%s6138_s28 + $0x70] sm:$0xff] %vm319_vm0, %v4139_v0  ;;  %v4703_v0 = vld [vmem:[%s4785_s14 + $0xd8] sm:$0xff] }
 0x415   : > { %v4042_v23 = vpop.f32.mrf.mxu3 }
 0x416   : > { %v4043_v37 = vadd.f32 %v6126_v51, %v4042_v23 }
 0x418   : > { %v4108_v38 = vadd.f32 %v4691_v26, %v4043_v37 }
 0x41a   : > { %v4140_v42 = vmax.f32 %v4108_v38, 0.0 }
 0x41c   : > { %4172 = vst.msk [vmem:[%s6138_s28 + $0x78] sm:$0xff] %vm319_vm0, %v4140_v42  ;;  %v4704_v42 = vld [vmem:[%s4785_s14 + $0xe0] sm:$0xff] }
 0x41d   : > { %v4045_v62 = vpop.f32.mrf.mxu3 }
 0x41e   : > { %v4046_v19 = vadd.f32 %v6126_v51, %v4045_v62 }
 0x420   : > { %v4109_v50 = vadd.f32 %v4692_v45, %v4046_v19 }
 0x422   : > { %v4141_v55 = vmax.f32 %v4109_v50, 0.0 }
 0x424   : > { %4173 = vst.msk [vmem:[%s6138_s28 + $0x80] sm:$0xff] %vm319_vm0, %v4141_v55  ;;  %v4705_v55 = vld [vmem:[%s4785_s14 + $0xe8] sm:$0xff] }
 0x425   : > { %v4048_v3 = vpop.f32.mrf.mxu3 }
 0x426   : > { %v4049_v1 = vadd.f32 %v6126_v51, %v4048_v3 }
 0x428   : > { %v4110_v43 = vadd.f32 %v4693_v52, %v4049_v1 }
 0x42a   : > { %v4142_v14 = vmax.f32 %v4110_v43, 0.0 }
 0x42c   : > { %4174 = vst.msk [vmem:[%s6138_s28 + $0x88] sm:$0xff] %vm319_vm0, %v4142_v14  ;;  %v4706_v14 = vld [vmem:[%s4785_s14 + $0xf0] sm:$0xff] }
 0x42d   : > { %v4051_v47 = vpop.f32.mrf.mxu3 }
 0x42e   : > { %v4052_v25 = vadd.f32 %v6126_v51, %v4051_v47 }
 0x430   : > { %v4111_v13 = vadd.f32 %v4694_v39, %v4052_v25 }
 0x432   : > { %v4143_v6 = vmax.f32 %v4111_v13, 0.0 }
 0x434   : > { %4175 = vst.msk [vmem:[%s6138_s28 + $0x90] sm:$0xff] %vm319_vm0, %v4143_v6  ;;  %v4707_v6 = vld [vmem:[%s4785_s14 + $0xf8] sm:$0xff] }
 0x435   : > { %v4054_v49 = vpop.f32.mrf.mxu3 }
 0x436   : > { %v4055_v57 = vadd.f32 %v6126_v51, %v4054_v49 }
 0x438   : > { %v4112_v31 = vadd.f32 %v4695_v56, %v4055_v57 }
 0x43a   : > { %v4144_v29 = vmax.f32 %v4112_v31, 0.0 }
 0x43c   : > { %4176 = vst.msk [vmem:[%s6138_s28 + $0x98] sm:$0xff] %vm319_vm0, %v4144_v29 }
 0x43d   : > { %v4057_v7 = vpop.f32.mrf.mxu3 }
 0x43e   : > { %v4058_v22 = vadd.f32 %v6126_v51, %v4057_v7 }
 0x440   : > { %v4113_v15 = vadd.f32 %v4696_v54, %v4058_v22 }
 0x442   : > { %v4145_v11 = vmax.f32 %v4113_v15, 0.0 }
 0x444   : > { %4177 = vst.msk [vmem:[%s6138_s28 + $0xa0] sm:$0xff] %vm319_vm0, %v4145_v11 }
 0x445   : > { %v4060_v35 = vpop.f32.mrf.mxu3 }
 0x446   : > { %v4061_v58 = vadd.f32 %v6126_v51, %v4060_v35 }
 0x448   : > { %v4114_v20 = vadd.f32 %v4697_v24, %v4061_v58 }
 0x44a   : > { %v4146_v60 = vmax.f32 %v4114_v20, 0.0 }
 0x44c   : > { %4178 = vst.msk [vmem:[%s6138_s28 + $0xa8] sm:$0xff] %vm319_vm0, %v4146_v60 }
 0x44d   : > { %v4063_v5 = vpop.f32.mrf.mxu3 }
 0x44e   : > { %v4064_v2 = vadd.f32 %v6126_v51, %v4063_v5 }
 0x450   : > { %v4115_v53 = vadd.f32 %v4698_v17, %v4064_v2 }
 0x452   : > { %v4147_v8 = vmax.f32 %v4115_v53, 0.0 }
 0x454   : > { %4179 = vst.msk [vmem:[%s6138_s28 + $0xb0] sm:$0xff] %vm319_vm0, %v4147_v8 }
 0x455   : > { %v4066_v16 = vpop.f32.mrf.mxu3 }
 0x456   : > { %v4067_v46 = vadd.f32 %v6126_v51, %v4066_v16 }
 0x458   : > { %v4116_v28 = vadd.f32 %v4699_v21, %v4067_v46 }
 0x45a   : > { %v4148_v63 = vmax.f32 %v4116_v28, 0.0 }
 0x45c   : > { %4180 = vst.msk [vmem:[%s6138_s28 + $0xb8] sm:$0xff] %vm319_vm0, %v4148_v63 }
 0x45d   : > { %v4069_v18 = vpop.f32.mrf.mxu3 }
 0x45e   : > { %v4070_v61 = vadd.f32 %v6126_v51, %v4069_v18 }
 0x460   : > { %v4117_v40 = vadd.f32 %v4700_v9, %v4070_v61 }
 0x462   : > { %v4149_v33 = vmax.f32 %v4117_v40, 0.0 }
 0x464   : > { %4181 = vst.msk [vmem:[%s6138_s28 + $0xc0] sm:$0xff] %vm319_vm0, %v4149_v33 }
 0x465   : > { %v4072_v34 = vpop.f32.mrf.mxu3 }
 0x466   : > { %v4073_v36 = vadd.f32 %v6126_v51, %v4072_v34 }
 0x468   : > { %v4118_v32 = vadd.f32 %v4701_v4, %v4073_v36 }
 0x46a   : > { %v4150_v59 = vmax.f32 %v4118_v32, 0.0 }
 0x46c   : > { %4182 = vst.msk [vmem:[%s6138_s28 + $0xc8] sm:$0xff] %vm319_vm0, %v4150_v59 }
 0x46d   : > { %v4075_v30 = vpop.f32.mrf.mxu3 }
 0x46e   : > { %v4076_v12 = vadd.f32 %v6126_v51, %v4075_v30 }
 0x470   : > { %v4119_v44 = vadd.f32 %v4702_v10, %v4076_v12 }
 0x472   : > { %v4151_v48 = vmax.f32 %v4119_v44, 0.0 }
 0x474   : > { %4183 = vst.msk [vmem:[%s6138_s28 + $0xd0] sm:$0xff] %vm319_vm0, %v4151_v48 }
 0x475   : > { %v4078_v27 = vpop.f32.mrf.mxu3 }
 0x476   : > { %v4079_v41 = vadd.f32 %v6126_v51, %v4078_v27 }
 0x478   : > { %v4120_v23 = vadd.f32 %v4703_v0, %v4079_v41 }
 0x47a   : > { %v4152_v37 = vmax.f32 %v4120_v23, 0.0 }
 0x47c   : > { %4184 = vst.msk [vmem:[%s6138_s28 + $0xd8] sm:$0xff] %vm319_vm0, %v4152_v37 }
 0x47d   : > { %v4081_v26 = vpop.f32.mrf.mxu3 }
 0x47e   : > { %v4082_v38 = vadd.f32 %v6126_v51, %v4081_v26 }
 0x480   : > { %v4121_v62 = vadd.f32 %v4704_v42, %v4082_v38 }
 0x482   : > { %v4153_v19 = vmax.f32 %v4121_v62, 0.0 }
 0x484   : > { %4185 = vst.msk [vmem:[%s6138_s28 + $0xe0] sm:$0xff] %vm319_vm0, %v4153_v19 }
 0x485   : > { %v4084_v45 = vpop.f32.mrf.mxu3 }
 0x486   : > { %v4085_v50 = vadd.f32 %v6126_v51, %v4084_v45 }
 0x488   : > { %v4122_v3 = vadd.f32 %v4705_v55, %v4085_v50 }
 0x48a   : > { %v4154_v1 = vmax.f32 %v4122_v3, 0.0 }
 0x48c   : > { %4186 = vst.msk [vmem:[%s6138_s28 + $0xe8] sm:$0xff] %vm319_vm0, %v4154_v1 }
 0x48d   : > { %v4087_v52 = vpop.f32.mrf.mxu3 }
 0x48e   : > { %v4088_v43 = vadd.f32 %v6126_v51, %v4087_v52 }
 0x490   : > { %v4123_v47 = vadd.f32 %v4706_v14, %v4088_v43 }
 0x492   : > { %v4155_v25 = vmax.f32 %v4123_v47, 0.0 }
 0x494   : > { %4187 = vst.msk [vmem:[%s6138_s28 + $0xf0] sm:$0xff] %vm319_vm0, %v4155_v25 }
 0x495   : > { %v4090_v39 = vpop.f32.mrf.mxu3 }
 0x496   : > { %v4091_v13 = vadd.f32 %v6126_v51, %v4090_v39 }
 0x498   : > { %v4124_v49 = vadd.f32 %v4707_v6, %v4091_v13 }
 0x49a   : > { %v4156_v57 = vmax.f32 %v4124_v49, 0.0 }
 0x49c   : > { %4188 = vst.msk [vmem:[%s6138_s28 + $0xf8] sm:$0xff] %vm319_vm0, %v4156_v57 }
 0x49d PF: > { %s17_s24 = sadd.s32 1, %s4714_s24  }
 0x49e   : > { %p14_p4 = scmp.ge.s32.totalorder %s17_s24, 4  }
 0x4a0   :  { %16 = sbr.rel (!%p14_p4) target bundleno = 1 (0x1), region = 86 }

</bundles_post_ra>
